<compile_context>
chip_gen: v5e
topology: v5e:2x2
jax: 0.10.0
libtpu: 0.0.40
codegen_flags: <defaults>
</compile_context>

<pallas_src>
import jax
import jax.numpy as jnp
from jax.experimental import pallas as pl
from jax.experimental.pallas import tpu as pltpu

EPS = 1e-5
LANE = 128
OUT_DIM = 71
VMEM_LIMIT = 40 << 20  # < 64 MiB physical on v7x, lifts v5e's 16 MiB default


def _round_up(x, m):
    return (x + m - 1) // m * m


def _make_layer_kernel(*, first, last, n_rows, tile_rows, mask):
    """Fused (BN -> ReLU ->) bf16 matmul (-> batch-stats) kernel body."""

    def kernel(*refs):
        if first:
            x_ref, w_ref = refs[0], refs[1]
            out_refs = refs[2:]
            act = x_ref[...]
        else:
            h_ref, s_ref, q_ref, g_ref, be_ref, w_ref = refs[:6]
            rest = refs[6:]
            if last:
                b_ref = rest[0]
                out_refs = rest[1:]
            else:
                out_refs = rest
            inv_n = jnp.float32(1.0 / n_rows)
            mean = s_ref[...] * inv_n
            var = jnp.maximum(q_ref[...] * inv_n - mean * mean, 0.0)
            h = (h_ref[...] - mean) * jax.lax.rsqrt(var + EPS)
            h = h * g_ref[...] + be_ref[...]
            act = jnp.maximum(h, 0.0)

        # MXU matmul: bf16 operands, f32 accumulation.
        y = jnp.dot(act.astype(jnp.bfloat16), w_ref[...],
                    preferred_element_type=jnp.float32)

        if last:
            out_refs[0][...] = y + b_ref[...]
            return

        h_out_ref, s_out_ref, q_out_ref = out_refs
        h_out_ref[...] = y

        ys = y
        if mask:  # padded batch rows must not pollute the BN statistics
            i = pl.program_id(0)
            row = jax.lax.broadcasted_iota(jnp.int32, y.shape, 0)
            ys = jnp.where(i * tile_rows + row < n_rows, y, 0.0)

        @pl.when(pl.program_id(0) == 0)
        def _():
            s_out_ref[...] = jnp.zeros_like(s_out_ref)
            q_out_ref[...] = jnp.zeros_like(q_out_ref)

        s_out_ref[...] += jnp.sum(ys, axis=0, keepdims=True)
        q_out_ref[...] += jnp.sum(ys * ys, axis=0, keepdims=True)

    return kernel


def mlp2_forward(x, params, *, tile_rows=256):
    """x: [N, 40*(2K+1)] float32; params: dict of arrays (see init_params)."""
    n, f_in = x.shape
    f_pad = _round_up(f_in, LANE)        # 120 -> 128
    out_pad = _round_up(OUT_DIM, LANE)   # 71  -> 128
    tile_rows = min(tile_rows, _round_up(n, 8))
    n_pad = _round_up(n, tile_rows)
    num_tiles = n_pad // tile_rows
    mask = n_pad != n

    # ---- glue: lane padding + bf16 matmul operands ----
    x_p = jnp.zeros((n_pad, f_pad), jnp.bfloat16).at[:n, :f_in].set(
        x.astype(jnp.bfloat16))
    w1 = jnp.zeros((f_pad, 1024), jnp.bfloat16).at[:f_in, :].set(
        params["w1"].T.astype(jnp.bfloat16))
    w2 = params["w2"].T.astype(jnp.bfloat16)
    w3 = params["w3"].T.astype(jnp.bfloat16)
    w4 = jnp.zeros((256, out_pad), jnp.bfloat16).at[:, :OUT_DIM].set(
        params["w4"].T.astype(jnp.bfloat16))
    b4 = jnp.zeros((1, out_pad), jnp.float32).at[0, :OUT_DIM].set(params["b4"])
    # b1..b3 are intentionally NOT used: Linear bias followed by training-mode
    # BatchNorm is exactly cancelled by the batch-mean subtraction.

    cp_arb = pltpu.CompilerParams(dimension_semantics=("arbitrary",),
                                  vmem_limit_bytes=VMEM_LIMIT)
    cp_par = pltpu.CompilerParams(dimension_semantics=("parallel",),
                                  vmem_limit_bytes=VMEM_LIMIT)

    def hidden_layer(inputs, in_specs, d_out, first):
        kern = _make_layer_kernel(first=first, last=False, n_rows=n,
                                  tile_rows=tile_rows, mask=mask)
        return pl.pallas_call(
            kern,
            grid=(num_tiles,),
            in_specs=in_specs,
            out_specs=[
                pl.BlockSpec((tile_rows, d_out), lambda i: (i, 0)),  # pre-BN h
                pl.BlockSpec((1, d_out), lambda i: (0, 0)),          # sum
                pl.BlockSpec((1, d_out), lambda i: (0, 0)),          # sum sq
            ],
            out_shape=[
                jax.ShapeDtypeStruct((n_pad, d_out), jnp.float32),
                jax.ShapeDtypeStruct((1, d_out), jnp.float32),
                jax.ShapeDtypeStruct((1, d_out), jnp.float32),
            ],
            compiler_params=cp_arb,
        )(*inputs)

    # layer 1: x @ W1, accumulate batch stats
    h1, s1, q1 = hidden_layer(
        (x_p, w1),
        [pl.BlockSpec((tile_rows, f_pad), lambda i: (i, 0)),
         pl.BlockSpec((f_pad, 1024), lambda i: (0, 0))],
        1024, first=True)

    def mid_inputs(h, s, q, g, be, w, d_in):
        specs = [pl.BlockSpec((tile_rows, d_in), lambda i: (i, 0)),
                 pl.BlockSpec((1, d_in), lambda i: (0, 0)),
                 pl.BlockSpec((1, d_in), lambda i: (0, 0)),
                 pl.BlockSpec((1, d_in), lambda i: (0, 0)),
                 pl.BlockSpec((1, d_in), lambda i: (0, 0)),
                 pl.BlockSpec((d_in, w.shape[1]), lambda i: (0, 0))]
        return (h, s, q, g[None, :], be[None, :], w), specs

    # layer 2: BN1 + ReLU + @W2, accumulate stats
    ins, specs = mid_inputs(h1, s1, q1, params["g1"], params["be1"], w2, 1024)
    h2, s2, q2 = hidden_layer(ins, specs, 512, first=False)

    # layer 3: BN2 + ReLU + @W3, accumulate stats
    ins, specs = mid_inputs(h2, s2, q2, params["g2"], params["be2"], w3, 512)
    h3, s3, q3 = hidden_layer(ins, specs, 256, first=False)

    # layer 4: BN3 + ReLU + @W4 + b4 (lane-padded output, no stats)
    kern = _make_layer_kernel(first=False, last=True, n_rows=n,
                              tile_rows=tile_rows, mask=mask)
    out = pl.pallas_call(
        kern,
        grid=(num_tiles,),
        in_specs=[pl.BlockSpec((tile_rows, 256), lambda i: (i, 0)),
                  pl.BlockSpec((1, 256), lambda i: (0, 0)),
                  pl.BlockSpec((1, 256), lambda i: (0, 0)),
                  pl.BlockSpec((1, 256), lambda i: (0, 0)),
                  pl.BlockSpec((1, 256), lambda i: (0, 0)),
                  pl.BlockSpec((256, out_pad), lambda i: (0, 0)),
                  pl.BlockSpec((1, out_pad), lambda i: (0, 0))],
        out_specs=pl.BlockSpec((tile_rows, out_pad), lambda i: (i, 0)),
        out_shape=jax.ShapeDtypeStruct((n_pad, out_pad), jnp.float32),
        compiler_params=cp_par,
    )(h3, s3, q3, params["g3"][None, :], params["be3"][None, :], w4, b4)

    return out[:n, :OUT_DIM]


def init_params(key, in_dim):
    """Deterministic synthetic parameters mirroring the PyTorch module shapes."""
    dims = [(in_dim, 1024), (1024, 512), (512, 256), (256, 71)]
    params = {}
    for i, (fan_in, fan_out) in enumerate(dims, start=1):
        key, kw, kb = jax.random.split(key, 3)
        bound = 1.0 / jnp.sqrt(jnp.float32(fan_in))
        params[f"w{i}"] = jax.random.uniform(
            kw, (fan_out, fan_in), jnp.float32, -bound, bound)
        params[f"b{i}"] = jax.random.uniform(
            kb, (fan_out,), jnp.float32, -bound, bound)
        if i <= 3:  # BatchNorm1d default init: gamma=1, beta=0
            params[f"g{i}"] = jnp.ones((fan_out,), jnp.float32)
            params[f"be{i}"] = jnp.zeros((fan_out,), jnp.float32)
    return params


def mlp2_reference_f32(x, params):
    """Pure-f32, PyTorch-faithful reference (training-mode BN, biases kept)."""
    h = x
    for i in range(1, 4):
        h = h @ params[f"w{i}"].T + params[f"b{i}"]
        mean = jnp.mean(h, axis=0, keepdims=True)
        var = jnp.mean((h - mean) ** 2, axis=0, keepdims=True)
        h = (h - mean) / jnp.sqrt(var + EPS)
        h = h * params[f"g{i}"][None, :] + params[f"be{i}"][None, :]
        h = jnp.maximum(h, 0.0)
    return h @ params["w4"].T + params["b4"]


def mlp2_reference_matched(x, params):
    """Pure-JAX reference matching the kernel's numerics: bf16 matmul operands,
    f32 accumulation, E[h^2]-mean^2 variance, BN-cancelled biases dropped."""
    def dot_bf16(a, w_t):
        return jnp.dot(a.astype(jnp.bfloat16), w_t.astype(jnp.bfloat16),
                       preferred_element_type=jnp.float32)

    h = dot_bf16(x, params["w1"].T)
    for i in range(1, 4):
        mean = jnp.mean(h, axis=0, keepdims=True)
        var = jnp.maximum(jnp.mean(h * h, axis=0, keepdims=True) - mean * mean, 0.0)
        h = (h - mean) * jax.lax.rsqrt(var + EPS)
        h = jnp.maximum(h * params[f"g{i}"][None, :] + params[f"be{i}"][None, :], 0.0)
        h = dot_bf16(h, params[f"w{i + 1}"].T)
    return h + params["b4"][None, :]


if __name__ == "__main__":
    K = 1                       # context width -> input features = 40*(2K+1) = 120
    in_dim = 40 * (2 * K + 1)
    batch = 400                 # >= 128 rows per MXU tile; not a multiple of the
                                # 256-row tile so the masked-stats path is exercised

    key = jax.random.PRNGKey(0)
    key, kx = jax.random.split(key)
    x = jax.random.normal(kx, (batch, in_dim), jnp.float32)
    params = init_params(key, in_dim)

    out = mlp2_forward(x, params)
    jax.block_until_ready(out)
    assert out.shape == (batch, OUT_DIM)

    ref = mlp2_reference_matched(x, params)
    assert jnp.allclose(out, ref, atol=2e-2, rtol=2e-2), "mismatch vs reference"

    print("KERNEL_OK")
</pallas_src>

<mosaic_0001>
module attributes {stable_mosaic.version = 11 : i64} {
  func.func @kernel(%arg0: i32, %arg1: memref<256x128xbf16, #tpu.memory_space<vmem>>, %arg2: memref<128x1024xbf16, #tpu.memory_space<vmem>>, %arg3: memref<256x1024xf32, #tpu.memory_space<vmem>>, %arg4: memref<1x1024xf32, #tpu.memory_space<vmem>>, %arg5: memref<1x1024xf32, #tpu.memory_space<vmem>>) attributes {dimension_semantics = [#tpu.dimension_semantics<arbitrary>], iteration_bounds = array<i64: 2>, scalar_prefetch = 0 : i64, scratch_operands = 0 : i64, tpu.core_type = #tpu.core_type<tc>, window_params = [{transform_indices = @transform_0, window_bounds = array<i64: 256, 128>}, {pipeline_mode = #tpu.pipeline_mode<synchronous>, transform_indices = @transform_1, window_bounds = array<i64: 128, 1024>}, {transform_indices = @transform_2, window_bounds = array<i64: 256, 1024>}, {pipeline_mode = #tpu.pipeline_mode<synchronous>, transform_indices = @transform_3, window_bounds = array<i64: 1, 1024>}, {pipeline_mode = #tpu.pipeline_mode<synchronous>, transform_indices = @transform_4, window_bounds = array<i64: 1, 1024>}]} {
    %c0 = arith.constant 0 : index
    %c0_0 = arith.constant 0 : index
    %0 = vector.load %arg1[%c0, %c0_0] : memref<256x128xbf16, #tpu.memory_space<vmem>>, vector<256x128xbf16>
    %c0_1 = arith.constant 0 : index
    %c0_2 = arith.constant 0 : index
    %1 = vector.load %arg2[%c0_1, %c0_2] : memref<128x1024xbf16, #tpu.memory_space<vmem>>, vector<128x1024xbf16>
    %cst = arith.constant dense<0.000000e+00> : vector<256x1024xf32>
    %2 = tpu.matmul %0, %1, %cst {dimension_numbers = #tpu.dot_dimension_numbers<[1], [0], [0], [1], [0, 0, 1, 1], [], []>} : vector<256x128xbf16>, vector<128x1024xbf16>, vector<256x1024xf32> -> vector<256x1024xf32>
    %c0_3 = arith.constant 0 : index
    %c0_4 = arith.constant 0 : index
    %3 = vector.load %arg3[%c0_3, %c0_4] : memref<256x1024xf32, #tpu.memory_space<vmem>>, vector<256x1024xf32>
    tpu.vector_store %arg3[%c0_3, %c0_4], %2 {strides = array<i32>} : memref<256x1024xf32, #tpu.memory_space<vmem>>, vector<256x1024xf32>,
    %4 = tpu.iota {dimensions = array<i32: 0>} : vector<256x1024xi32>
    %c256_i32 = arith.constant 256 : i32
    %5 = arith.muli %arg0, %c256_i32 : i32
    %6 = vector.broadcast %5 : i32 to vector<256x1024xi32>
    %7 = arith.addi %6, %4 : vector<256x1024xi32>
    %c400_i32 = arith.constant 400 : i32
    %8 = vector.broadcast %c400_i32 : i32 to vector<256x1024xi32>
    %9 = arith.cmpi slt, %7, %8 : vector<256x1024xi32>
    %cst_5 = arith.constant 0.000000e+00 : f32
    %10 = vector.broadcast %cst_5 : f32 to vector<256x1024xf32>
    %11 = arith.select %9, %2, %10 : vector<256x1024xi1>, vector<256x1024xf32>
    %c0_i32 = arith.constant 0 : i32
    %12 = arith.cmpi eq, %arg0, %c0_i32 : i32
    %13 = arith.extui %12 : i1 to i32
    %c0_i32_6 = arith.constant 0 : i32
    %14 = arith.cmpi ne, %13, %c0_i32_6 : i32
    scf.if %14 {
      %cst_17 = arith.constant 0.000000e+00 : f32
      %26 = vector.broadcast %cst_17 : f32 to vector<1x1024xf32>
      %c0_18 = arith.constant 0 : index
      %c0_19 = arith.constant 0 : index
      %27 = vector.load %arg4[%c0_18, %c0_19] : memref<1x1024xf32, #tpu.memory_space<vmem>>, vector<1x1024xf32>
      tpu.vector_store %arg4[%c0_18, %c0_19], %26 {strides = array<i32>} : memref<1x1024xf32, #tpu.memory_space<vmem>>, vector<1x1024xf32>,
      %cst_20 = arith.constant 0.000000e+00 : f32
      %28 = vector.broadcast %cst_20 : f32 to vector<1x1024xf32>
      %c0_21 = arith.constant 0 : index
      %c0_22 = arith.constant 0 : index
      %29 = vector.load %arg5[%c0_21, %c0_22] : memref<1x1024xf32, #tpu.memory_space<vmem>>, vector<1x1024xf32>
      tpu.vector_store %arg5[%c0_21, %c0_22], %28 {strides = array<i32>} : memref<1x1024xf32, #tpu.memory_space<vmem>>, vector<1x1024xf32>,
    } else {
    }
    %c0_7 = arith.constant 0 : index
    %c0_8 = arith.constant 0 : index
    %15 = vector.load %arg4[%c0_7, %c0_8] : memref<1x1024xf32, #tpu.memory_space<vmem>>, vector<1x1024xf32>
    %cst_9 = arith.constant dense<0.000000e+00> : vector<1024xf32>
    %16 = vector.multi_reduction <add>, %11, %cst_9 [0] : vector<256x1024xf32> to vector<1024xf32>
    %17 = vector.shape_cast %16 : vector<1024xf32> to vector<1x1024xf32>
    %18 = arith.addf %15, %17 : vector<1x1024xf32>
    %c0_10 = arith.constant 0 : index
    %c0_11 = arith.constant 0 : index
    %19 = vector.load %arg4[%c0_10, %c0_11] : memref<1x1024xf32, #tpu.memory_space<vmem>>, vector<1x1024xf32>
    tpu.vector_store %arg4[%c0_10, %c0_11], %18 {strides = array<i32>} : memref<1x1024xf32, #tpu.memory_space<vmem>>, vector<1x1024xf32>,
    %c0_12 = arith.constant 0 : index
    %c0_13 = arith.constant 0 : index
    %20 = vector.load %arg5[%c0_12, %c0_13] : memref<1x1024xf32, #tpu.memory_space<vmem>>, vector<1x1024xf32>
    %21 = arith.mulf %11, %11 : vector<256x1024xf32>
    %cst_14 = arith.constant dense<0.000000e+00> : vector<1024xf32>
    %22 = vector.multi_reduction <add>, %21, %cst_14 [0] : vector<256x1024xf32> to vector<1024xf32>
    %23 = vector.shape_cast %22 : vector<1024xf32> to vector<1x1024xf32>
    %24 = arith.addf %20, %23 : vector<1x1024xf32>
    %c0_15 = arith.constant 0 : index
    %c0_16 = arith.constant 0 : index
    %25 = vector.load %arg5[%c0_15, %c0_16] : memref<1x1024xf32, #tpu.memory_space<vmem>>, vector<1x1024xf32>
    tpu.vector_store %arg5[%c0_15, %c0_16], %24 {strides = array<i32>} : memref<1x1024xf32, #tpu.memory_space<vmem>>, vector<1x1024xf32>,
    return
  }
  func.func @transform_0(%arg0: i32) -> (i32, i32) {
    %c0_i32 = arith.constant 0 : i32
    %c0_i32_0 = arith.constant 0 : i32
    return %arg0, %c0_i32 : i32, i32
  }
  func.func @transform_1(%arg0: i32) -> (i32, i32) {
    %c0_i32 = arith.constant 0 : i32
    %c0_i32_0 = arith.constant 0 : i32
    %c0_i32_1 = arith.constant 0 : i32
    return %c0_i32, %c0_i32_0 : i32, i32
  }
  func.func @transform_2(%arg0: i32) -> (i32, i32) {
    %c0_i32 = arith.constant 0 : i32
    %c0_i32_0 = arith.constant 0 : i32
    return %arg0, %c0_i32 : i32, i32
  }
  func.func @transform_3(%arg0: i32) -> (i32, i32) {
    %c0_i32 = arith.constant 0 : i32
    %c0_i32_0 = arith.constant 0 : i32
    %c0_i32_1 = arith.constant 0 : i32
    return %c0_i32, %c0_i32_0 : i32, i32
  }
  func.func @transform_4(%arg0: i32) -> (i32, i32) {
    %c0_i32 = arith.constant 0 : i32
    %c0_i32_0 = arith.constant 0 : i32
    %c0_i32_1 = arith.constant 0 : i32
    return %c0_i32, %c0_i32_0 : i32, i32
  }
}

</mosaic_0001>

<bundles_post_ra>
// kernel: tpu_custom_call.1
= control target key start
LH: loop header
LB: loop body
LE: loop exit
PB: predicated region body
PF: predicated region fallthrough
CT: control target
= control target key end

     0   :  { %10 = vsyncpa [#allocation3], 0  ;;  %s7108_s0 = inlined_call_operand.hbm [shape: bf16[512,128], index: 0, kind: input, shape index: {}]   ;;  %s7109_s1 = inlined_call_operand.hbm [shape: bf16[128,1024], index: 1, kind: input, shape index: {}]   ;;  %s7110_s2 = inlined_call_operand.hbm [shape: f32[512,1024], index: 2, kind: output, shape index: {0}]   ;;  %s7111_s3 = inlined_call_operand.hbm [shape: f32[1,1024], index: 3, kind: output, shape index: {1}]   ;;  %s7112_s4 = inlined_call_operand.hbm [shape: f32[1,1024], index: 4, kind: output, shape index: {2}]  }
   0x1   :  { %12 = vsyncpa [#allocation3 + $0x1], 0 }
   0x2   :  { %13 = vsyncpa [#allocation6], 0 }
   0x3   :  { %14 = vsyncpa [#allocation4], 0 }
   0x4   :  { %16 = vsyncpa [#allocation4 + $0x1], 0 }
   0x5   :  { %17 = vsyncpa [#allocation9], 0  ;;  %s3871_s15 = smov 0   ;;  %s3873_s16 = smov 0  }
   0x6   :  { %s3875_s17 = smov 0   ;;  %s3877_s18 = smov 0  }
   0x7 LB: > { %s3892_s19 = sadd.s32 4294967295, %s3834_s18   ;;  %s3128_s20 = sadd.s32 4294967294, %s3834_s18   ;;  %s3834_s18 = sphi %s3877_s18, %s8535_s18   ;;  %s3830_s17 = sphi %s3875_s17, %s8534_s17   ;;  %s3826_s16 = sphi %s3873_s16, %s8533_s16   ;;  %s3822_s15 = sphi %s3871_s15, %s8532_s15  }
   0x8   : > { %p43_p0 = scmp.ne.s32.totalorder %s3826_s16, %s3822_s15  ;;  %p44_p1 = scmp.eq.s32.totalorder %s3892_s19, 0 }
   0x9   : > { %p7113_p2 = scmp.eq.s32.totalorder %s3892_s19, 1  ;;  %p94_p3 = scmp.eq.s32.totalorder %s3128_s20, 1 }
   0xa   : > { %p3901_p4 = por %p44_p1, %p43_p0  ;;  %p3129_p5 = scmp.ge.s32.totalorder %s3834_s18, 1 }
   0xb   : > { %p3906_p6 = por %p94_p3, %p43_p0  ;;  %p143_p7 = scmp.lt.s32.totalorder %s3834_s18, 3 }
   0xc   : > { %s154_s25 = sshll.u32 %s7109_s1, 4  ;;  %s3836_s27 = smov [#allocation5]   ;;  %s155_s25 = int_to_ptr.hbm [resolvable:$true] %s154_s25 }
   0xd   : > { %p3915_p9 = pnand %p3129_p5, %p143_p7  ;;  %s156_s28 = sshll.u32 %s3836_s27, 4  ;;  %s157_s28 = int_to_ptr.vmem [resolvable:$true] %s156_s28 }
   0xe   : > { %s3925_s29 = sadd.s32 1, %s3834_s18   ;;  %s3837_s30 = smov 512  }
   0xf   : > { %p3570_p10 = pneg %p3915_p9  ;;  %s3838_s5 = smov 32  }
  0x10   : > { %s27_s6 = ssub.s32 %s3834_s18, %s3925_s29  ;;  %s30_s7 = sadd.s32 1, %s3830_s17 }
  0x11   : > { %p3571_p11 = pnand %p3570_p10, %p44_p1  ;;  %p28_p13 = scmp.eq.s32.totalorder %s27_s6, 0 }
  0x12   : > { %p37_p0 = scmp.ne.s32.totalorder %s3830_s17, %s3826_s16  ;;  %p38_p3 = scmp.eq.s32.totalorder %s3834_s18, 0 }
  0x13   : > { %3573 = dma.hbm_to_vmem [thread:$0]  (!%p3571_p11), %s155_s25, 8192, %s157_s28, [#allocation6], %s3837_s30, %s3837_s30, %s3838_s5  }
  0x14   : > { %p3583_p5 = scmp.lt.s32.totalorder %s3834_s18, 2  ;;  %p39_p7 = por %p38_p3, %p37_p0 }
  0x15   : > { %s3935_s8 = scalar_select %p28_p13, %s3830_s17, %s30_s7  }
  0x16   : > { %p3939_p10 = por %p7113_p2, %p37_p0  ;;  %s170_s10 = sand.u32 1, %s3830_s17  }
  0x17   : > { %s3471_s11 = sshll.u32 %s3834_s18, 7  ;;  %s3132_s12 = sshll.u32 %s170_s10, 7 }
  0x18   : > { %s179_s20 = scalar_lea.hbm %s7108_s0, %s3471_s11  ;;  %s174_s24 = scalar_lea.vmem [#allocation2], %s3132_s12 }
  0x19   : > { %s180_s23 = sshll.u32 %s179_s20, 4  ;;  %s182_s25 = sshll.u32 %s174_s24, 4  ;;  %s181_s23 = int_to_ptr.hbm [resolvable:$true] %s180_s23  ;;  %s183_s25 = int_to_ptr.vmem [resolvable:$true] %s182_s25 }
  0x1a   : > { %p3950_p11 = pnand %p3583_p5, %p39_p7  ;;  %s171_s28 = scalar_lea.sflag [#allocation3], %s170_s10 }
  0x1b   : > { %s3674_s30 = sshra.s32 %s181_s23, 4  ;;  %s3681_s11 = scalar_lea.hbm %s7108_s0, 256  ;;  %s3675_s30 = int_to_ptr.hbm [resolvable:$true] %s3674_s30 }
  0x1c   : > { %s3676_s5 = scalar_lea.hbm %s3675_s30, 128  ;;  %p3678_p0 = pneg %p3950_p11 }
  0x1d   : > { %p3677_p13 = scmp.ne.s32.totalorder %s3675_s30, %s3676_s5  ;;  %p3682_p5 = scmp.lt.s32.totalorder %s3675_s30, %s7108_s0 }
  0x1e   : > { %p3683_p7 = scmp.lt.s32.totalorder %s3681_s11, %s3676_s5 }
  0x1f   : > { %p3679_p3 = pnand %p3678_p0, %p3677_p13 }
  0x20   : > { %p3684_p2 = por %p3683_p7, %p3682_p5 }
  0x21   : > { %p3680_p12 = pneg %p3679_p3 }
  0x23   : > { %p3685_p8 = pnand %p3684_p2, %p3680_p12 }
  0x25   : > { %3688 = shalt.err (!%p3685_p8)
}
  0x26   : > { %s3839_s10 = smov 64   ;;  %s3840_s14 = smov 4  }
  0x27   : > { %3577 = dma.hbm_to_vmem [thread:$0]  (!%p3950_p11), %s181_s23, 2048, %s183_s25, %s171_s28, %s3839_s10, %s3839_s10, %s3840_s14  }
  0x28   : > { %194 = sbr.rel (%p3915_p9) target bundleno = 1120 (0x460), region = 28 }
  0x2d   : > { %s3967_s20 = sand.u32 1, %s3826_s16  }
  0x2e   : > { %s3136_s24 = sshll.u32 %s3967_s20, 7  ;;  %s197_s30 = scalar_lea.sflag [#allocation3], %s3967_s20 }
  0x2f   : > { %s3971_s5 = scalar_lea.vmem [#allocation2], %s3136_s24 }
  0x30   : > { %3805 = dma.done.wait (%p3901_p4), %s197_s30, 2048  }
  0x31   : > { %3807 = vsyncadd (%p3901_p4), %s197_s30, 4294965248 }
  0x32   : > { %3809 = dma.done.wait (%p44_p1), [#allocation6], 8192  }
  0x33   : > { %3811 = vsyncadd (%p44_p1), [#allocation6], 4294959104  ;;  %v3429_v0 = vld [vmem:[#allocation5 + $0x1c0] sm:$0xf]  ;;  %v3544_v2 = vld [vmem:[#allocation5 + $0x1c4] sm:$0xf] }
  0x34   : > { %v3548_v1 = vld [vmem:[#allocation5 + $0x1dc] sm:$0xf0]  ;;  %v3431_v4 = vld [vmem:[#allocation5 + $0x1e0] sm:$0xf0]  ;;  %v3437_v5 = vld [vmem:[#allocation5 + $0x1c8] sm:$0xf] }
  0x35   : > { %v3430_v3 = vor.u32 %v3548_v1, %v3429_v0  ;;  %v3549_v6 = vld [vmem:[#allocation5 + $0x1e4] sm:$0xf0]  ;;  %v3434_v7 = vor.u32 %v3544_v2, %v3431_v4  ;;  %v3545_v9 = vld [vmem:[#allocation5 + $0x1cc] sm:$0xf]  ;;  %v3397_v11 = vld [vmem:[#allocation5 + $0x180] sm:$0xf] }
  0x36   : > { %v3438_v8 = vor.u32 %v3549_v6, %v3437_v5  ;;  %v3439_v10 = vld [vmem:[#allocation5 + $0x1e8] sm:$0xf0]  ;;  %v3540_v13 = vld [vmem:[#allocation5 + $0x19c] sm:$0xf0]  ;;  %v3536_v14 = vld [vmem:[#allocation5 + $0x184] sm:$0xf] }
  0x37   : > { %745 = vmatpush.bf16.msra.mxu0 %v3430_v3  ;;  %v3442_v12 = vor.u32 %v3545_v9, %v3439_v10  ;;  %v3399_v15 = vld [vmem:[#allocation5 + $0x1a0] sm:$0xf0]  ;;  %834 = vmatpush.bf16.msra.mxu1 %v3434_v7  ;;  %v3398_v16 = vor.u32 %v3540_v13, %v3397_v11  ;;  %v3405_v18 = vld [vmem:[#allocation5 + $0x188] sm:$0xf]  ;;  %v3537_v20 = vld [vmem:[#allocation5 + $0x18c] sm:$0xf] }
  0x38   : > { %923 = vmatpush.bf16.msra.mxu2 %v3438_v8  ;;  %v3402_v17 = vor.u32 %v3536_v14, %v3399_v15  ;;  %v3541_v19 = vld [vmem:[#allocation5 + $0x1a4] sm:$0xf0]  ;;  %v3407_v22 = vld [vmem:[#allocation5 + $0x1a8] sm:$0xf0]  ;;  %v3365_v23 = vld [vmem:[#allocation5 + $0x140] sm:$0xf] }
  0x39   : > { %1012 = vmatpush.bf16.msra.mxu3 %v3442_v12  ;;  %v3406_v21 = vor.u32 %v3541_v19, %v3405_v18  ;;  %v3532_v24 = vld [vmem:[#allocation5 + $0x15c] sm:$0xf0]  ;;  %v3410_v25 = vor.u32 %v3537_v20, %v3407_v22  ;;  %v3528_v26 = vld [vmem:[#allocation5 + $0x144] sm:$0xf]  ;;  %v3373_v28 = vld [vmem:[#allocation5 + $0x148] sm:$0xf] }
  0x3a   : > { %v3367_v27 = vld [vmem:[#allocation5 + $0x160] sm:$0xf0]  ;;  %v3366_v29 = vor.u32 %v3532_v24, %v3365_v23  ;;  %v3533_v30 = vld [vmem:[#allocation5 + $0x164] sm:$0xf0]  ;;  %v3529_v31 = vld [vmem:[#allocation5 + $0x14c] sm:$0xf] }
  0x3b   : > { %746 = vmatpush.bf16.msra.mxu0 %v3398_v16  ;;  %v3375_v32 = vld [vmem:[#allocation5 + $0x168] sm:$0xf0]  ;;  %835 = vmatpush.bf16.msra.mxu1 %v3402_v17  ;;  %v3370_v33 = vor.u32 %v3528_v26, %v3367_v27  ;;  %v3374_v34 = vor.u32 %v3533_v30, %v3373_v28  ;;  %v3333_v35 = vld [vmem:[#allocation5 + $0x100] sm:$0xf]  ;;  %v3520_v37 = vld [vmem:[#allocation5 + $0x104] sm:$0xf] }
  0x3c   : > { %924 = vmatpush.bf16.msra.mxu2 %v3406_v21  ;;  %v3524_v36 = vld [vmem:[#allocation5 + $0x11c] sm:$0xf0]  ;;  %v3378_v38 = vor.u32 %v3529_v31, %v3375_v32  ;;  %v3335_v39 = vld [vmem:[#allocation5 + $0x120] sm:$0xf0]  ;;  %v3341_v40 = vld [vmem:[#allocation5 + $0x108] sm:$0xf] }
  0x3d   : > { %1013 = vmatpush.bf16.msra.mxu3 %v3410_v25  ;;  %v3525_v41 = vld [vmem:[#allocation5 + $0x124] sm:$0xf0]  ;;  %v3521_v42 = vld [vmem:[#allocation5 + $0x10c] sm:$0xf]  ;;  %v3334_v44 = vor.u32 %v3524_v36, %v3333_v35  ;;  %v3338_v45 = vor.u32 %v3520_v37, %v3335_v39  ;;  %v3301_v47 = vld [vmem:[#allocation5 + $0xc0] sm:$0xf] }
  0x3e   : > { %v3343_v43 = vld [vmem:[#allocation5 + $0x128] sm:$0xf0]  ;;  %v3342_v46 = vor.u32 %v3525_v41, %v3341_v40  ;;  %v3516_v48 = vld [vmem:[#allocation5 + $0xdc] sm:$0xf0]  ;;  %v3512_v49 = vld [vmem:[#allocation5 + $0xc4] sm:$0xf] }
  0x3f   : > { %747 = vmatpush.bf16.msra.mxu0 %v3366_v29  ;;  %836 = vmatpush.bf16.msra.mxu1 %v3370_v33  ;;  %v3346_v50 = vor.u32 %v3521_v42, %v3343_v43  ;;  %v3303_v51 = vld [vmem:[#allocation5 + $0xe0] sm:$0xf0]  ;;  %v3309_v52 = vld [vmem:[#allocation5 + $0xc8] sm:$0xf]  ;;  %v3513_v54 = vld [vmem:[#allocation5 + $0xcc] sm:$0xf]  ;;  %v3302_v56 = vor.u32 %v3516_v48, %v3301_v47 }
  0x40   : > { %925 = vmatpush.bf16.msra.mxu2 %v3374_v34  ;;  %v3517_v53 = vld [vmem:[#allocation5 + $0xe4] sm:$0xf0]  ;;  %v3311_v55 = vld [vmem:[#allocation5 + $0xe8] sm:$0xf0]  ;;  %v3306_v57 = vor.u32 %v3512_v49, %v3303_v51  ;;  %v3269_v59 = vld [vmem:[#allocation5 + $0x80] sm:$0xf] }
  0x41   : > { %1014 = vmatpush.bf16.msra.mxu3 %v3378_v38  ;;  %v3310_v58 = vor.u32 %v3517_v53, %v3309_v52  ;;  %v3508_v60 = vld [vmem:[#allocation5 + $0x9c] sm:$0xf0]  ;;  %v3504_v61 = vld [vmem:[#allocation5 + $0x84] sm:$0xf]  ;;  %v3314_v62 = vor.u32 %v3513_v54, %v3311_v55  ;;  %v3277_v0 = vld [vmem:[#allocation5 + $0x88] sm:$0xf] }
  0x42   : > { %v3271_v63 = vld [vmem:[#allocation5 + $0xa0] sm:$0xf0]  ;;  %v3509_v1 = vld [vmem:[#allocation5 + $0xa4] sm:$0xf0]  ;;  %v3505_v2 = vld [vmem:[#allocation5 + $0x8c] sm:$0xf]  ;;  %v3270_v4 = vor.u32 %v3508_v60, %v3269_v59 }
  0x43   : > { %748 = vmatpush.bf16.msra.mxu0 %v3334_v44  ;;  %837 = vmatpush.bf16.msra.mxu1 %v3338_v45  ;;  %v3279_v3 = vld [vmem:[#allocation5 + $0xa8] sm:$0xf0]  ;;  %v3274_v5 = vor.u32 %v3504_v61, %v3271_v63  ;;  %v3278_v6 = vor.u32 %v3509_v1, %v3277_v0  ;;  %v3237_v7 = vld [vmem:[#allocation5 + $0x40] sm:$0xf]  ;;  %v3496_v9 = vld [vmem:[#allocation5 + $0x44] sm:$0xf] }
  0x44   : > { %926 = vmatpush.bf16.msra.mxu2 %v3342_v46  ;;  %v3500_v8 = vld [vmem:[#allocation5 + $0x5c] sm:$0xf0]  ;;  %v3282_v10 = vor.u32 %v3505_v2, %v3279_v3  ;;  %v3239_v11 = vld [vmem:[#allocation5 + $0x60] sm:$0xf0]  ;;  %v3245_v12 = vld [vmem:[#allocation5 + $0x48] sm:$0xf] }
  0x45   : > { %1015 = vmatpush.bf16.msra.mxu3 %v3346_v50  ;;  %v3501_v13 = vld [vmem:[#allocation5 + $0x64] sm:$0xf0]  ;;  %v3497_v14 = vld [vmem:[#allocation5 + $0x4c] sm:$0xf]  ;;  %v3238_v16 = vor.u32 %v3500_v8, %v3237_v7  ;;  %v3205_v17 = vld [vmem:[#allocation5] sm:$0xf]  ;;  %v3242_v18 = vor.u32 %v3496_v9, %v3239_v11 }
  0x46   : > { %v3247_v15 = vld [vmem:[#allocation5 + $0x68] sm:$0xf0]  ;;  %v3246_v19 = vor.u32 %v3501_v13, %v3245_v12  ;;  %v3492_v20 = vld [vmem:[#allocation5 + $0x1c] sm:$0xf0]  ;;  %v3488_v21 = vld [vmem:[#allocation5 + $0x4] sm:$0xf] }
  0x47   : > { %749 = vmatpush.bf16.msra.mxu0 %v3302_v56  ;;  %838 = vmatpush.bf16.msra.mxu1 %v3306_v57  ;;  %v3207_v22 = vld [vmem:[#allocation5 + $0x20] sm:$0xf0]  ;;  %v3250_v23 = vor.u32 %v3497_v14, %v3247_v15  ;;  %v3213_v24 = vld [vmem:[#allocation5 + $0x8] sm:$0xf]  ;;  %v3489_v26 = vld [vmem:[#allocation5 + $0xc] sm:$0xf]  ;;  %v3206_v30 = vor.u32 %v3492_v20, %v3205_v17 }
  0x48   : > { %927 = vmatpush.bf16.msra.mxu2 %v3310_v58  ;;  %v3493_v25 = vld [vmem:[#allocation5 + $0x24] sm:$0xf0]  ;;  %v3215_v27 = vld [vmem:[#allocation5 + $0x28] sm:$0xf0]  ;;  %v3453_v28 = vld [vmem:[#allocation5 + $0x1d8] sm:$0xf]  ;;  %v3210_v33 = vor.u32 %v3488_v21, %v3207_v22 }
  0x49   : > { %1016 = vmatpush.bf16.msra.mxu3 %v3314_v62  ;;  %v3551_v29 = vld [vmem:[#allocation5 + $0x1f4] sm:$0xf0]  ;;  %v3547_v31 = vld [vmem:[#allocation5 + $0x1dc] sm:$0xf]  ;;  %v3214_v34 = vor.u32 %v3493_v25, %v3213_v24  ;;  %v3218_v35 = vor.u32 %v3489_v26, %v3215_v27  ;;  %v3445_v37 = vld [vmem:[#allocation5 + $0x1d0] sm:$0xf] }
  0x4a   : > { %v3455_v32 = vld [vmem:[#allocation5 + $0x1f8] sm:$0xf0]  ;;  %v3454_v36 = vor.u32 %v3551_v29, %v3453_v28  ;;  %v3550_v38 = vld [vmem:[#allocation5 + $0x1ec] sm:$0xf0]  ;;  %v3982_v39 = vld [vmem:[%s3971_s5] sm:$0xff]  ;;  %s3459_s21 = sshll.u32 %s3892_s19, 8 }
  0x4b   : > { %750 = vmatpush.bf16.msra.mxu0 %v3270_v4  ;;  %839 = vmatpush.bf16.msra.mxu1 %v3274_v5  ;;  %v3458_v40 = vor.u32 %v3547_v31, %v3455_v32  ;;  %v3546_v41 = vld [vmem:[#allocation5 + $0x1d4] sm:$0xf]  ;;  %v3446_v43 = vor.u32 %v3550_v38, %v3445_v37  ;;  %v3421_v45 = vld [vmem:[#allocation5 + $0x198] sm:$0xf]  ;;  %v3539_v47 = vld [vmem:[#allocation5 + $0x19c] sm:$0xf]  ;;  %v4016_v38 = vstv %s3459_s21 }
  0x4c   : > { %928 = vmatpush.bf16.msra.mxu2 %v3278_v6  ;;  %v3447_v42 = vld [vmem:[#allocation5 + $0x1f0] sm:$0xf0]  ;;  %v3543_v46 = vld [vmem:[#allocation5 + $0x1b4] sm:$0xf0]  ;;  %v3423_v49 = vld [vmem:[#allocation5 + $0x1b8] sm:$0xf0] }
  0x4d   : > { %1017 = vmatpush.bf16.msra.mxu3 %v3282_v10  ;;  %v3450_v44 = vor.u32 %v3546_v41, %v3447_v42  ;;  %v3422_v48 = vor.u32 %v3543_v46, %v3421_v45  ;;  %v3413_v50 = vld [vmem:[#allocation5 + $0x190] sm:$0xf]  ;;  %v3426_v52 = vor.u32 %v3539_v47, %v3423_v49  ;;  %v3538_v54 = vld [vmem:[#allocation5 + $0x194] sm:$0xf]  ;;  %v3989_v57 = vld [vmem:[%s3971_s5 + $0x8] sm:$0xff]  ;;  %s3138_s26 = sshll.u32 %s3967_s20, 11 }
  0x4e   : > { %v3542_v51 = vld [vmem:[#allocation5 + $0x1ac] sm:$0xf0]  ;;  %v3415_v55 = vld [vmem:[#allocation5 + $0x1b0] sm:$0xf0]  ;;  %v3389_v59 = vld [vmem:[#allocation5 + $0x158] sm:$0xf] }
  0x4f   : > { %751 = vmatpush.bf16.msra.mxu0 %v3238_v16  ;;  %840 = vmatpush.bf16.msra.mxu1 %v3242_v18  ;;  %v3414_v53 = vor.u32 %v3542_v51, %v3413_v50  ;;  %v3418_v56 = vor.u32 %v3538_v54, %v3415_v55  ;;  %v3996_v58 = vld [vmem:[%s3971_s5 + $0x10] sm:$0xff]  ;;  %v3535_v60 = vld [vmem:[#allocation5 + $0x174] sm:$0xf0]  ;;  %v3531_v61 = vld [vmem:[#allocation5 + $0x15c] sm:$0xf]  ;;  %s4026_s23 = scalar_lea.vmem [#allocation7], %s3138_s26 }
  0x50   : > { %929 = vmatpush.bf16.msra.mxu2 %v3246_v19  ;;  %v3390_v62 = vor.u32 %v3535_v60, %v3389_v59  ;;  %v3391_v63 = vld [vmem:[#allocation5 + $0x178] sm:$0xf0]  ;;  %v3381_v0 = vld [vmem:[#allocation5 + $0x150] sm:$0xf]  ;;  %v3530_v4 = vld [vmem:[#allocation5 + $0x154] sm:$0xf] }
  0x51   : > { %1018 = vmatpush.bf16.msra.mxu3 %v3250_v23  ;;  %v3534_v1 = vld [vmem:[#allocation5 + $0x16c] sm:$0xf0]  ;;  %v3394_v2 = vor.u32 %v3531_v61, %v3391_v63  ;;  %v3383_v5 = vld [vmem:[#allocation5 + $0x170] sm:$0xf0]  ;;  %v4003_v7 = vld [vmem:[%s3971_s5 + $0x18] sm:$0xff]  ;;  %p7699_p1 = scmp.ne.s32.totalorder %s3892_s19, 0 }
  0x52   : > { %v3382_v3 = vor.u32 %v3534_v1, %v3381_v0  ;;  %v3386_v6 = vor.u32 %v3530_v4, %v3383_v5  ;;  %v3476_v8 = vld [vmem:[%s3971_s5 + $0x20] sm:$0xff]  ;;  %v3357_v9 = vld [vmem:[#allocation5 + $0x118] sm:$0xf]  ;;  %v3523_v11 = vld [vmem:[#allocation5 + $0x11c] sm:$0xf] }
  0x53   : > { %752 = vmatpush.bf16.msra.mxu0 %v3206_v30  ;;  %841 = vmatpush.bf16.msra.mxu1 %v3210_v33  ;;  %v3527_v10 = vld [vmem:[#allocation5 + $0x134] sm:$0xf0]  ;;  %v3359_v13 = vld [vmem:[#allocation5 + $0x138] sm:$0xf0]  ;;  %v3349_v14 = vld [vmem:[#allocation5 + $0x110] sm:$0xf] }
  0x54   : > { %930 = vmatpush.bf16.msra.mxu2 %v3214_v34  ;;  %v3358_v12 = vor.u32 %v3527_v10, %v3357_v9  ;;  %v3526_v15 = vld [vmem:[#allocation5 + $0x12c] sm:$0xf0]  ;;  %v3362_v16 = vor.u32 %v3523_v11, %v3359_v13  ;;  %v3522_v18 = vld [vmem:[#allocation5 + $0x114] sm:$0xf]  ;;  %v3477_v21 = vld [vmem:[%s3971_s5 + $0x28] sm:$0xff] }
  0x55   : > { %1019 = vmatpush.bf16.msra.mxu3 %v3218_v35  ;;  %v3350_v17 = vor.u32 %v3526_v15, %v3349_v14  ;;  %v3351_v19 = vld [vmem:[#allocation5 + $0x130] sm:$0xf0]  ;;  %v3325_v23 = vld [vmem:[#allocation5 + $0xd8] sm:$0xf]  ;;  %v3515_v25 = vld [vmem:[#allocation5 + $0xdc] sm:$0xf] }
  0x56   : > { %753 = vmatmul.bf16.vlgmr.msra.gmra.mxu0 %v3982_v39  ;;  %842 = vmatmul.bf16.vlgmr.msra.gmra.mxu1 %v3982_v39  ;;  %v3354_v20 = vor.u32 %v3522_v18, %v3351_v19  ;;  %v3478_v22 = vld [vmem:[%s3971_s5 + $0x30] sm:$0xff]  ;;  %v3519_v24 = vld [vmem:[#allocation5 + $0xf4] sm:$0xf0]  ;;  %v3327_v27 = vld [vmem:[#allocation5 + $0xf8] sm:$0xf0] }
  0x57   : > { %931 = vmatmul.bf16.vlgmr.msra.gmra.mxu2 %v3982_v39  ;;  %1101 = vmatpush.bf16.msrb.mxu0 %v3446_v43  ;;  %v3326_v26 = vor.u32 %v3519_v24, %v3325_v23  ;;  %v3330_v28 = vor.u32 %v3515_v25, %v3327_v27  ;;  %v3317_v29 = vld [vmem:[#allocation5 + $0xd0] sm:$0xf]  ;;  %v3514_v31 = vld [vmem:[#allocation5 + $0xd4] sm:$0xf]  ;;  %v3479_v35 = vld [vmem:[%s3971_s5 + $0x38] sm:$0xff] }
  0x58   : > { %1279 = vmatpush.bf16.msrb.mxu2 %v3454_v36  ;;  %1020 = vmatmul.bf16.vlgmr.msra.gmra.mxu3 %v3982_v39  ;;  %v3518_v30 = vld [vmem:[#allocation5 + $0xec] sm:$0xf0]  ;;  %v3319_v33 = vld [vmem:[#allocation5 + $0xf0] sm:$0xf0]  ;;  %v1713_v36 = vlaneseq  ;;  %v3480_v42 = vld [vmem:[%s3971_s5 + $0x40] sm:$0xff] }
  0x59   : > { %1368 = vmatpush.bf16.msrb.mxu3 %v3458_v40  ;;  %1190 = vmatpush.bf16.msrb.mxu1 %v3450_v44  ;;  %v3318_v32 = vor.u32 %v3518_v30, %v3317_v29  ;;  %v3322_v34 = vor.u32 %v3514_v31, %v3319_v33  ;;  %v3511_v49 = vld [vmem:[#allocation5 + $0xb4] sm:$0xf0]  ;;  %v3507_v50 = vld [vmem:[#allocation5 + $0x9c] sm:$0xf]  ;;  %v3506_v5 = vld [vmem:[#allocation5 + $0x94] sm:$0xf] }
  0x5a   : > { %v4014_v37 = vshrl.u32 %v1713_v36, 7  ;;  %v3481_v11 = vld [vmem:[%s3971_s5 + $0x48] sm:$0xff] }
  0x5b   : > { %1102 = vmatpush.bf16.msrb.mxu0 %v3414_v53  ;;  %v3295_v53 = vld [vmem:[#allocation5 + $0xb8] sm:$0xf0] }
  0x5c   : > { %1280 = vmatpush.bf16.msrb.mxu2 %v3422_v48  ;;  %v4020_v40 = vadd.s32 %v4016_v38, %v4014_v37  ;;  %v1715_v41 = vadd.s32 8, %v4014_v37  ;;  %v3293_v48 = vld [vmem:[#allocation5 + $0x98] sm:$0xf]  ;;  %v1716_v51 = vadd.s32 16, %v4014_v37  ;;  %v3298_v55 = vor.u32 %v3507_v50, %v3295_v53  ;;  %v3499_v50 = vld [vmem:[#allocation5 + $0x5c] sm:$0xf] }
  0x5d   : > { %1369 = vmatpush.bf16.msrb.mxu3 %v3426_v52  ;;  %1191 = vmatpush.bf16.msrb.mxu1 %v3418_v56  ;;  %v3294_v52 = vor.u32 %v3511_v49, %v3293_v48  ;;  %v1717_v9 = vadd.s32 24, %v4014_v37  ;;  %v1719_v30 = vadd.s32 40, %v4014_v37  ;;  %v3261_v48 = vld [vmem:[#allocation5 + $0x58] sm:$0xf]  ;;  %v3263_v53 = vld [vmem:[#allocation5 + $0x78] sm:$0xf0] }
  0x5e   : > { %vm1780_vm0 = vcmp.lt.s32.totalorder %v4020_v40, 400  ;;  %v4039_v47 = vadd.s32 %v4016_v38, %v1715_v41  ;;  %v4063_v1 = vadd.s32 %v4016_v38, %v1716_v51  ;;  %v3503_v49 = vld [vmem:[#allocation5 + $0x74] sm:$0xf0]  ;;  %v1720_v51 = vadd.s32 48, %v4014_v37 }
  0x5f   : > { %1103 = vmatpush.bf16.msrb.mxu0 %v3382_v3  ;;  %v3510_v3 = vld [vmem:[#allocation5 + $0xac] sm:$0xf0]  ;;  %v4089_v19 = vadd.s32 %v4016_v38, %v1717_v9 }
  0x60   : > { %1281 = vmatpush.bf16.msrb.mxu2 %v3390_v62  ;;  %vm1781_vm1 = vcmp.lt.s32.totalorder %v4039_v47, 400  ;;  %vm1782_vm2 = vcmp.lt.s32.totalorder %v4063_v1, 400  ;;  %v3502_v9 = vld [vmem:[#allocation5 + $0x6c] sm:$0xf0] }
  0x61   : > { %1370 = vmatpush.bf16.msrb.mxu3 %v3394_v2  ;;  %1192 = vmatpush.bf16.msrb.mxu1 %v3386_v6  ;;  %v3285_v2 = vld [vmem:[#allocation5 + $0x90] sm:$0xf]  ;;  %v3287_v6 = vld [vmem:[#allocation5 + $0xb0] sm:$0xf0]  ;;  %vm1783_vm3 = vcmp.lt.s32.totalorder %v4089_v19, 400 }
  0x62   : > { %v3286_v4 = vor.u32 %v3510_v3, %v3285_v2 }
  0x63   : > { %1104 = vmatpush.bf16.msrb.mxu0 %v3350_v17 }
  0x64   : > { %1282 = vmatpush.bf16.msrb.mxu2 %v3358_v12 }
  0x65   : > { %1371 = vmatpush.bf16.msrb.mxu3 %v3362_v16  ;;  %1193 = vmatpush.bf16.msrb.mxu1 %v3354_v20  ;;  %v1718_v20 = vadd.s32 32, %v4014_v37 }
  0x66   : > { %758 = vmatmul.bf16.gmra.mxu0 %v3989_v57  ;;  %847 = vmatmul.bf16.gmra.mxu1 %v3989_v57 }
  0x67   : > { %936 = vmatmul.bf16.gmra.mxu2 %v3989_v57  ;;  %1105 = vmatpush.bf16.msrb.mxu0 %v3318_v32  ;;  %v4114_v29 = vadd.s32 %v4016_v38, %v1718_v20  ;;  %v3482_v32 = vld [vmem:[%s3971_s5 + $0x50] sm:$0xff] }
  0x68   : > { %1025 = vmatmul.bf16.gmra.mxu3 %v3989_v57  ;;  %1283 = vmatpush.bf16.msrb.mxu2 %v3326_v26 }
  0x69   : > { %1372 = vmatpush.bf16.msrb.mxu3 %v3330_v28  ;;  %1194 = vmatpush.bf16.msrb.mxu1 %v3322_v34  ;;  %vm1784_vm4 = vcmp.lt.s32.totalorder %v4114_v29, 400 }
  0x6b   : > { %1106 = vmatpush.bf16.msrb.mxu0 %v3286_v4 }
  0x6c   : > { %1284 = vmatpush.bf16.msrb.mxu2 %v3294_v52  ;;  %v3262_v52 = vor.u32 %v3503_v49, %v3261_v48 }
  0x6d   : > { %1373 = vmatpush.bf16.msrb.mxu3 %v3298_v55  ;;  %v3266_v55 = vor.u32 %v3499_v50, %v3263_v53 }
  0x70   : > { %1285 = vmatpush.bf16.msrb.mxu2 %v3262_v52 }
  0x71   : > { %1374 = vmatpush.bf16.msrb.mxu3 %v3266_v55 }
  0x76   : > { %763 = vmatmul.bf16.gmra.mxu0 %v3996_v58  ;;  %852 = vmatmul.bf16.gmra.mxu1 %v3996_v58 }
  0x77   : > { %941 = vmatmul.bf16.gmra.mxu2 %v3996_v58 }
  0x78   : > { %1030 = vmatmul.bf16.gmra.mxu3 %v3996_v58 }
  0x86   : > { %768 = vmatmul.bf16.gmra.mxu0 %v4003_v7  ;;  %857 = vmatmul.bf16.gmra.mxu1 %v4003_v7 }
  0x87   : > { %946 = vmatmul.bf16.gmra.mxu2 %v4003_v7 }
  0x88   : > { %1035 = vmatmul.bf16.gmra.mxu3 %v4003_v7 }
  0x96   : > { %773 = vmatmul.bf16.gmra.mxu0 %v3476_v8  ;;  %862 = vmatmul.bf16.gmra.mxu1 %v3476_v8 }
  0x97   : > { %951 = vmatmul.bf16.gmra.mxu2 %v3476_v8 }
  0x98   : > { %1040 = vmatmul.bf16.gmra.mxu3 %v3476_v8  ;;  %v3290_v8 = vor.u32 %v3506_v5, %v3287_v6  ;;  %v4165_v6 = vadd.s32 %v4016_v38, %v1720_v51 }
  0x9a   : > { %1195 = vmatpush.bf16.msrb.mxu1 %v3290_v8  ;;  %v3253_v8 = vld [vmem:[#allocation5 + $0x50] sm:$0xf]  ;;  %vm1786_vm6 = vcmp.lt.s32.totalorder %v4165_v6, 400 }
  0xa6   : > { %778 = vmatmul.bf16.gmra.mxu0 %v3477_v21  ;;  %867 = vmatmul.bf16.gmra.mxu1 %v3477_v21 }
  0xa7   : > { %956 = vmatmul.bf16.gmra.mxu2 %v3477_v21 }
  0xa8   : > { %1045 = vmatmul.bf16.gmra.mxu3 %v3477_v21 }
  0xb6   : > { %783 = vmatmul.bf16.gmra.mxu0 %v3478_v22  ;;  %872 = vmatmul.bf16.gmra.mxu1 %v3478_v22 }
  0xb7   : > { %961 = vmatmul.bf16.gmra.mxu2 %v3478_v22 }
  0xb8   : > { %1050 = vmatmul.bf16.gmra.mxu3 %v3478_v22 }
  0xc6   : > { %788 = vmatmul.bf16.gmra.mxu0 %v3479_v35  ;;  %877 = vmatmul.bf16.gmra.mxu1 %v3479_v35 }
  0xc7   : > { %966 = vmatmul.bf16.gmra.mxu2 %v3479_v35 }
  0xc8   : > { %1055 = vmatmul.bf16.gmra.mxu3 %v3479_v35 }
  0xd3   : > { %v754_v43 = vpop.f32.mrf.mxu0  ;;  %v843_v45 = vpop.f32.mrf.mxu1 }
  0xd4   : > { %1457 = vst [vmem:[%s4026_s23] sm:$0xff] %v754_v43  ;;  %v4031_v44 = vsel %vm1780_vm0, %v754_v43, 0.0  ;;  %v4036_v46 = vsel %vm1780_vm0, %v843_v45, 0.0 }
  0xd5   : > { %1458 = vst [vmem:[%s4026_s23 + $0x8] sm:$0xff] %v843_v45  ;;  %v4140_v45 = vadd.s32 %v4016_v38, %v1719_v30 }
  0xd6   : > { %7385 = vst [vmem:[#allocation15_spill] sm:$0xff] %v4036_v46  ;;  %793 = vmatmul.bf16.gmra.mxu0 %v3480_v42  ;;  %882 = vmatmul.bf16.gmra.mxu1 %v3480_v42 }
  0xd7   : > { %971 = vmatmul.bf16.gmra.mxu2 %v3480_v42  ;;  %vm1785_vm5 = vcmp.lt.s32.totalorder %v4140_v45, 400 }
  0xd8   : > { %1060 = vmatmul.bf16.gmra.mxu3 %v3480_v42 }
  0xda   : > { %v932_v54 = vpop.f32.mrf.mxu2 }
  0xdb   : > { %1459 = vst [vmem:[%s4026_s23 + $0x10] sm:$0xff] %v932_v54  ;;  %v4046_v56 = vsel %vm1780_vm0, %v932_v54, 0.0  ;;  %v1021_v59 = vpop.f32.mrf.mxu3  ;;  %v756_v60 = vpop.f32.mrf.mxu0 }
  0xdc   : > { %1460 = vst [vmem:[%s4026_s23 + $0x18] sm:$0xff] %v1021_v59  ;;  %v4051_v61 = vsel %vm1780_vm0, %v1021_v59, 0.0  ;;  %v4055_v62 = vsel %vm1781_vm1, %v756_v60, 0.0  ;;  %v845_v63 = vpop.f32.mrf.mxu1 }
  0xdd   : > { %7386 = vst [vmem:[#allocation16_spill] sm:$0xff] %v4051_v61  ;;  %v4060_v0 = vsel %vm1781_vm1, %v845_v63, 0.0 }
  0xde   : > { %7387 = vst [vmem:[#allocation17_spill] sm:$0xff] %v4055_v62 }
  0xdf   : > { %1465 = vst [vmem:[%s4026_s23 + $0x40] sm:$0xff] %v756_v60 }
  0xe0   : > { %7388 = vst [vmem:[#allocation18_spill] sm:$0xff] %v4060_v0 }
  0xe1   : > { %1466 = vst [vmem:[%s4026_s23 + $0x48] sm:$0xff] %v845_v63 }
  0xe2   : > { %v934_v10 = vpop.f32.mrf.mxu2 }
  0xe3   : > { %1467 = vst [vmem:[%s4026_s23 + $0x50] sm:$0xff] %v934_v10  ;;  %v4072_v12 = vsel %vm1781_vm1, %v934_v10, 0.0  ;;  %v1023_v13 = vpop.f32.mrf.mxu3  ;;  %v759_v14 = vpop.f32.mrf.mxu0  ;;  %v3254_v10 = vor.u32 %v3502_v9, %v3253_v8  ;;  %v3484_v8 = vld [vmem:[%s3971_s5 + $0x60] sm:$0xff] }
  0xe4   : > { %7389 = vst [vmem:[#allocation19_spill] sm:$0xff] %v4072_v12  ;;  %v4077_v15 = vsel %vm1781_vm1, %v1023_v13, 0.0  ;;  %v4081_v16 = vsel %vm1782_vm2, %v759_v14, 0.0  ;;  %v848_v17 = vpop.f32.mrf.mxu1 }
  0xe5   : > { %1468 = vst [vmem:[%s4026_s23 + $0x58] sm:$0xff] %v1023_v13  ;;  %v4086_v18 = vsel %vm1782_vm2, %v848_v17, 0.0  ;;  %v3255_v13 = vld [vmem:[#allocation5 + $0x70] sm:$0xf0]  ;;  %1107 = vmatpush.bf16.msrb.mxu0 %v3254_v10 }
  0xe6   : > { %7390 = vst [vmem:[#allocation20_spill] sm:$0xff] %v4077_v15  ;;  %798 = vmatmul.bf16.gmra.mxu0 %v3481_v11  ;;  %887 = vmatmul.bf16.gmra.mxu1 %v3481_v11 }
  0xe7   : > { %7391 = vst [vmem:[#allocation21_spill] sm:$0xff] %v4081_v16  ;;  %976 = vmatmul.bf16.gmra.mxu2 %v3481_v11 }
  0xe8   : > { %1473 = vst [vmem:[%s4026_s23 + $0x80] sm:$0xff] %v759_v14  ;;  %1065 = vmatmul.bf16.gmra.mxu3 %v3481_v11  ;;  %v3498_v11 = vld [vmem:[#allocation5 + $0x54] sm:$0xf] }
  0xe9   : > { %7392 = vst [vmem:[#allocation22_spill] sm:$0xff] %v4086_v18  ;;  %v3258_v14 = vor.u32 %v3498_v11, %v3255_v13 }
  0xea   : > { %1474 = vst [vmem:[%s4026_s23 + $0x88] sm:$0xff] %v848_v17  ;;  %v937_v21 = vpop.f32.mrf.mxu2  ;;  %v1721_v17 = vadd.s32 56, %v4014_v37 }
  0xeb   : > { %1475 = vst [vmem:[%s4026_s23 + $0x90] sm:$0xff] %v937_v21  ;;  %v4097_v22 = vsel %vm1782_vm2, %v937_v21, 0.0  ;;  %v1026_v23 = vpop.f32.mrf.mxu3  ;;  %v761_v24 = vpop.f32.mrf.mxu0  ;;  %v3483_v21 = vld [vmem:[%s3971_s5 + $0x58] sm:$0xff]  ;;  %1196 = vmatpush.bf16.msrb.mxu1 %v3258_v14 }
  0xec   : > { %7393 = vst [vmem:[#allocation23_spill] sm:$0xff] %v4097_v22  ;;  %v4102_v25 = vsel %vm1782_vm2, %v1026_v23, 0.0  ;;  %v4106_v26 = vsel %vm1783_vm3, %v761_v24, 0.0  ;;  %v850_v27 = vpop.f32.mrf.mxu1 }
  0xed   : > { %1476 = vst [vmem:[%s4026_s23 + $0x98] sm:$0xff] %v1026_v23  ;;  %v4111_v28 = vsel %vm1783_vm3, %v850_v27, 0.0 }
  0xee   : > { %7394 = vst [vmem:[#allocation24_spill] sm:$0xff] %v4106_v26 }
  0xef   : > { %1481 = vst [vmem:[%s4026_s23 + $0xc0] sm:$0xff] %v761_v24 }
  0xf0   : > { %7395 = vst [vmem:[#allocation25_spill] sm:$0xff] %v4111_v28 }
  0xf1   : > { %1482 = vst [vmem:[%s4026_s23 + $0xc8] sm:$0xff] %v850_v27 }
  0xf2   : > { %v939_v31 = vpop.f32.mrf.mxu2 }
  0xf3   : > { %1483 = vst [vmem:[%s4026_s23 + $0xd0] sm:$0xff] %v939_v31  ;;  %v4123_v33 = vsel %vm1783_vm3, %v939_v31, 0.0  ;;  %v1028_v34 = vpop.f32.mrf.mxu3  ;;  %v764_v35 = vpop.f32.mrf.mxu0 }
  0xf4   : > { %7396 = vst [vmem:[#allocation26_spill] sm:$0xff] %v4123_v33  ;;  %v4128_v36 = vsel %vm1783_vm3, %v1028_v34, 0.0  ;;  %v4132_v41 = vsel %vm1784_vm4, %v764_v35, 0.0  ;;  %v853_v42 = vpop.f32.mrf.mxu1 }
  0xf5   : > { %1484 = vst [vmem:[%s4026_s23 + $0xd8] sm:$0xff] %v1028_v34  ;;  %v4137_v43 = vsel %vm1784_vm4, %v853_v42, 0.0 }
  0xf6   : > { %7397 = vst [vmem:[#allocation27_spill] sm:$0xff] %v4128_v36  ;;  %803 = vmatmul.bf16.gmra.mxu0 %v3482_v32  ;;  %892 = vmatmul.bf16.gmra.mxu1 %v3482_v32 }
  0xf7   : > { %7398 = vst [vmem:[#allocation28_spill] sm:$0xff] %v4132_v41  ;;  %981 = vmatmul.bf16.gmra.mxu2 %v3482_v32 }
  0xf8   : > { %1489 = vst [vmem:[%s4026_s23 + $0x100] sm:$0xff] %v764_v35  ;;  %1070 = vmatmul.bf16.gmra.mxu3 %v3482_v32  ;;  %v4191_v35 = vadd.s32 %v4016_v38, %v1721_v17 }
  0xf9   : > { %7399 = vst [vmem:[#allocation29_spill] sm:$0xff] %v4137_v43 }
  0xfa   : > { %1490 = vst [vmem:[%s4026_s23 + $0x108] sm:$0xff] %v853_v42  ;;  %v942_v54 = vpop.f32.mrf.mxu2  ;;  %vm1787_vm7 = vcmp.lt.s32.totalorder %v4191_v35, 400  ;;  %v1722_v42 = vadd.s32 64, %v4014_v37 }
  0xfb   : > { %1491 = vst [vmem:[%s4026_s23 + $0x110] sm:$0xff] %v942_v54  ;;  %v4148_v59 = vsel %vm1784_vm4, %v942_v54, 0.0  ;;  %v1031_v60 = vpop.f32.mrf.mxu3  ;;  %v766_v63 = vpop.f32.mrf.mxu0 }
  0xfc   : > { %7400 = vst [vmem:[#allocation30_spill] sm:$0xff] %v4148_v59  ;;  %v4153_v2 = vsel %vm1784_vm4, %v1031_v60, 0.0  ;;  %v4157_v3 = vsel %vm1785_vm5, %v766_v63, 0.0  ;;  %v855_v4 = vpop.f32.mrf.mxu1 }
  0xfd   : > { %1492 = vst [vmem:[%s4026_s23 + $0x118] sm:$0xff] %v1031_v60  ;;  %v4162_v5 = vsel %vm1785_vm5, %v855_v4, 0.0  ;;  %v4216_v60 = vadd.s32 %v4016_v38, %v1722_v42  ;;  %v1724_v42 = vadd.s32 80, %v4014_v37 }
  0xfe   : > { %7401 = vst [vmem:[#allocation31_spill] sm:$0xff] %v4153_v2 }
  0xff   : > { %7402 = vst [vmem:[#allocation32_spill] sm:$0xff] %v4157_v3  ;;  %vm1788_vm8 = vcmp.lt.s32.totalorder %v4216_v60, 400 }
 0x100   : > { %1497 = vst [vmem:[%s4026_s23 + $0x140] sm:$0xff] %v766_v63  ;;  %v1723_v63 = vadd.s32 72, %v4014_v37 }
 0x101   : > { %7403 = vst [vmem:[#allocation33_spill] sm:$0xff] %v4162_v5 }
 0x102   : > { %1498 = vst [vmem:[%s4026_s23 + $0x148] sm:$0xff] %v855_v4  ;;  %v944_v20 = vpop.f32.mrf.mxu2 }
 0x103   : > { %1499 = vst [vmem:[%s4026_s23 + $0x150] sm:$0xff] %v944_v20  ;;  %v4174_v23 = vsel %vm1785_vm5, %v944_v20, 0.0  ;;  %v1033_v24 = vpop.f32.mrf.mxu3  ;;  %v769_v27 = vpop.f32.mrf.mxu0 }
 0x104   : > { %7404 = vst [vmem:[#allocation34_spill] sm:$0xff] %v4174_v23  ;;  %v4179_v30 = vsel %vm1785_vm5, %v1033_v24, 0.0  ;;  %v4183_v31 = vsel %vm1786_vm6, %v769_v27, 0.0  ;;  %v858_v32 = vpop.f32.mrf.mxu1 }
 0x105   : > { %1500 = vst [vmem:[%s4026_s23 + $0x158] sm:$0xff] %v1033_v24  ;;  %v4188_v34 = vsel %vm1786_vm6, %v858_v32, 0.0  ;;  %v3229_v24 = vld [vmem:[#allocation5 + $0x18] sm:$0xf] }
 0x106   : > { %7405 = vst [vmem:[#allocation35_spill] sm:$0xff] %v4179_v30  ;;  %808 = vmatmul.bf16.gmra.mxu0 %v3483_v21  ;;  %897 = vmatmul.bf16.gmra.mxu1 %v3483_v21 }
 0x107   : > { %7406 = vst [vmem:[#allocation36_spill] sm:$0xff] %v4183_v31  ;;  %986 = vmatmul.bf16.gmra.mxu2 %v3483_v21 }
 0x108   : > { %1505 = vst [vmem:[%s4026_s23 + $0x180] sm:$0xff] %v769_v27  ;;  %1075 = vmatmul.bf16.gmra.mxu3 %v3483_v21  ;;  %v4242_v21 = vadd.s32 %v4016_v38, %v1723_v63  ;;  %v3495_v27 = vld [vmem:[#allocation5 + $0x34] sm:$0xf0] }
 0x109   : > { %7407 = vst [vmem:[#allocation37_spill] sm:$0xff] %v4188_v34 }
 0x10a   : > { %1506 = vst [vmem:[%s4026_s23 + $0x188] sm:$0xff] %v858_v32  ;;  %v947_v48 = vpop.f32.mrf.mxu2  ;;  %v3491_v32 = vld [vmem:[#allocation5 + $0x1c] sm:$0xf]  ;;  %vm1789_vm9 = vcmp.lt.s32.totalorder %v4242_v21, 400 }
 0x10b   : > { %1507 = vst [vmem:[%s4026_s23 + $0x190] sm:$0xff] %v947_v48  ;;  %v4199_v49 = vsel %vm1786_vm6, %v947_v48, 0.0  ;;  %v1036_v50 = vpop.f32.mrf.mxu3  ;;  %v771_v51 = vpop.f32.mrf.mxu0  ;;  %v3230_v48 = vor.u32 %v3495_v27, %v3229_v24  ;;  %v4267_v27 = vadd.s32 %v4016_v38, %v1724_v42 }
 0x10c   : > { %7408 = vst [vmem:[#allocation38_spill] sm:$0xff] %v4199_v49  ;;  %v4204_v52 = vsel %vm1786_vm6, %v1036_v50, 0.0  ;;  %v4208_v53 = vsel %vm1787_vm7, %v771_v51, 0.0  ;;  %v860_v54 = vpop.f32.mrf.mxu1 }
 0x10d   : > { %1508 = vst [vmem:[%s4026_s23 + $0x198] sm:$0xff] %v1036_v50  ;;  %v4213_v55 = vsel %vm1787_vm7, %v860_v54, 0.0  ;;  %v3231_v50 = vld [vmem:[#allocation5 + $0x38] sm:$0xf0]  ;;  %1286 = vmatpush.bf16.msrb.mxu2 %v3230_v48  ;;  %v3494_v48 = vld [vmem:[#allocation5 + $0x2c] sm:$0xf0] }
 0x10e   : > { %7409 = vst [vmem:[#allocation39_spill] sm:$0xff] %v4204_v52  ;;  %vm1790_vm10 = vcmp.lt.s32.totalorder %v4267_v27, 400 }
 0x10f   : > { %7410 = vst [vmem:[#allocation40_spill] sm:$0xff] %v4208_v53 }
 0x110   : > { %1513 = vst [vmem:[%s4026_s23 + $0x1c0] sm:$0xff] %v771_v51 }
 0x111   : > { %7411 = vst [vmem:[#allocation41_spill] sm:$0xff] %v4213_v55 }
 0x112   : > { %1514 = vst [vmem:[%s4026_s23 + $0x1c8] sm:$0xff] %v860_v54  ;;  %v949_v4 = vpop.f32.mrf.mxu2  ;;  %v3234_v54 = vor.u32 %v3491_v32, %v3231_v50  ;;  %v3221_v32 = vld [vmem:[#allocation5 + $0x10] sm:$0xf] }
 0x113   : > { %1515 = vst [vmem:[%s4026_s23 + $0x1d0] sm:$0xff] %v949_v4  ;;  %v4225_v9 = vsel %vm1787_vm7, %v949_v4, 0.0  ;;  %v1038_v10 = vpop.f32.mrf.mxu3  ;;  %v774_v11 = vpop.f32.mrf.mxu0  ;;  %v3222_v50 = vor.u32 %v3494_v48, %v3221_v32 }
 0x114   : > { %7412 = vst [vmem:[#allocation42_spill] sm:$0xff] %v4225_v9  ;;  %v4230_v13 = vsel %vm1787_vm7, %v1038_v10, 0.0  ;;  %v4234_v14 = vsel %vm1788_vm8, %v774_v11, 0.0  ;;  %v863_v17 = vpop.f32.mrf.mxu1  ;;  %1375 = vmatpush.bf16.msrb.mxu3 %v3234_v54  ;;  %v1725_v54 = vadd.s32 88, %v4014_v37 }
 0x115   : > { %1516 = vst [vmem:[%s4026_s23 + $0x1d8] sm:$0xff] %v1038_v10  ;;  %v4239_v20 = vsel %vm1788_vm8, %v863_v17, 0.0  ;;  %1108 = vmatpush.bf16.msrb.mxu0 %v3222_v50 }
 0x116   : > { %7413 = vst [vmem:[#allocation43_spill] sm:$0xff] %v4230_v13  ;;  %813 = vmatmul.bf16.gmra.mxu0 %v3484_v8  ;;  %902 = vmatmul.bf16.gmra.mxu1 %v3484_v8 }
 0x117   : > { %7414 = vst [vmem:[#allocation44_spill] sm:$0xff] %v4234_v14  ;;  %991 = vmatmul.bf16.gmra.mxu2 %v3484_v8 }
 0x118   : > { %1521 = vst [vmem:[%s4026_s23 + $0x200] sm:$0xff] %v774_v11  ;;  %1080 = vmatmul.bf16.gmra.mxu3 %v3484_v8 }
 0x119   : > { %7415 = vst [vmem:[#allocation45_spill] sm:$0xff] %v4239_v20 }
 0x11a   : > { %1522 = vst [vmem:[%s4026_s23 + $0x208] sm:$0xff] %v863_v17  ;;  %v952_v51 = vpop.f32.mrf.mxu2 }
 0x11b   : > { %1523 = vst [vmem:[%s4026_s23 + $0x210] sm:$0xff] %v952_v51  ;;  %v4250_v63 = vsel %vm1788_vm8, %v952_v51, 0.0  ;;  %v1041_v4 = vpop.f32.mrf.mxu3  ;;  %v776_v8 = vpop.f32.mrf.mxu0  ;;  %v3490_v51 = vld [vmem:[#allocation5 + $0x14] sm:$0xf] }
 0x11c   : > { %7416 = vst [vmem:[#allocation46_spill] sm:$0xff] %v4250_v63  ;;  %v4255_v10 = vsel %vm1788_vm8, %v1041_v4, 0.0  ;;  %v4259_v11 = vsel %vm1789_vm9, %v776_v8, 0.0  ;;  %v865_v17 = vpop.f32.mrf.mxu1 }
 0x11d   : > { %1524 = vst [vmem:[%s4026_s23 + $0x218] sm:$0xff] %v1041_v4  ;;  %v4264_v24 = vsel %vm1789_vm9, %v865_v17, 0.0  ;;  %v3223_v4 = vld [vmem:[#allocation5 + $0x30] sm:$0xf0] }
 0x11e   : > { %7417 = vst [vmem:[#allocation47_spill] sm:$0xff] %v4255_v10 }
 0x11f   : > { %7418 = vst [vmem:[#allocation48_spill] sm:$0xff] %v4259_v11  ;;  %v3226_v11 = vor.u32 %v3490_v51, %v3223_v4  ;;  %v4293_v4 = vadd.s32 %v4016_v38, %v1725_v54 }
 0x120   : > { %1529 = vst [vmem:[%s4026_s23 + $0x240] sm:$0xff] %v776_v8 }
 0x121   : > { %7419 = vst [vmem:[#allocation49_spill] sm:$0xff] %v4264_v24  ;;  %v3485_v24 = vld [vmem:[%s3971_s5 + $0x68] sm:$0xff]  ;;  %1197 = vmatpush.bf16.msrb.mxu1 %v3226_v11  ;;  %vm1791_vm11 = vcmp.lt.s32.totalorder %v4293_v4, 400 }
 0x122   : > { %1530 = vst [vmem:[%s4026_s23 + $0x248] sm:$0xff] %v865_v17  ;;  %v954_v8 = vpop.f32.mrf.mxu2 }
 0x123   : > { %1531 = vst [vmem:[%s4026_s23 + $0x250] sm:$0xff] %v954_v8  ;;  %v4276_v42 = vsel %vm1789_vm9, %v954_v8, 0.0  ;;  %v1043_v17 = vpop.f32.mrf.mxu3  ;;  %v779_v32 = vpop.f32.mrf.mxu0  ;;  %v1726_v8 = vadd.s32 96, %v4014_v37 }
 0x124   : > { %7420 = vst [vmem:[#allocation50_spill] sm:$0xff] %v4276_v42  ;;  %v4281_v48 = vsel %vm1789_vm9, %v1043_v17, 0.0  ;;  %v4285_v51 = vsel %vm1790_vm10, %v779_v32, 0.0  ;;  %v868_v50 = vpop.f32.mrf.mxu1 }
 0x125   : > { %1532 = vst [vmem:[%s4026_s23 + $0x258] sm:$0xff] %v1043_v17  ;;  %v4290_v11 = vsel %vm1790_vm10, %v868_v50, 0.0 }
 0x126   : > { %7421 = vst [vmem:[#allocation51_spill] sm:$0xff] %v4281_v48  ;;  %818 = vmatmul.bf16.gmra.mxu0 %v3485_v24  ;;  %907 = vmatmul.bf16.gmra.mxu1 %v3485_v24 }
 0x127   : > { %7422 = vst [vmem:[#allocation52_spill] sm:$0xff] %v4285_v51  ;;  %996 = vmatmul.bf16.gmra.mxu2 %v3485_v24 }
 0x128   : > { %1537 = vst [vmem:[%s4026_s23 + $0x280] sm:$0xff] %v779_v32  ;;  %1085 = vmatmul.bf16.gmra.mxu3 %v3485_v24 }
 0x129   : > { %7423 = vst [vmem:[#allocation53_spill] sm:$0xff] %v4290_v11 }
 0x12a   : > { %1538 = vst [vmem:[%s4026_s23 + $0x288] sm:$0xff] %v868_v50  ;;  %v957_v17 = vpop.f32.mrf.mxu2 }
 0x12b   : > { %1539 = vst [vmem:[%s4026_s23 + $0x290] sm:$0xff] %v957_v17  ;;  %v4301_v32 = vsel %vm1790_vm10, %v957_v17, 0.0  ;;  %v1046_v54 = vpop.f32.mrf.mxu3  ;;  %v781_v50 = vpop.f32.mrf.mxu0  ;;  %v4318_v17 = vadd.s32 %v4016_v38, %v1726_v8 }
 0x12c   : > { %7424 = vst [vmem:[#allocation54_spill] sm:$0xff] %v4301_v32  ;;  %v4306_v11 = vsel %vm1790_vm10, %v1046_v54, 0.0  ;;  %v4310_v24 = vsel %vm1791_vm11, %v781_v50, 0.0  ;;  %v870_v51 = vpop.f32.mrf.mxu1  ;;  %v3486_v32 = vld [vmem:[%s3971_s5 + $0x70] sm:$0xff] }
 0x12d   : > { %1540 = vst [vmem:[%s4026_s23 + $0x298] sm:$0xff] %v1046_v54  ;;  %v4315_v48 = vsel %vm1791_vm11, %v870_v51, 0.0  ;;  %vm1792_vm12 = vcmp.lt.s32.totalorder %v4318_v17, 400  ;;  %v1727_v54 = vadd.s32 104, %v4014_v37 }
 0x12e   : > { %7425 = vst [vmem:[#allocation55_spill] sm:$0xff] %v4306_v11 }
 0x12f   : > { %7426 = vst [vmem:[#allocation56_spill] sm:$0xff] %v4310_v24 }
 0x130   : > { %1545 = vst [vmem:[%s4026_s23 + $0x2c0] sm:$0xff] %v781_v50 }
 0x131   : > { %7427 = vst [vmem:[#allocation57_spill] sm:$0xff] %v4315_v48 }
 0x132   : > { %1546 = vst [vmem:[%s4026_s23 + $0x2c8] sm:$0xff] %v870_v51  ;;  %v959_v11 = vpop.f32.mrf.mxu2 }
 0x133   : > { %1547 = vst [vmem:[%s4026_s23 + $0x2d0] sm:$0xff] %v959_v11  ;;  %v4327_v50 = vsel %vm1791_vm11, %v959_v11, 0.0  ;;  %v1048_v24 = vpop.f32.mrf.mxu3  ;;  %v784_v42 = vpop.f32.mrf.mxu0  ;;  %v4344_v11 = vadd.s32 %v4016_v38, %v1727_v54 }
 0x134   : > { %7428 = vst [vmem:[#allocation58_spill] sm:$0xff] %v4327_v50  ;;  %v4332_v8 = vsel %vm1791_vm11, %v1048_v24, 0.0  ;;  %v4336_v51 = vsel %vm1792_vm12, %v784_v42, 0.0  ;;  %v873_v48 = vpop.f32.mrf.mxu1 }
 0x135   : > { %1548 = vst [vmem:[%s4026_s23 + $0x2d8] sm:$0xff] %v1048_v24  ;;  %v4341_v10 = vsel %vm1792_vm12, %v873_v48, 0.0  ;;  %vm7140_vm13 = vcmp.lt.s32.totalorder %v4344_v11, 400  ;;  %v1728_v24 = vadd.s32 112, %v4014_v37 }
 0x136   : > { %7429 = vst [vmem:[#allocation59_spill] sm:$0xff] %v4332_v8  ;;  %823 = vmatmul.bf16.gmra.mxu0 %v3486_v32  ;;  %912 = vmatmul.bf16.gmra.mxu1 %v3486_v32 }
 0x137   : > { %7430 = vst [vmem:[#allocation60_spill] sm:$0xff] %v4336_v51  ;;  %1001 = vmatmul.bf16.gmra.mxu2 %v3486_v32 }
 0x138   : > { %1553 = vst [vmem:[%s4026_s23 + $0x300] sm:$0xff] %v784_v42  ;;  %1090 = vmatmul.bf16.gmra.mxu3 %v3486_v32 }
 0x139   : > { %7431 = vst [vmem:[#allocation61_spill] sm:$0xff] %v4341_v10 }
 0x13a   : > { %1554 = vst [vmem:[%s4026_s23 + $0x308] sm:$0xff] %v873_v48  ;;  %v962_v51 = vpop.f32.mrf.mxu2 }
 0x13b   : > { %1555 = vst [vmem:[%s4026_s23 + $0x310] sm:$0xff] %v962_v51  ;;  %v4352_v42 = vsel %vm1792_vm12, %v962_v51, 0.0  ;;  %v1051_v54 = vpop.f32.mrf.mxu3  ;;  %v786_v48 = vpop.f32.mrf.mxu0  ;;  %v4369_v51 = vadd.s32 %v4016_v38, %v1728_v24 }
 0x13c   : > { %7432 = vst [vmem:[#allocation62_spill] sm:$0xff] %v4352_v42  ;;  %v4357_v10 = vsel %vm1792_vm12, %v1051_v54, 0.0  ;;  %v4361_v32 = vsel %vm7140_vm13, %v786_v48, 0.0  ;;  %v875_v8 = vpop.f32.mrf.mxu1  ;;  %v4375_v42 = vld [vmem:[%s3971_s5 + $0x78] sm:$0xff] }
 0x13d   : > { %1556 = vst [vmem:[%s4026_s23 + $0x318] sm:$0xff] %v1051_v54  ;;  %v4366_v50 = vsel %vm7140_vm13, %v875_v8, 0.0  ;;  %vm7151_vm14 = vcmp.lt.s32.totalorder %v4369_v51, 400  ;;  %v1729_v54 = vadd.s32 120, %v4014_v37 }
 0x13e   : > { %7433 = vst [vmem:[#allocation63_spill] sm:$0xff] %v4357_v10 }
 0x13f   : > { %7434 = vst [vmem:[#allocation64_spill] sm:$0xff] %v4361_v32 }
 0x140   : > { %1561 = vst [vmem:[%s4026_s23 + $0x340] sm:$0xff] %v786_v48 }
 0x141   : > { %7435 = vst [vmem:[#allocation65_spill] sm:$0xff] %v4366_v50 }
 0x142   : > { %1562 = vst [vmem:[%s4026_s23 + $0x348] sm:$0xff] %v875_v8  ;;  %v964_v10 = vpop.f32.mrf.mxu2 }
 0x143   : > { %1563 = vst [vmem:[%s4026_s23 + $0x350] sm:$0xff] %v964_v10  ;;  %v4380_v48 = vsel %vm7140_vm13, %v964_v10, 0.0  ;;  %v1053_v32 = vpop.f32.mrf.mxu3  ;;  %v789_v63 = vpop.f32.mrf.mxu0  ;;  %v4397_v10 = vadd.s32 %v4016_v38, %v1729_v54 }
 0x144   : > { %7436 = vst [vmem:[#allocation66_spill] sm:$0xff] %v4380_v48  ;;  %v4385_v8 = vsel %vm7140_vm13, %v1053_v32, 0.0  ;;  %v4389_v24 = vsel %vm7151_vm14, %v789_v63, 0.0  ;;  %v878_v50 = vpop.f32.mrf.mxu1 }
 0x145   : > { %1564 = vst [vmem:[%s4026_s23 + $0x358] sm:$0xff] %v1053_v32  ;;  %v4394_v20 = vsel %vm7151_vm14, %v878_v50, 0.0  ;;  %vm7146_vm15 = vcmp.lt.s32.totalorder %v4397_v10, 400 }
 0x146   : > { %7437 = vst [vmem:[#allocation67_spill] sm:$0xff] %v4385_v8  ;;  %828 = vmatmul.bf16.gmra.mxu0 %v4375_v42  ;;  %917 = vmatmul.bf16.gmra.mxu1 %v4375_v42 }
 0x147   : > { %7438 = vst [vmem:[#allocation68_spill] sm:$0xff] %v4389_v24  ;;  %1006 = vmatmul.bf16.gmra.mxu2 %v4375_v42 }
 0x148   : > { %1569 = vst [vmem:[%s4026_s23 + $0x380] sm:$0xff] %v789_v63  ;;  %1095 = vmatmul.bf16.gmra.mxu3 %v4375_v42  ;;  %v1730_v63 = vadd.s32 128, %v4014_v37 }
 0x149   : > { %7439 = vst [vmem:[#allocation69_spill] sm:$0xff] %v4394_v20 }
 0x14a   : > { %1570 = vst [vmem:[%s4026_s23 + $0x388] sm:$0xff] %v878_v50  ;;  %v967_v32 = vpop.f32.mrf.mxu2 }
 0x14b   : > { %1571 = vst [vmem:[%s4026_s23 + $0x390] sm:$0xff] %v967_v32  ;;  %v4409_v50 = vsel %vm7151_vm14, %v967_v32, 0.0  ;;  %v1056_v54 = vpop.f32.mrf.mxu3  ;;  %v791_v20 = vpop.f32.mrf.mxu0  ;;  %v4426_v32 = vadd.s32 %v4016_v38, %v1730_v63 }
 0x14c   : > { %7440 = vst [vmem:[#allocation70_spill] sm:$0xff] %v4409_v50  ;;  %v4414_v24 = vsel %vm7151_vm14, %v1056_v54, 0.0  ;;  %v4418_v8 = vsel %vm7146_vm15, %v791_v20, 0.0  ;;  %v880_v48 = vpop.f32.mrf.mxu1 }
 0x14d   : > { %1572 = vst [vmem:[%s4026_s23 + $0x398] sm:$0xff] %v1056_v54  ;;  %v4423_v14 = vsel %vm7146_vm15, %v880_v48, 0.0  ;;  %vm7162_vm13 = vcmp.lt.s32.totalorder %v4426_v32, 400  ;;  %v1731_v54 = vadd.s32 136, %v4014_v37 }
 0x14e   : > { %7441 = vst [vmem:[#allocation71_spill] sm:$0xff] %v4414_v24 }
 0x14f   : > { %7442 = vst [vmem:[#allocation72_spill] sm:$0xff] %v4418_v8 }
 0x150   : > { %1577 = vst [vmem:[%s4026_s23 + $0x3c0] sm:$0xff] %v791_v20 }
 0x151   : > { %7443 = vst [vmem:[#allocation73_spill] sm:$0xff] %v4423_v14 }
 0x152   : > { %1578 = vst [vmem:[%s4026_s23 + $0x3c8] sm:$0xff] %v880_v48  ;;  %v969_v24 = vpop.f32.mrf.mxu2 }
 0x153   : > { %1579 = vst [vmem:[%s4026_s23 + $0x3d0] sm:$0xff] %v969_v24  ;;  %v4434_v8 = vsel %vm7146_vm15, %v969_v24, 0.0  ;;  %v1058_v20 = vpop.f32.mrf.mxu3  ;;  %v794_v50 = vpop.f32.mrf.mxu0  ;;  %v4451_v24 = vadd.s32 %v4016_v38, %v1731_v54 }
 0x154   : > { %7444 = vst [vmem:[#allocation74_spill] sm:$0xff] %v4434_v8  ;;  %v4439_v63 = vsel %vm7146_vm15, %v1058_v20, 0.0  ;;  %v4443_v48 = vsel %vm7162_vm13, %v794_v50, 0.0  ;;  %v883_v14 = vpop.f32.mrf.mxu1 }
 0x155   : > { %1580 = vst [vmem:[%s4026_s23 + $0x3d8] sm:$0xff] %v1058_v20  ;;  %v4448_v13 = vsel %vm7162_vm13, %v883_v14, 0.0  ;;  %vm7157_vm15 = vcmp.lt.s32.totalorder %v4451_v24, 400 }
 0x156   : > { %7445 = vst [vmem:[#allocation75_spill] sm:$0xff] %v4439_v63  ;;  %1109 = vmatmul.bf16.vlgmr.msrb.gmra.mxu0 %v3982_v39  ;;  %1198 = vmatmul.bf16.vlgmr.msrb.gmra.mxu1 %v3982_v39 }
 0x157   : > { %7446 = vst [vmem:[#allocation76_spill] sm:$0xff] %v4443_v48  ;;  %1287 = vmatmul.bf16.vlgmr.msrb.gmra.mxu2 %v3982_v39 }
 0x158   : > { %1585 = vst [vmem:[%s4026_s23 + $0x400] sm:$0xff] %v794_v50  ;;  %1376 = vmatmul.bf16.vlgmr.msrb.gmra.mxu3 %v3982_v39  ;;  %v1732_v50 = vadd.s32 144, %v4014_v37 }
 0x159   : > { %7447 = vst [vmem:[#allocation77_spill] sm:$0xff] %v4448_v13 }
 0x15a   : > { %1586 = vst [vmem:[%s4026_s23 + $0x408] sm:$0xff] %v883_v14  ;;  %v972_v20 = vpop.f32.mrf.mxu2 }
 0x15b   : > { %1587 = vst [vmem:[%s4026_s23 + $0x410] sm:$0xff] %v972_v20  ;;  %v4463_v14 = vsel %vm7162_vm13, %v972_v20, 0.0  ;;  %v1061_v54 = vpop.f32.mrf.mxu3  ;;  %v796_v13 = vpop.f32.mrf.mxu0  ;;  %v4480_v20 = vadd.s32 %v4016_v38, %v1732_v50 }
 0x15c   : > { %7448 = vst [vmem:[#allocation78_spill] sm:$0xff] %v4463_v14  ;;  %v4468_v48 = vsel %vm7162_vm13, %v1061_v54, 0.0  ;;  %v4472_v39 = vsel %vm7157_vm15, %v796_v13, 0.0  ;;  %v885_v63 = vpop.f32.mrf.mxu1 }
 0x15d   : > { %1588 = vst [vmem:[%s4026_s23 + $0x418] sm:$0xff] %v1061_v54  ;;  %v4477_v8 = vsel %vm7157_vm15, %v885_v63, 0.0  ;;  %vm7173_vm14 = vcmp.lt.s32.totalorder %v4480_v20, 400  ;;  %v1733_v54 = vadd.s32 152, %v4014_v37 }
 0x15e   : > { %7449 = vst [vmem:[#allocation79_spill] sm:$0xff] %v4468_v48 }
 0x15f   : > { %7450 = vst [vmem:[#allocation80_spill] sm:$0xff] %v4472_v39 }
 0x160   : > { %1593 = vst [vmem:[%s4026_s23 + $0x440] sm:$0xff] %v796_v13 }
 0x161   : > { %7451 = vst [vmem:[#allocation81_spill] sm:$0xff] %v4477_v8 }
 0x162   : > { %1594 = vst [vmem:[%s4026_s23 + $0x448] sm:$0xff] %v885_v63  ;;  %v974_v48 = vpop.f32.mrf.mxu2 }
 0x163   : > { %1595 = vst [vmem:[%s4026_s23 + $0x450] sm:$0xff] %v974_v48  ;;  %v4488_v39 = vsel %vm7157_vm15, %v974_v48, 0.0  ;;  %v1063_v13 = vpop.f32.mrf.mxu3  ;;  %v799_v14 = vpop.f32.mrf.mxu0  ;;  %v4505_v48 = vadd.s32 %v4016_v38, %v1733_v54 }
 0x164   : > { %7452 = vst [vmem:[#allocation82_spill] sm:$0xff] %v4488_v39  ;;  %v4493_v50 = vsel %vm7157_vm15, %v1063_v13, 0.0  ;;  %v4497_v63 = vsel %vm7173_vm14, %v799_v14, 0.0  ;;  %v888_v8 = vpop.f32.mrf.mxu1 }
 0x165   : > { %1596 = vst [vmem:[%s4026_s23 + $0x458] sm:$0xff] %v1063_v13  ;;  %v4502_v9 = vsel %vm7173_vm14, %v888_v8, 0.0  ;;  %vm7168_vm15 = vcmp.lt.s32.totalorder %v4505_v48, 400 }
 0x166   : > { %7453 = vst [vmem:[#allocation83_spill] sm:$0xff] %v4493_v50  ;;  %1114 = vmatmul.bf16.gmra.mxu0 %v3989_v57  ;;  %1203 = vmatmul.bf16.gmra.mxu1 %v3989_v57 }
 0x167   : > { %7454 = vst [vmem:[#allocation84_spill] sm:$0xff] %v4497_v63  ;;  %1292 = vmatmul.bf16.gmra.mxu2 %v3989_v57 }
 0x168   : > { %1601 = vst [vmem:[%s4026_s23 + $0x480] sm:$0xff] %v799_v14  ;;  %1381 = vmatmul.bf16.gmra.mxu3 %v3989_v57  ;;  %v1734_v14 = vadd.s32 160, %v4014_v37 }
 0x169   : > { %7455 = vst [vmem:[#allocation85_spill] sm:$0xff] %v4502_v9 }
 0x16a   : > { %1602 = vst [vmem:[%s4026_s23 + $0x488] sm:$0xff] %v888_v8  ;;  %v977_v13 = vpop.f32.mrf.mxu2 }
 0x16b   : > { %1603 = vst [vmem:[%s4026_s23 + $0x490] sm:$0xff] %v977_v13  ;;  %v4517_v8 = vsel %vm7173_vm14, %v977_v13, 0.0  ;;  %v1066_v54 = vpop.f32.mrf.mxu3  ;;  %v801_v9 = vpop.f32.mrf.mxu0  ;;  %v4534_v13 = vadd.s32 %v4016_v38, %v1734_v14 }
 0x16c   : > { %7456 = vst [vmem:[#allocation86_spill] sm:$0xff] %v4517_v8  ;;  %v4522_v63 = vsel %vm7173_vm14, %v1066_v54, 0.0  ;;  %v4526_v57 = vsel %vm7168_vm15, %v801_v9, 0.0  ;;  %v890_v50 = vpop.f32.mrf.mxu1 }
 0x16d   : > { %1604 = vst [vmem:[%s4026_s23 + $0x498] sm:$0xff] %v1066_v54  ;;  %v4531_v39 = vsel %vm7168_vm15, %v890_v50, 0.0  ;;  %vm1800_vm13 = vcmp.lt.s32.totalorder %v4534_v13, 400  ;;  %v1735_v54 = vadd.s32 168, %v4014_v37 }
 0x16e   : > { %7457 = vst [vmem:[#allocation87_spill] sm:$0xff] %v4522_v63 }
 0x16f   : > { %7458 = vst [vmem:[#allocation88_spill] sm:$0xff] %v4526_v57 }
 0x170   : > { %1609 = vst [vmem:[%s4026_s23 + $0x4c0] sm:$0xff] %v801_v9 }
 0x171   : > { %7459 = vst [vmem:[#allocation89_spill] sm:$0xff] %v4531_v39 }
 0x172   : > { %1610 = vst [vmem:[%s4026_s23 + $0x4c8] sm:$0xff] %v890_v50  ;;  %v979_v63 = vpop.f32.mrf.mxu2 }
 0x173   : > { %1611 = vst [vmem:[%s4026_s23 + $0x4d0] sm:$0xff] %v979_v63  ;;  %v4542_v57 = vsel %vm7168_vm15, %v979_v63, 0.0  ;;  %v1068_v9 = vpop.f32.mrf.mxu3  ;;  %v804_v8 = vpop.f32.mrf.mxu0  ;;  %v4559_v63 = vadd.s32 %v4016_v38, %v1735_v54 }
 0x174   : > { %7460 = vst [vmem:[#allocation90_spill] sm:$0xff] %v4542_v57  ;;  %v4547_v14 = vsel %vm7168_vm15, %v1068_v9, 0.0  ;;  %v4551_v50 = vsel %vm1800_vm13, %v804_v8, 0.0  ;;  %v893_v39 = vpop.f32.mrf.mxu1 }
 0x175   : > { %1612 = vst [vmem:[%s4026_s23 + $0x4d8] sm:$0xff] %v1068_v9  ;;  %v4556_v55 = vsel %vm1800_vm13, %v893_v39, 0.0  ;;  %vm7179_vm15 = vcmp.lt.s32.totalorder %v4559_v63, 400 }
 0x176   : > { %7461 = vst [vmem:[#allocation91_spill] sm:$0xff] %v4547_v14  ;;  %1119 = vmatmul.bf16.gmra.mxu0 %v3996_v58  ;;  %1208 = vmatmul.bf16.gmra.mxu1 %v3996_v58 }
 0x177   : > { %7462 = vst [vmem:[#allocation92_spill] sm:$0xff] %v4551_v50  ;;  %1297 = vmatmul.bf16.gmra.mxu2 %v3996_v58 }
 0x178   : > { %1617 = vst [vmem:[%s4026_s23 + $0x500] sm:$0xff] %v804_v8  ;;  %1386 = vmatmul.bf16.gmra.mxu3 %v3996_v58  ;;  %v1736_v8 = vadd.s32 176, %v4014_v37 }
 0x179   : > { %7463 = vst [vmem:[#allocation93_spill] sm:$0xff] %v4556_v55 }
 0x17a   : > { %1618 = vst [vmem:[%s4026_s23 + $0x508] sm:$0xff] %v893_v39  ;;  %v982_v9 = vpop.f32.mrf.mxu2 }
 0x17b   : > { %1619 = vst [vmem:[%s4026_s23 + $0x510] sm:$0xff] %v982_v9  ;;  %v4571_v39 = vsel %vm1800_vm13, %v982_v9, 0.0  ;;  %v1071_v54 = vpop.f32.mrf.mxu3  ;;  %v806_v55 = vpop.f32.mrf.mxu0  ;;  %v4588_v9 = vadd.s32 %v4016_v38, %v1736_v8 }
 0x17c   : > { %7464 = vst [vmem:[#allocation94_spill] sm:$0xff] %v4571_v39  ;;  %v4576_v50 = vsel %vm1800_vm13, %v1071_v54, 0.0  ;;  %v4580_v58 = vsel %vm7179_vm15, %v806_v55, 0.0  ;;  %v895_v14 = vpop.f32.mrf.mxu1 }
 0x17d   : > { %1620 = vst [vmem:[%s4026_s23 + $0x518] sm:$0xff] %v1071_v54  ;;  %v4585_v57 = vsel %vm7179_vm15, %v895_v14, 0.0  ;;  %vm7184_vm14 = vcmp.lt.s32.totalorder %v4588_v9, 400  ;;  %v1737_v54 = vadd.s32 184, %v4014_v37 }
 0x17e   : > { %7465 = vst [vmem:[#allocation95_spill] sm:$0xff] %v4576_v50 }
 0x17f   : > { %7466 = vst [vmem:[#allocation96_spill] sm:$0xff] %v4580_v58 }
 0x180   : > { %1625 = vst [vmem:[%s4026_s23 + $0x540] sm:$0xff] %v806_v55 }
 0x181   : > { %7467 = vst [vmem:[#allocation97_spill] sm:$0xff] %v4585_v57 }
 0x182   : > { %1626 = vst [vmem:[%s4026_s23 + $0x548] sm:$0xff] %v895_v14  ;;  %v984_v50 = vpop.f32.mrf.mxu2 }
 0x183   : > { %1627 = vst [vmem:[%s4026_s23 + $0x550] sm:$0xff] %v984_v50  ;;  %v4596_v58 = vsel %vm7179_vm15, %v984_v50, 0.0  ;;  %v1073_v55 = vpop.f32.mrf.mxu3  ;;  %v809_v39 = vpop.f32.mrf.mxu0  ;;  %v4613_v50 = vadd.s32 %v4016_v38, %v1737_v54 }
 0x184   : > { %7468 = vst [vmem:[#allocation98_spill] sm:$0xff] %v4596_v58  ;;  %v4601_v8 = vsel %vm7179_vm15, %v1073_v55, 0.0  ;;  %v4605_v14 = vsel %vm7184_vm14, %v809_v39, 0.0  ;;  %v898_v57 = vpop.f32.mrf.mxu1 }
 0x185   : > { %1628 = vst [vmem:[%s4026_s23 + $0x558] sm:$0xff] %v1073_v55  ;;  %v4610_v53 = vsel %vm7184_vm14, %v898_v57, 0.0  ;;  %vm7191_vm15 = vcmp.lt.s32.totalorder %v4613_v50, 400 }
 0x186   : > { %7469 = vst [vmem:[#allocation99_spill] sm:$0xff] %v4601_v8  ;;  %1124 = vmatmul.bf16.gmra.mxu0 %v4003_v7  ;;  %1213 = vmatmul.bf16.gmra.mxu1 %v4003_v7 }
 0x187   : > { %7470 = vst [vmem:[#allocation100_spill] sm:$0xff] %v4605_v14  ;;  %1302 = vmatmul.bf16.gmra.mxu2 %v4003_v7 }
 0x188   : > { %1633 = vst [vmem:[%s4026_s23 + $0x580] sm:$0xff] %v809_v39  ;;  %1391 = vmatmul.bf16.gmra.mxu3 %v4003_v7  ;;  %v1738_v39 = vadd.s32 192, %v4014_v37 }
 0x189   : > { %7471 = vst [vmem:[#allocation101_spill] sm:$0xff] %v4610_v53 }
 0x18a   : > { %1634 = vst [vmem:[%s4026_s23 + $0x588] sm:$0xff] %v898_v57  ;;  %v987_v55 = vpop.f32.mrf.mxu2 }
 0x18b   : > { %1635 = vst [vmem:[%s4026_s23 + $0x590] sm:$0xff] %v987_v55  ;;  %v4625_v57 = vsel %vm7184_vm14, %v987_v55, 0.0  ;;  %v1076_v54 = vpop.f32.mrf.mxu3  ;;  %v811_v53 = vpop.f32.mrf.mxu0  ;;  %v4642_v55 = vadd.s32 %v4016_v38, %v1738_v39 }
 0x18c   : > { %7472 = vst [vmem:[#allocation102_spill] sm:$0xff] %v4625_v57  ;;  %v4630_v14 = vsel %vm7184_vm14, %v1076_v54, 0.0  ;;  %v4634_v7 = vsel %vm7191_vm15, %v811_v53, 0.0  ;;  %v900_v8 = vpop.f32.mrf.mxu1 }
 0x18d   : > { %1636 = vst [vmem:[%s4026_s23 + $0x598] sm:$0xff] %v1076_v54  ;;  %v4639_v58 = vsel %vm7191_vm15, %v900_v8, 0.0  ;;  %vm7196_vm14 = vcmp.lt.s32.totalorder %v4642_v55, 400  ;;  %v1739_v54 = vadd.s32 200, %v4014_v37 }
 0x18e   : > { %7473 = vst [vmem:[#allocation103_spill] sm:$0xff] %v4630_v14 }
 0x18f   : > { %7474 = vst [vmem:[#allocation104_spill] sm:$0xff] %v4634_v7 }
 0x190   : > { %1641 = vst [vmem:[%s4026_s23 + $0x5c0] sm:$0xff] %v811_v53 }
 0x191   : > { %7475 = vst [vmem:[#allocation105_spill] sm:$0xff] %v4639_v58 }
 0x192   : > { %1642 = vst [vmem:[%s4026_s23 + $0x5c8] sm:$0xff] %v900_v8  ;;  %v989_v14 = vpop.f32.mrf.mxu2 }
 0x193   : > { %1643 = vst [vmem:[%s4026_s23 + $0x5d0] sm:$0xff] %v989_v14  ;;  %v4650_v7 = vsel %vm7191_vm15, %v989_v14, 0.0  ;;  %v1078_v53 = vpop.f32.mrf.mxu3  ;;  %v814_v57 = vpop.f32.mrf.mxu0  ;;  %v4667_v14 = vadd.s32 %v4016_v38, %v1739_v54 }
 0x194   : > { %7476 = vst [vmem:[#allocation106_spill] sm:$0xff] %v4650_v7  ;;  %v4655_v39 = vsel %vm7191_vm15, %v1078_v53, 0.0  ;;  %v4659_v8 = vsel %vm7196_vm14, %v814_v57, 0.0  ;;  %v903_v58 = vpop.f32.mrf.mxu1  ;;  %v3632_v7 = vld [vmem:[%s3971_s5 + $0x20] sm:$0xff] }
 0x195   : > { %1644 = vst [vmem:[%s4026_s23 + $0x5d8] sm:$0xff] %v1078_v53  ;;  %v4664_v52 = vsel %vm7196_vm14, %v903_v58, 0.0  ;;  %vm7203_vm15 = vcmp.lt.s32.totalorder %v4667_v14, 400 }
 0x196   : > { %7477 = vst [vmem:[#allocation107_spill] sm:$0xff] %v4655_v39  ;;  %1129 = vmatmul.bf16.gmra.mxu0 %v3632_v7  ;;  %1218 = vmatmul.bf16.gmra.mxu1 %v3632_v7 }
 0x197   : > { %7478 = vst [vmem:[#allocation108_spill] sm:$0xff] %v4659_v8  ;;  %1307 = vmatmul.bf16.gmra.mxu2 %v3632_v7 }
 0x198   : > { %1649 = vst [vmem:[%s4026_s23 + $0x600] sm:$0xff] %v814_v57  ;;  %1396 = vmatmul.bf16.gmra.mxu3 %v3632_v7  ;;  %v1740_v57 = vadd.s32 208, %v4014_v37 }
 0x199   : > { %7479 = vst [vmem:[#allocation109_spill] sm:$0xff] %v4664_v52 }
 0x19a   : > { %1650 = vst [vmem:[%s4026_s23 + $0x608] sm:$0xff] %v903_v58  ;;  %v992_v53 = vpop.f32.mrf.mxu2 }
 0x19b   : > { %1651 = vst [vmem:[%s4026_s23 + $0x610] sm:$0xff] %v992_v53  ;;  %v4676_v52 = vsel %vm7196_vm14, %v992_v53, 0.0  ;;  %v1081_v54 = vpop.f32.mrf.mxu3  ;;  %v816_v58 = vpop.f32.mrf.mxu0  ;;  %v4693_v53 = vadd.s32 %v4016_v38, %v1740_v57 }
 0x19c   : > { %7480 = vst [vmem:[#allocation110_spill] sm:$0xff] %v4676_v52  ;;  %v4681_v8 = vsel %vm7196_vm14, %v1081_v54, 0.0  ;;  %v4685_v7 = vsel %vm7203_vm15, %v816_v58, 0.0  ;;  %v905_v39 = vpop.f32.mrf.mxu1 }
 0x19d   : > { %1652 = vst [vmem:[%s4026_s23 + $0x618] sm:$0xff] %v1081_v54  ;;  %v4690_v49 = vsel %vm7203_vm15, %v905_v39, 0.0  ;;  %vm7208_vm14 = vcmp.lt.s32.totalorder %v4693_v53, 400  ;;  %v1741_v54 = vadd.s32 216, %v4014_v37 }
 0x19e   : > { %7481 = vst [vmem:[#allocation111_spill] sm:$0xff] %v4681_v8 }
 0x19f   : > { %7482 = vst [vmem:[#allocation112_spill] sm:$0xff] %v4685_v7 }
 0x1a0   : > { %1657 = vst [vmem:[%s4026_s23 + $0x640] sm:$0xff] %v816_v58 }
 0x1a1   : > { %7483 = vst [vmem:[#allocation113_spill] sm:$0xff] %v4690_v49 }
 0x1a2   : > { %1658 = vst [vmem:[%s4026_s23 + $0x648] sm:$0xff] %v905_v39  ;;  %v994_v8 = vpop.f32.mrf.mxu2 }
 0x1a3   : > { %1659 = vst [vmem:[%s4026_s23 + $0x650] sm:$0xff] %v994_v8  ;;  %v4701_v7 = vsel %vm7203_vm15, %v994_v8, 0.0  ;;  %v1083_v58 = vpop.f32.mrf.mxu3  ;;  %v819_v52 = vpop.f32.mrf.mxu0  ;;  %v4718_v8 = vadd.s32 %v4016_v38, %v1741_v54 }
 0x1a4   : > { %7484 = vst [vmem:[#allocation114_spill] sm:$0xff] %v4701_v7  ;;  %v4706_v57 = vsel %vm7203_vm15, %v1083_v58, 0.0  ;;  %v4710_v39 = vsel %vm7208_vm14, %v819_v52, 0.0  ;;  %v908_v49 = vpop.f32.mrf.mxu1  ;;  %v3633_v7 = vld [vmem:[%s3971_s5 + $0x28] sm:$0xff] }
 0x1a5   : > { %1660 = vst [vmem:[%s4026_s23 + $0x658] sm:$0xff] %v1083_v58  ;;  %v4715_v34 = vsel %vm7208_vm14, %v908_v49, 0.0  ;;  %vm7215_vm15 = vcmp.lt.s32.totalorder %v4718_v8, 400 }
 0x1a6   : > { %7485 = vst [vmem:[#allocation115_spill] sm:$0xff] %v4706_v57  ;;  %1134 = vmatmul.bf16.gmra.mxu0 %v3633_v7  ;;  %1223 = vmatmul.bf16.gmra.mxu1 %v3633_v7 }
 0x1a7   : > { %7486 = vst [vmem:[#allocation116_spill] sm:$0xff] %v4710_v39  ;;  %1312 = vmatmul.bf16.gmra.mxu2 %v3633_v7 }
 0x1a8   : > { %1665 = vst [vmem:[%s4026_s23 + $0x680] sm:$0xff] %v819_v52  ;;  %1401 = vmatmul.bf16.gmra.mxu3 %v3633_v7  ;;  %v1742_v52 = vadd.s32 224, %v4014_v37 }
 0x1a9   : > { %7487 = vst [vmem:[#allocation117_spill] sm:$0xff] %v4715_v34 }
 0x1aa   : > { %1666 = vst [vmem:[%s4026_s23 + $0x688] sm:$0xff] %v908_v49  ;;  %v997_v58 = vpop.f32.mrf.mxu2 }
 0x1ab   : > { %1667 = vst [vmem:[%s4026_s23 + $0x690] sm:$0xff] %v997_v58  ;;  %v4727_v34 = vsel %vm7208_vm14, %v997_v58, 0.0  ;;  %v1086_v54 = vpop.f32.mrf.mxu3  ;;  %v821_v49 = vpop.f32.mrf.mxu0  ;;  %v4744_v58 = vadd.s32 %v4016_v38, %v1742_v52 }
 0x1ac   : > { %7488 = vst [vmem:[#allocation118_spill] sm:$0xff] %v4727_v34  ;;  %v4732_v39 = vsel %vm7208_vm14, %v1086_v54, 0.0  ;;  %v4736_v7 = vsel %vm7215_vm15, %v821_v49, 0.0  ;;  %v910_v57 = vpop.f32.mrf.mxu1 }
 0x1ad   : > { %1668 = vst [vmem:[%s4026_s23 + $0x698] sm:$0xff] %v1086_v54  ;;  %v4741_v31 = vsel %vm7215_vm15, %v910_v57, 0.0  ;;  %vm7220_vm14 = vcmp.lt.s32.totalorder %v4744_v58, 400  ;;  %v1743_v54 = vadd.s32 232, %v4014_v37 }
 0x1ae   : > { %7489 = vst [vmem:[#allocation119_spill] sm:$0xff] %v4732_v39 }
 0x1af   : > { %7490 = vst [vmem:[#allocation120_spill] sm:$0xff] %v4736_v7 }
 0x1b0   : > { %1673 = vst [vmem:[%s4026_s23 + $0x6c0] sm:$0xff] %v821_v49 }
 0x1b1   : > { %7491 = vst [vmem:[#allocation121_spill] sm:$0xff] %v4741_v31 }
 0x1b2   : > { %1674 = vst [vmem:[%s4026_s23 + $0x6c8] sm:$0xff] %v910_v57  ;;  %v999_v39 = vpop.f32.mrf.mxu2 }
 0x1b3   : > { %1675 = vst [vmem:[%s4026_s23 + $0x6d0] sm:$0xff] %v999_v39  ;;  %v4752_v7 = vsel %vm7215_vm15, %v999_v39, 0.0  ;;  %v1088_v49 = vpop.f32.mrf.mxu3  ;;  %v824_v34 = vpop.f32.mrf.mxu0  ;;  %v4769_v39 = vadd.s32 %v4016_v38, %v1743_v54 }
 0x1b4   : > { %7492 = vst [vmem:[#allocation122_spill] sm:$0xff] %v4752_v7  ;;  %v4757_v52 = vsel %vm7215_vm15, %v1088_v49, 0.0  ;;  %v4761_v57 = vsel %vm7220_vm14, %v824_v34, 0.0  ;;  %v913_v31 = vpop.f32.mrf.mxu1  ;;  %v3634_v7 = vld [vmem:[%s3971_s5 + $0x30] sm:$0xff] }
 0x1b5   : > { %1676 = vst [vmem:[%s4026_s23 + $0x6d8] sm:$0xff] %v1088_v49  ;;  %v4766_v30 = vsel %vm7220_vm14, %v913_v31, 0.0  ;;  %vm7226_vm15 = vcmp.lt.s32.totalorder %v4769_v39, 400 }
 0x1b6   : > { %7493 = vst [vmem:[#allocation123_spill] sm:$0xff] %v4757_v52  ;;  %1139 = vmatmul.bf16.gmra.mxu0 %v3634_v7  ;;  %1228 = vmatmul.bf16.gmra.mxu1 %v3634_v7 }
 0x1b7   : > { %7494 = vst [vmem:[#allocation124_spill] sm:$0xff] %v4761_v57  ;;  %1317 = vmatmul.bf16.gmra.mxu2 %v3634_v7 }
 0x1b8   : > { %1681 = vst [vmem:[%s4026_s23 + $0x700] sm:$0xff] %v824_v34  ;;  %1406 = vmatmul.bf16.gmra.mxu3 %v3634_v7  ;;  %v1744_v34 = vadd.s32 240, %v4014_v37 }
 0x1b9   : > { %7495 = vst [vmem:[#allocation125_spill] sm:$0xff] %v4766_v30 }
 0x1ba   : > { %1682 = vst [vmem:[%s4026_s23 + $0x708] sm:$0xff] %v913_v31  ;;  %v1002_v49 = vpop.f32.mrf.mxu2 }
 0x1bb   : > { %1683 = vst [vmem:[%s4026_s23 + $0x710] sm:$0xff] %v1002_v49  ;;  %v4778_v30 = vsel %vm7220_vm14, %v1002_v49, 0.0  ;;  %v1091_v54 = vpop.f32.mrf.mxu3  ;;  %v826_v31 = vpop.f32.mrf.mxu0  ;;  %v4795_v49 = vadd.s32 %v4016_v38, %v1744_v34 }
 0x1bc   : > { %7496 = vst [vmem:[#allocation126_spill] sm:$0xff] %v4778_v30  ;;  %v4783_v57 = vsel %vm7220_vm14, %v1091_v54, 0.0  ;;  %v4787_v7 = vsel %vm7226_vm15, %v826_v31, 0.0  ;;  %v915_v52 = vpop.f32.mrf.mxu1 }
 0x1bd   : > { %1684 = vst [vmem:[%s4026_s23 + $0x718] sm:$0xff] %v1091_v54  ;;  %v4792_v23 = vsel %vm7226_vm15, %v915_v52, 0.0  ;;  %vm1810_vm14 = vcmp.lt.s32.totalorder %v4795_v49, 400  ;;  %v1745_v54 = vadd.s32 248, %v4014_v37 }
 0x1be   : > { %7497 = vst [vmem:[#allocation127_spill] sm:$0xff] %v4783_v57 }
 0x1bf   : > { %7498 = vst [vmem:[#allocation128_spill] sm:$0xff] %v4787_v7 }
 0x1c0   : > { %1689 = vst [vmem:[%s4026_s23 + $0x740] sm:$0xff] %v826_v31 }
 0x1c1   : > { %7499 = vst [vmem:[#allocation129_spill] sm:$0xff] %v4792_v23 }
 0x1c2   : > { %1690 = vst [vmem:[%s4026_s23 + $0x748] sm:$0xff] %v915_v52  ;;  %v1004_v57 = vpop.f32.mrf.mxu2 }
 0x1c3   : > { %1691 = vst [vmem:[%s4026_s23 + $0x750] sm:$0xff] %v1004_v57  ;;  %v4803_v7 = vsel %vm7226_vm15, %v1004_v57, 0.0  ;;  %v1093_v31 = vpop.f32.mrf.mxu3  ;;  %v829_v30 = vpop.f32.mrf.mxu0  ;;  %v4820_v57 = vadd.s32 %v4016_v38, %v1745_v54 }
 0x1c4   : > { %7500 = vst [vmem:[#allocation130_spill] sm:$0xff] %v4803_v7  ;;  %v4808_v34 = vsel %vm7226_vm15, %v1093_v31, 0.0  ;;  %v4812_v52 = vsel %vm1810_vm14, %v829_v30, 0.0  ;;  %v918_v23 = vpop.f32.mrf.mxu1  ;;  %v3635_v7 = vld [vmem:[%s3971_s5 + $0x38] sm:$0xff] }
 0x1c5   : > { %1692 = vst [vmem:[%s4026_s23 + $0x758] sm:$0xff] %v1093_v31  ;;  %v4817_v37 = vsel %vm1810_vm14, %v918_v23, 0.0  ;;  %vm1811_vm15 = vcmp.lt.s32.totalorder %v4820_v57, 400 }
 0x1c6   : > { %7501 = vst [vmem:[#allocation131_spill] sm:$0xff] %v4808_v34  ;;  %1144 = vmatmul.bf16.gmra.mxu0 %v3635_v7  ;;  %1233 = vmatmul.bf16.gmra.mxu1 %v3635_v7 }
 0x1c7   : > { %7502 = vst [vmem:[#allocation132_spill] sm:$0xff] %v4812_v52  ;;  %1322 = vmatmul.bf16.gmra.mxu2 %v3635_v7 }
 0x1c8   : > { %1697 = vst [vmem:[%s4026_s23 + $0x780] sm:$0xff] %v829_v30  ;;  %1411 = vmatmul.bf16.gmra.mxu3 %v3635_v7 }
 0x1c9   : > { %7503 = vst [vmem:[#allocation133_spill] sm:$0xff] %v4817_v37 }
 0x1ca   : > { %1698 = vst [vmem:[%s4026_s23 + $0x788] sm:$0xff] %v918_v23  ;;  %v1007_v31 = vpop.f32.mrf.mxu2 }
 0x1cb   : > { %1699 = vst [vmem:[%s4026_s23 + $0x790] sm:$0xff] %v1007_v31  ;;  %v4828_v30 = vsel %vm1810_vm14, %v1007_v31, 0.0  ;;  %v1096_v38 = vpop.f32.mrf.mxu3  ;;  %v831_v54 = vpop.f32.mrf.mxu0 }
 0x1cc   : > { %7504 = vst [vmem:[#allocation134_spill] sm:$0xff] %v4828_v30  ;;  %v4833_v23 = vsel %vm1810_vm14, %v1096_v38, 0.0  ;;  %v4837_v7 = vsel %vm1811_vm15, %v831_v54, 0.0  ;;  %v920_v37 = vpop.f32.mrf.mxu1 }
 0x1cd   : > { %1700 = vst [vmem:[%s4026_s23 + $0x798] sm:$0xff] %v1096_v38  ;;  %v4842_v31 = vsel %vm1811_vm15, %v920_v37, 0.0 }
 0x1ce   : > { %7505 = vst [vmem:[#allocation135_spill] sm:$0xff] %v4833_v23 }
 0x1cf   : > { %7506 = vst [vmem:[#allocation136_spill] sm:$0xff] %v4837_v7 }
 0x1d0   : > { %1705 = vst [vmem:[%s4026_s23 + $0x7c0] sm:$0xff] %v831_v54 }
 0x1d1   : > { %7507 = vst [vmem:[#allocation137_spill] sm:$0xff] %v4842_v31 }
 0x1d2   : > { %1706 = vst [vmem:[%s4026_s23 + $0x7c8] sm:$0xff] %v920_v37  ;;  %v1009_v30 = vpop.f32.mrf.mxu2 }
 0x1d3   : > { %1707 = vst [vmem:[%s4026_s23 + $0x7d0] sm:$0xff] %v1009_v30  ;;  %v4848_v52 = vsel %vm1811_vm15, %v1009_v30, 0.0  ;;  %v1098_v38 = vpop.f32.mrf.mxu3  ;;  %v1110_v23 = vpop.f32.mrf.mxu0  ;;  %v3636_v30 = vld [vmem:[%s3971_s5 + $0x40] sm:$0xff] }
 0x1d4   : > { %7508 = vst [vmem:[#allocation138_spill] sm:$0xff] %v4848_v52  ;;  %v4853_v7 = vsel %vm1811_vm15, %v1098_v38, 0.0  ;;  %v4857_v54 = vsel %vm1780_vm0, %v1110_v23, 0.0  ;;  %v1199_v37 = vpop.f32.mrf.mxu1 }
 0x1d5   : > { %1708 = vst [vmem:[%s4026_s23 + $0x7d8] sm:$0xff] %v1098_v38  ;;  %v4862_v31 = vsel %vm1780_vm0, %v1199_v37, 0.0 }
 0x1d6   : > { %7509 = vst [vmem:[#allocation139_spill] sm:$0xff] %v4853_v7  ;;  %1149 = vmatmul.bf16.gmra.mxu0 %v3636_v30  ;;  %1238 = vmatmul.bf16.gmra.mxu1 %v3636_v30 }
 0x1d7   : > { %1461 = vst [vmem:[%s4026_s23 + $0x20] sm:$0xff] %v1110_v23  ;;  %1327 = vmatmul.bf16.gmra.mxu2 %v3636_v30 }
 0x1d8   : > { %7510 = vst [vmem:[#allocation140_spill] sm:$0xff] %v4862_v31  ;;  %1416 = vmatmul.bf16.gmra.mxu3 %v3636_v30 }
 0x1d9   : > { %1462 = vst [vmem:[%s4026_s23 + $0x28] sm:$0xff] %v1199_v37 }
 0x1da   : > { %v1288_v38 = vpop.f32.mrf.mxu2 }
 0x1db   : > { %1463 = vst [vmem:[%s4026_s23 + $0x30] sm:$0xff] %v1288_v38  ;;  %v4869_v7 = vsel %vm1780_vm0, %v1288_v38, 0.0  ;;  %v1377_v23 = vpop.f32.mrf.mxu3  ;;  %v1112_v52 = vpop.f32.mrf.mxu0 }
 0x1dc   : > { %1464 = vst [vmem:[%s4026_s23 + $0x38] sm:$0xff] %v1377_v23  ;;  %v4874_v37 = vsel %vm1780_vm0, %v1377_v23, 0.0  ;;  %v4878_v34 = vsel %vm1781_vm1, %v1112_v52, 0.0  ;;  %v1201_v30 = vpop.f32.mrf.mxu1  ;;  %vm7559_vm0 = vcmp.lt.s32.totalorder %v4344_v11, 400  ;;  %v3643_v11 = vld [vmem:[%s3971_s5 + $0x78] sm:$0xff] }
 0x1dd   : > { %7511 = vst [vmem:[#allocation141_spill] sm:$0xff] %v4874_v37  ;;  %v4883_v38 = vsel %vm1781_vm1, %v1201_v30, 0.0 }
 0x1de   : > { %7512 = vst [vmem:[#allocation142_spill] sm:$0xff] %v4878_v34 }
 0x1df   : > { %1469 = vst [vmem:[%s4026_s23 + $0x60] sm:$0xff] %v1112_v52 }
 0x1e0   : > { %7513 = vst [vmem:[#allocation143_spill] sm:$0xff] %v4883_v38 }
 0x1e1   : > { %1470 = vst [vmem:[%s4026_s23 + $0x68] sm:$0xff] %v1201_v30 }
 0x1e2   : > { %v1290_v5 = vpop.f32.mrf.mxu2 }
 0x1e3   : > { %1471 = vst [vmem:[%s4026_s23 + $0x70] sm:$0xff] %v1290_v5  ;;  %v4889_v40 = vsel %vm1781_vm1, %v1290_v5, 0.0  ;;  %v1379_v23 = vpop.f32.mrf.mxu3  ;;  %v1115_v3 = vpop.f32.mrf.mxu0  ;;  %v3637_v5 = vld [vmem:[%s3971_s5 + $0x48] sm:$0xff] }
 0x1e4   : > { %7514 = vst [vmem:[#allocation144_spill] sm:$0xff] %v4889_v40  ;;  %v4894_v2 = vsel %vm1781_vm1, %v1379_v23, 0.0  ;;  %v4898_v52 = vsel %vm1782_vm2, %v1115_v3, 0.0  ;;  %v1204_v30 = vpop.f32.mrf.mxu1  ;;  %vm7561_vm1 = vmmov %vm7559_vm0 }
 0x1e5   : > { %1472 = vst [vmem:[%s4026_s23 + $0x78] sm:$0xff] %v1379_v23  ;;  %v4903_v59 = vsel %vm1782_vm2, %v1204_v30, 0.0 }
 0x1e6   : > { %7515 = vst [vmem:[#allocation145_spill] sm:$0xff] %v4894_v2  ;;  %1154 = vmatmul.bf16.gmra.mxu0 %v3637_v5  ;;  %1243 = vmatmul.bf16.gmra.mxu1 %v3637_v5 }
 0x1e7   : > { %1477 = vst [vmem:[%s4026_s23 + $0xa0] sm:$0xff] %v1115_v3  ;;  %1332 = vmatmul.bf16.gmra.mxu2 %v3637_v5 }
 0x1e8   : > { %7516 = vst [vmem:[#allocation146_spill] sm:$0xff] %v4903_v59  ;;  %1421 = vmatmul.bf16.gmra.mxu3 %v3637_v5 }
 0x1e9   : > { %1478 = vst [vmem:[%s4026_s23 + $0xa8] sm:$0xff] %v1204_v30 }
 0x1ea   : > { %v1293_v47 = vpop.f32.mrf.mxu2 }
 0x1eb   : > { %1479 = vst [vmem:[%s4026_s23 + $0xb0] sm:$0xff] %v1293_v47  ;;  %v4910_v23 = vsel %vm1782_vm2, %v1293_v47, 0.0  ;;  %v1382_v3 = vpop.f32.mrf.mxu3  ;;  %v1117_v43 = vpop.f32.mrf.mxu0 }
 0x1ec   : > { %7517 = vst [vmem:[#allocation147_spill] sm:$0xff] %v4910_v23  ;;  %v4915_v30 = vsel %vm1782_vm2, %v1382_v3, 0.0  ;;  %v4919_v41 = vsel %vm1783_vm3, %v1117_v43, 0.0  ;;  %v1206_v5 = vpop.f32.mrf.mxu1  ;;  %vm7563_vm2 = vmmov %vm7559_vm0 }
 0x1ed   : > { %1480 = vst [vmem:[%s4026_s23 + $0xb8] sm:$0xff] %v1382_v3  ;;  %v4924_v47 = vsel %vm1783_vm3, %v1206_v5, 0.0 }
 0x1ee   : > { %7518 = vst [vmem:[#allocation148_spill] sm:$0xff] %v4915_v30 }
 0x1ef   : > { %7519 = vst [vmem:[#allocation149_spill] sm:$0xff] %v4919_v41 }
 0x1f0   : > { %1485 = vst [vmem:[%s4026_s23 + $0xe0] sm:$0xff] %v1117_v43 }
 0x1f1   : > { %7520 = vst [vmem:[#allocation150_spill] sm:$0xff] %v4924_v47 }
 0x1f2   : > { %1486 = vst [vmem:[%s4026_s23 + $0xe8] sm:$0xff] %v1206_v5  ;;  %v1295_v36 = vpop.f32.mrf.mxu2 }
 0x1f3   : > { %1487 = vst [vmem:[%s4026_s23 + $0xf0] sm:$0xff] %v1295_v36  ;;  %v4930_v1 = vsel %vm1783_vm3, %v1295_v36, 0.0  ;;  %v1384_v3 = vpop.f32.mrf.mxu3  ;;  %v1120_v33 = vpop.f32.mrf.mxu0  ;;  %v3638_v36 = vld [vmem:[%s3971_s5 + $0x50] sm:$0xff] }
 0x1f4   : > { %7521 = vst [vmem:[#allocation151_spill] sm:$0xff] %v4930_v1  ;;  %v4935_v41 = vsel %vm1783_vm3, %v1384_v3, 0.0  ;;  %v4939_v43 = vsel %vm1784_vm4, %v1120_v33, 0.0  ;;  %v1209_v5 = vpop.f32.mrf.mxu1  ;;  %vm7565_vm3 = vmmov %vm7559_vm0 }
 0x1f5   : > { %1488 = vst [vmem:[%s4026_s23 + $0xf8] sm:$0xff] %v1384_v3  ;;  %v4944_v47 = vsel %vm1784_vm4, %v1209_v5, 0.0 }
 0x1f6   : > { %7522 = vst [vmem:[#allocation152_spill] sm:$0xff] %v4935_v41  ;;  %1159 = vmatmul.bf16.gmra.mxu0 %v3638_v36  ;;  %1248 = vmatmul.bf16.gmra.mxu1 %v3638_v36 }
 0x1f7   : > { %7523 = vst [vmem:[#allocation153_spill] sm:$0xff] %v4939_v43  ;;  %1337 = vmatmul.bf16.gmra.mxu2 %v3638_v36 }
 0x1f8   : > { %1493 = vst [vmem:[%s4026_s23 + $0x120] sm:$0xff] %v1120_v33  ;;  %1426 = vmatmul.bf16.gmra.mxu3 %v3638_v36 }
 0x1f9   : > { %7524 = vst [vmem:[#allocation154_spill] sm:$0xff] %v4944_v47 }
 0x1fa   : > { %1494 = vst [vmem:[%s4026_s23 + $0x128] sm:$0xff] %v1209_v5  ;;  %v1298_v19 = vpop.f32.mrf.mxu2 }
 0x1fb   : > { %1495 = vst [vmem:[%s4026_s23 + $0x130] sm:$0xff] %v1298_v19  ;;  %v4951_v3 = vsel %vm1784_vm4, %v1298_v19, 0.0  ;;  %v1387_v33 = vpop.f32.mrf.mxu3  ;;  %v1122_v43 = vpop.f32.mrf.mxu0 }
 0x1fc   : > { %7525 = vst [vmem:[#allocation155_spill] sm:$0xff] %v4951_v3  ;;  %v4956_v5 = vsel %vm1784_vm4, %v1387_v33, 0.0  ;;  %v4960_v47 = vsel %vm1785_vm5, %v1122_v43, 0.0  ;;  %v1211_v36 = vpop.f32.mrf.mxu1  ;;  %vm7567_vm4 = vcmp.lt.s32.totalorder %v4369_v51, 400 }
 0x1fd   : > { %1496 = vst [vmem:[%s4026_s23 + $0x138] sm:$0xff] %v1387_v33  ;;  %v4965_v19 = vsel %vm1785_vm5, %v1211_v36, 0.0 }
 0x1fe   : > { %7526 = vst [vmem:[#allocation156_spill] sm:$0xff] %v4956_v5 }
 0x1ff   : > { %7527 = vst [vmem:[#allocation157_spill] sm:$0xff] %v4960_v47 }
 0x200   : > { %1501 = vst [vmem:[%s4026_s23 + $0x160] sm:$0xff] %v1122_v43 }
 0x201   : > { %7528 = vst [vmem:[#allocation158_spill] sm:$0xff] %v4965_v19 }
 0x202   : > { %1502 = vst [vmem:[%s4026_s23 + $0x168] sm:$0xff] %v1211_v36  ;;  %v1300_v3 = vpop.f32.mrf.mxu2 }
 0x203   : > { %1503 = vst [vmem:[%s4026_s23 + $0x170] sm:$0xff] %v1300_v3  ;;  %v4971_v29 = vsel %vm1785_vm5, %v1300_v3, 0.0  ;;  %v1389_v33 = vpop.f32.mrf.mxu3  ;;  %v1125_v5 = vpop.f32.mrf.mxu0  ;;  %v3639_v3 = vld [vmem:[%s3971_s5 + $0x58] sm:$0xff] }
 0x204   : > { %7529 = vst [vmem:[#allocation159_spill] sm:$0xff] %v4971_v29  ;;  %v4976_v47 = vsel %vm1785_vm5, %v1389_v33, 0.0  ;;  %v4980_v43 = vsel %vm1786_vm6, %v1125_v5, 0.0  ;;  %v1214_v36 = vpop.f32.mrf.mxu1  ;;  %vm7569_vm5 = vmmov %vm7567_vm4 }
 0x205   : > { %1504 = vst [vmem:[%s4026_s23 + $0x178] sm:$0xff] %v1389_v33  ;;  %v4985_v19 = vsel %vm1786_vm6, %v1214_v36, 0.0 }
 0x206   : > { %7530 = vst [vmem:[#allocation160_spill] sm:$0xff] %v4976_v47  ;;  %1164 = vmatmul.bf16.gmra.mxu0 %v3639_v3  ;;  %1253 = vmatmul.bf16.gmra.mxu1 %v3639_v3 }
 0x207   : > { %7531 = vst [vmem:[#allocation161_spill] sm:$0xff] %v4980_v43  ;;  %1342 = vmatmul.bf16.gmra.mxu2 %v3639_v3 }
 0x208   : > { %1509 = vst [vmem:[%s4026_s23 + $0x1a0] sm:$0xff] %v1125_v5  ;;  %1431 = vmatmul.bf16.gmra.mxu3 %v3639_v3 }
 0x209   : > { %7532 = vst [vmem:[#allocation162_spill] sm:$0xff] %v4985_v19 }
 0x20a   : > { %1510 = vst [vmem:[%s4026_s23 + $0x1a8] sm:$0xff] %v1214_v36  ;;  %v1303_v45 = vpop.f32.mrf.mxu2 }
 0x20b   : > { %1511 = vst [vmem:[%s4026_s23 + $0x1b0] sm:$0xff] %v1303_v45  ;;  %v4992_v33 = vsel %vm1786_vm6, %v1303_v45, 0.0  ;;  %v1392_v5 = vpop.f32.mrf.mxu3  ;;  %v1127_v43 = vpop.f32.mrf.mxu0 }
 0x20c   : > { %7533 = vst [vmem:[#allocation163_spill] sm:$0xff] %v4992_v33  ;;  %v4997_v36 = vsel %vm1786_vm6, %v1392_v5, 0.0  ;;  %v5001_v19 = vsel %vm1787_vm7, %v1127_v43, 0.0  ;;  %v1216_v3 = vpop.f32.mrf.mxu1  ;;  %vm7571_vm6 = vmmov %vm7567_vm4 }
 0x20d   : > { %1512 = vst [vmem:[%s4026_s23 + $0x1b8] sm:$0xff] %v1392_v5  ;;  %v5006_v45 = vsel %vm1787_vm7, %v1216_v3, 0.0 }
 0x20e   : > { %7534 = vst [vmem:[#allocation164_spill] sm:$0xff] %v4997_v36 }
 0x20f   : > { %7535 = vst [vmem:[#allocation165_spill] sm:$0xff] %v5001_v19 }
 0x210   : > { %1517 = vst [vmem:[%s4026_s23 + $0x1e0] sm:$0xff] %v1127_v43 }
 0x211   : > { %7536 = vst [vmem:[#allocation166_spill] sm:$0xff] %v5006_v45 }
 0x212   : > { %1518 = vst [vmem:[%s4026_s23 + $0x1e8] sm:$0xff] %v1216_v3  ;;  %v1305_v33 = vpop.f32.mrf.mxu2 }
 0x213   : > { %1519 = vst [vmem:[%s4026_s23 + $0x1f0] sm:$0xff] %v1305_v33  ;;  %v5012_v6 = vsel %vm1787_vm7, %v1305_v33, 0.0  ;;  %v1394_v5 = vpop.f32.mrf.mxu3  ;;  %v1130_v36 = vpop.f32.mrf.mxu0  ;;  %v3640_v33 = vld [vmem:[%s3971_s5 + $0x60] sm:$0xff] }
 0x214   : > { %7537 = vst [vmem:[#allocation167_spill] sm:$0xff] %v5012_v6  ;;  %v5017_v19 = vsel %vm1787_vm7, %v1394_v5, 0.0  ;;  %v5021_v43 = vsel %vm1788_vm8, %v1130_v36, 0.0  ;;  %v1219_v3 = vpop.f32.mrf.mxu1  ;;  %vm7573_vm7 = vmmov %vm7567_vm4 }
 0x215   : > { %1520 = vst [vmem:[%s4026_s23 + $0x1f8] sm:$0xff] %v1394_v5  ;;  %v5026_v45 = vsel %vm1788_vm8, %v1219_v3, 0.0 }
 0x216   : > { %7538 = vst [vmem:[#allocation168_spill] sm:$0xff] %v5017_v19  ;;  %1169 = vmatmul.bf16.gmra.mxu0 %v3640_v33  ;;  %1258 = vmatmul.bf16.gmra.mxu1 %v3640_v33 }
 0x217   : > { %7539 = vst [vmem:[#allocation169_spill] sm:$0xff] %v5021_v43  ;;  %1347 = vmatmul.bf16.gmra.mxu2 %v3640_v33 }
 0x218   : > { %1525 = vst [vmem:[%s4026_s23 + $0x220] sm:$0xff] %v1130_v36  ;;  %1436 = vmatmul.bf16.gmra.mxu3 %v3640_v33 }
 0x219   : > { %7540 = vst [vmem:[#allocation170_spill] sm:$0xff] %v5026_v45 }
 0x21a   : > { %1526 = vst [vmem:[%s4026_s23 + $0x228] sm:$0xff] %v1219_v3  ;;  %v1308_v35 = vpop.f32.mrf.mxu2 }
 0x21b   : > { %1527 = vst [vmem:[%s4026_s23 + $0x230] sm:$0xff] %v1308_v35  ;;  %v5033_v5 = vsel %vm1788_vm8, %v1308_v35, 0.0  ;;  %v1397_v36 = vpop.f32.mrf.mxu3  ;;  %v1132_v43 = vpop.f32.mrf.mxu0 }
 0x21c   : > { %7541 = vst [vmem:[#allocation171_spill] sm:$0xff] %v5033_v5  ;;  %v5038_v3 = vsel %vm1788_vm8, %v1397_v36, 0.0  ;;  %v5042_v45 = vsel %vm1789_vm9, %v1132_v43, 0.0  ;;  %v1221_v33 = vpop.f32.mrf.mxu1  ;;  %vm7575_vm8 = vcmp.lt.s32.totalorder %v4397_v10, 400 }
 0x21d   : > { %1528 = vst [vmem:[%s4026_s23 + $0x238] sm:$0xff] %v1397_v36  ;;  %v5047_v35 = vsel %vm1789_vm9, %v1221_v33, 0.0 }
 0x21e   : > { %7542 = vst [vmem:[#allocation172_spill] sm:$0xff] %v5038_v3 }
 0x21f   : > { %7543 = vst [vmem:[#allocation173_spill] sm:$0xff] %v5042_v45 }
 0x220   : > { %1533 = vst [vmem:[%s4026_s23 + $0x260] sm:$0xff] %v1132_v43 }
 0x221   : > { %7544 = vst [vmem:[#allocation174_spill] sm:$0xff] %v5047_v35 }
 0x222   : > { %1534 = vst [vmem:[%s4026_s23 + $0x268] sm:$0xff] %v1221_v33  ;;  %v1310_v5 = vpop.f32.mrf.mxu2 }
 0x223   : > { %1535 = vst [vmem:[%s4026_s23 + $0x270] sm:$0xff] %v1310_v5  ;;  %v5053_v60 = vsel %vm1789_vm9, %v1310_v5, 0.0  ;;  %v1399_v36 = vpop.f32.mrf.mxu3  ;;  %v1135_v3 = vpop.f32.mrf.mxu0  ;;  %v3641_v5 = vld [vmem:[%s3971_s5 + $0x68] sm:$0xff] }
 0x224   : > { %7545 = vst [vmem:[#allocation175_spill] sm:$0xff] %v5053_v60  ;;  %v5058_v45 = vsel %vm1789_vm9, %v1399_v36, 0.0  ;;  %v5062_v43 = vsel %vm1790_vm10, %v1135_v3, 0.0  ;;  %v1224_v33 = vpop.f32.mrf.mxu1  ;;  %vm7577_vm9 = vmmov %vm7575_vm8 }
 0x225   : > { %1536 = vst [vmem:[%s4026_s23 + $0x278] sm:$0xff] %v1399_v36  ;;  %v5067_v35 = vsel %vm1790_vm10, %v1224_v33, 0.0 }
 0x226   : > { %7546 = vst [vmem:[#allocation176_spill] sm:$0xff] %v5058_v45  ;;  %1174 = vmatmul.bf16.gmra.mxu0 %v3641_v5  ;;  %1263 = vmatmul.bf16.gmra.mxu1 %v3641_v5 }
 0x227   : > { %7547 = vst [vmem:[#allocation177_spill] sm:$0xff] %v5062_v43  ;;  %1352 = vmatmul.bf16.gmra.mxu2 %v3641_v5 }
 0x228   : > { %1541 = vst [vmem:[%s4026_s23 + $0x2a0] sm:$0xff] %v1135_v3  ;;  %1441 = vmatmul.bf16.gmra.mxu3 %v3641_v5 }
 0x229   : > { %7548 = vst [vmem:[#allocation178_spill] sm:$0xff] %v5067_v35 }
 0x22a   : > { %1542 = vst [vmem:[%s4026_s23 + $0x2a8] sm:$0xff] %v1224_v33  ;;  %v1313_v21 = vpop.f32.mrf.mxu2 }
 0x22b   : > { %1543 = vst [vmem:[%s4026_s23 + $0x2b0] sm:$0xff] %v1313_v21  ;;  %v5074_v36 = vsel %vm1790_vm10, %v1313_v21, 0.0  ;;  %v1402_v3 = vpop.f32.mrf.mxu3  ;;  %v1137_v43 = vpop.f32.mrf.mxu0 }
 0x22c   : > { %7549 = vst [vmem:[#allocation179_spill] sm:$0xff] %v5074_v36  ;;  %v5079_v33 = vsel %vm1790_vm10, %v1402_v3, 0.0  ;;  %v5083_v35 = vsel %vm1791_vm11, %v1137_v43, 0.0  ;;  %v1226_v5 = vpop.f32.mrf.mxu1  ;;  %vm7579_vm10 = vmmov %vm7575_vm8 }
 0x22d   : > { %1544 = vst [vmem:[%s4026_s23 + $0x2b8] sm:$0xff] %v1402_v3  ;;  %v5088_v21 = vsel %vm1791_vm11, %v1226_v5, 0.0 }
 0x22e   : > { %7550 = vst [vmem:[#allocation180_spill] sm:$0xff] %v5079_v33 }
 0x22f   : > { %7551 = vst [vmem:[#allocation181_spill] sm:$0xff] %v5083_v35 }
 0x230   : > { %1549 = vst [vmem:[%s4026_s23 + $0x2e0] sm:$0xff] %v1137_v43 }
 0x231   : > { %7552 = vst [vmem:[#allocation182_spill] sm:$0xff] %v5088_v21 }
 0x232   : > { %1550 = vst [vmem:[%s4026_s23 + $0x2e8] sm:$0xff] %v1226_v5  ;;  %v1315_v36 = vpop.f32.mrf.mxu2 }
 0x233   : > { %1551 = vst [vmem:[%s4026_s23 + $0x2f0] sm:$0xff] %v1315_v36  ;;  %v5094_v27 = vsel %vm1791_vm11, %v1315_v36, 0.0  ;;  %v1404_v3 = vpop.f32.mrf.mxu3  ;;  %v1140_v33 = vpop.f32.mrf.mxu0  ;;  %v3642_v36 = vld [vmem:[%s3971_s5 + $0x70] sm:$0xff] }
 0x234   : > { %7553 = vst [vmem:[#allocation183_spill] sm:$0xff] %v5094_v27  ;;  %v5099_v35 = vsel %vm1791_vm11, %v1404_v3, 0.0  ;;  %v5103_v43 = vsel %vm1792_vm12, %v1140_v33, 0.0  ;;  %v1229_v5 = vpop.f32.mrf.mxu1  ;;  %vm7581_vm11 = vmmov %vm7575_vm8 }
 0x235   : > { %1552 = vst [vmem:[%s4026_s23 + $0x2f8] sm:$0xff] %v1404_v3  ;;  %v5108_v21 = vsel %vm1792_vm12, %v1229_v5, 0.0 }
 0x236   : > { %7554 = vst [vmem:[#allocation184_spill] sm:$0xff] %v5099_v35  ;;  %1179 = vmatmul.bf16.gmra.mxu0 %v3642_v36  ;;  %1268 = vmatmul.bf16.gmra.mxu1 %v3642_v36 }
 0x237   : > { %7555 = vst [vmem:[#allocation185_spill] sm:$0xff] %v5103_v43  ;;  %1357 = vmatmul.bf16.gmra.mxu2 %v3642_v36 }
 0x238   : > { %1557 = vst [vmem:[%s4026_s23 + $0x320] sm:$0xff] %v1140_v33  ;;  %1446 = vmatmul.bf16.gmra.mxu3 %v3642_v36 }
 0x239   : > { %7556 = vst [vmem:[#allocation186_spill] sm:$0xff] %v5108_v21 }
 0x23a   : > { %1558 = vst [vmem:[%s4026_s23 + $0x328] sm:$0xff] %v1229_v5  ;;  %v1318_v4 = vpop.f32.mrf.mxu2 }
 0x23b   : > { %1559 = vst [vmem:[%s4026_s23 + $0x330] sm:$0xff] %v1318_v4  ;;  %v5115_v3 = vsel %vm1792_vm12, %v1318_v4, 0.0  ;;  %v1407_v33 = vpop.f32.mrf.mxu3  ;;  %v1142_v43 = vpop.f32.mrf.mxu0 }
 0x23c   : > { %7557 = vst [vmem:[#allocation187_spill] sm:$0xff] %v5115_v3  ;;  %v5120_v5 = vsel %vm1792_vm12, %v1407_v33, 0.0  ;;  %v5124_v21 = vsel %vm7559_vm0, %v1142_v43, 0.0  ;;  %v1231_v36 = vpop.f32.mrf.mxu1  ;;  %vm7583_vm12 = vcmp.lt.s32.totalorder %v4426_v32, 400 }
 0x23d   : > { %1560 = vst [vmem:[%s4026_s23 + $0x338] sm:$0xff] %v1407_v33  ;;  %v5129_v35 = vsel %vm7561_vm1, %v1231_v36, 0.0  ;;  %vm7585_vm0 = vmmov %vm7583_vm12 }
 0x23e   : > { %7558 = vst [vmem:[#allocation188_spill] sm:$0xff] %v5120_v5  ;;  %vm7587_vm1 = vmmov %vm7585_vm0 }
 0x23f   : > { %7560 = vst [vmem:[#allocation189_spill] sm:$0xff] %v5124_v21 }
 0x240   : > { %1565 = vst [vmem:[%s4026_s23 + $0x360] sm:$0xff] %v1142_v43 }
 0x241   : > { %7562 = vst [vmem:[#allocation190_spill] sm:$0xff] %v5129_v35 }
 0x242   : > { %1566 = vst [vmem:[%s4026_s23 + $0x368] sm:$0xff] %v1231_v36  ;;  %v1320_v4 = vpop.f32.mrf.mxu2 }
 0x243   : > { %1567 = vst [vmem:[%s4026_s23 + $0x370] sm:$0xff] %v1320_v4  ;;  %v5135_v17 = vsel %vm7563_vm2, %v1320_v4, 0.0  ;;  %v1409_v33 = vpop.f32.mrf.mxu3  ;;  %v1145_v5 = vpop.f32.mrf.mxu0  ;;  %vm7589_vm2 = vmmov %vm7585_vm0 }
 0x244   : > { %7564 = vst [vmem:[#allocation191_spill] sm:$0xff] %v5135_v17  ;;  %v5140_v21 = vsel %vm7565_vm3, %v1409_v33, 0.0  ;;  %v5144_v43 = vsel %vm7567_vm4, %v1145_v5, 0.0  ;;  %v1234_v36 = vpop.f32.mrf.mxu1  ;;  %vm7591_vm3 = vcmp.lt.s32.totalorder %v4451_v24, 400 }
 0x245   : > { %1568 = vst [vmem:[%s4026_s23 + $0x378] sm:$0xff] %v1409_v33  ;;  %v5149_v35 = vsel %vm7569_vm5, %v1234_v36, 0.0  ;;  %vm7593_vm4 = vmmov %vm7591_vm3 }
 0x246   : > { %7566 = vst [vmem:[#allocation192_spill] sm:$0xff] %v5140_v21  ;;  %1184 = vmatmul.bf16.gmra.mxu0 %v4375_v42  ;;  %1273 = vmatmul.bf16.gmra.mxu1 %v4375_v42  ;;  %vm7595_vm5 = vmmov %vm7591_vm3 }
 0x247   : > { %7568 = vst [vmem:[#allocation193_spill] sm:$0xff] %v5144_v43  ;;  %1362 = vmatmul.bf16.gmra.mxu2 %v3643_v11 }
 0x248   : > { %1573 = vst [vmem:[%s4026_s23 + $0x3a0] sm:$0xff] %v1145_v5  ;;  %1451 = vmatmul.bf16.gmra.mxu3 %v3643_v11 }
 0x249   : > { %7570 = vst [vmem:[#allocation194_spill] sm:$0xff] %v5149_v35 }
 0x24a   : > { %1574 = vst [vmem:[%s4026_s23 + $0x3a8] sm:$0xff] %v1234_v36  ;;  %v1323_v4 = vpop.f32.mrf.mxu2 }
 0x24b   : > { %1575 = vst [vmem:[%s4026_s23 + $0x3b0] sm:$0xff] %v1323_v4  ;;  %v5158_v5 = vsel %vm7571_vm6, %v1323_v4, 0.0  ;;  %v1412_v33 = vpop.f32.mrf.mxu3  ;;  %v1147_v35 = vpop.f32.mrf.mxu0  ;;  %vm7597_vm6 = vmmov %vm7591_vm3 }
 0x24c   : > { %7572 = vst [vmem:[#allocation195_spill] sm:$0xff] %v5158_v5  ;;  %v5163_v36 = vsel %vm7573_vm7, %v1412_v33, 0.0  ;;  %v5167_v42 = vsel %vm7575_vm8, %v1147_v35, 0.0  ;;  %v1236_v11 = vpop.f32.mrf.mxu1  ;;  %vm7599_vm7 = vcmp.lt.s32.totalorder %v4480_v20, 400 }
 0x24d   : > { %1576 = vst [vmem:[%s4026_s23 + $0x3b8] sm:$0xff] %v1412_v33  ;;  %v5172_v4 = vsel %vm7577_vm9, %v1236_v11, 0.0  ;;  %vm7601_vm8 = vmmov %vm7599_vm7 }
 0x24e   : > { %7574 = vst [vmem:[#allocation196_spill] sm:$0xff] %v5163_v36  ;;  %vm7603_vm9 = vmmov %vm7599_vm7 }
 0x24f   : > { %7576 = vst [vmem:[#allocation197_spill] sm:$0xff] %v5167_v42 }
 0x250   : > { %1581 = vst [vmem:[%s4026_s23 + $0x3e0] sm:$0xff] %v1147_v35 }
 0x251   : > { %7578 = vst [vmem:[#allocation198_spill] sm:$0xff] %v5172_v4 }
 0x252   : > { %1582 = vst [vmem:[%s4026_s23 + $0x3e8] sm:$0xff] %v1236_v11  ;;  %v1325_v5 = vpop.f32.mrf.mxu2 }
 0x253   : > { %1583 = vst [vmem:[%s4026_s23 + $0x3f0] sm:$0xff] %v1325_v5  ;;  %v5178_v51 = vsel %vm7579_vm10, %v1325_v5, 0.0  ;;  %v1414_v33 = vpop.f32.mrf.mxu3  ;;  %v1150_v36 = vpop.f32.mrf.mxu0  ;;  %vm7605_vm10 = vmmov %vm7599_vm7 }
 0x254   : > { %7580 = vst [vmem:[#allocation199_spill] sm:$0xff] %v5178_v51  ;;  %v5183_v35 = vsel %vm7581_vm11, %v1414_v33, 0.0  ;;  %v5187_v42 = vsel %vm7583_vm12, %v1150_v36, 0.0  ;;  %v1239_v11 = vpop.f32.mrf.mxu1  ;;  %vm7607_vm11 = vcmp.lt.s32.totalorder %v4505_v48, 400 }
 0x255   : > { %1584 = vst [vmem:[%s4026_s23 + $0x3f8] sm:$0xff] %v1414_v33  ;;  %v5192_v5 = vsel %vm7585_vm0, %v1239_v11, 0.0  ;;  %vm7609_vm12 = vmmov %vm7607_vm11 }
 0x256   : > { %7582 = vst [vmem:[#allocation200_spill] sm:$0xff] %v5183_v35  ;;  %vm7611_vm0 = vmmov %vm7607_vm11 }
 0x257   : > { %7584 = vst [vmem:[#allocation201_spill] sm:$0xff] %v5187_v42 }
 0x258   : > { %1589 = vst [vmem:[%s4026_s23 + $0x420] sm:$0xff] %v1150_v36 }
 0x259   : > { %7586 = vst [vmem:[#allocation202_spill] sm:$0xff] %v5192_v5 }
 0x25a   : > { %1590 = vst [vmem:[%s4026_s23 + $0x428] sm:$0xff] %v1239_v11  ;;  %v1328_v51 = vpop.f32.mrf.mxu2 }
 0x25b   : > { %1591 = vst [vmem:[%s4026_s23 + $0x430] sm:$0xff] %v1328_v51  ;;  %v5198_v10 = vsel %vm7587_vm1, %v1328_v51, 0.0  ;;  %v1417_v33 = vpop.f32.mrf.mxu3  ;;  %v1152_v35 = vpop.f32.mrf.mxu0  ;;  %vm7613_vm1 = vmmov %vm7611_vm0 }
 0x25c   : > { %7588 = vst [vmem:[#allocation203_spill] sm:$0xff] %v5198_v10  ;;  %v5203_v36 = vsel %vm7589_vm2, %v1417_v33, 0.0  ;;  %v5207_v42 = vsel %vm7591_vm3, %v1152_v35, 0.0  ;;  %v1241_v11 = vpop.f32.mrf.mxu1  ;;  %vm7619_vm2 = vcmp.lt.s32.totalorder %v4559_v63, 400 }
 0x25d   : > { %1592 = vst [vmem:[%s4026_s23 + $0x438] sm:$0xff] %v1417_v33  ;;  %v5212_v51 = vsel %vm7593_vm4, %v1241_v11, 0.0  ;;  %vm7621_vm3 = vmmov %vm7619_vm2 }
 0x25e   : > { %7590 = vst [vmem:[#allocation204_spill] sm:$0xff] %v5203_v36  ;;  %vm7623_vm4 = vmmov %vm7619_vm2 }
 0x25f   : > { %7592 = vst [vmem:[#allocation205_spill] sm:$0xff] %v5207_v42 }
 0x260   : > { %1597 = vst [vmem:[%s4026_s23 + $0x460] sm:$0xff] %v1152_v35 }
 0x261   : > { %7594 = vst [vmem:[#allocation206_spill] sm:$0xff] %v5212_v51 }
 0x262   : > { %1598 = vst [vmem:[%s4026_s23 + $0x468] sm:$0xff] %v1241_v11  ;;  %v1330_v10 = vpop.f32.mrf.mxu2 }
 0x263   : > { %1599 = vst [vmem:[%s4026_s23 + $0x470] sm:$0xff] %v1330_v10  ;;  %v5218_v32 = vsel %vm7595_vm5, %v1330_v10, 0.0  ;;  %v1419_v33 = vpop.f32.mrf.mxu3  ;;  %v1155_v36 = vpop.f32.mrf.mxu0  ;;  %vm7627_vm5 = vcmp.lt.s32.totalorder %v4588_v9, 400 }
 0x264   : > { %7596 = vst [vmem:[#allocation207_spill] sm:$0xff] %v5218_v32  ;;  %v5223_v35 = vsel %vm7597_vm6, %v1419_v33, 0.0  ;;  %v5227_v42 = vsel %vm7599_vm7, %v1155_v36, 0.0  ;;  %v1244_v11 = vpop.f32.mrf.mxu1  ;;  %vm7629_vm6 = vmmov %vm7627_vm5 }
 0x265   : > { %1600 = vst [vmem:[%s4026_s23 + $0x478] sm:$0xff] %v1419_v33  ;;  %v5232_v10 = vsel %vm7601_vm8, %v1244_v11, 0.0  ;;  %vm7631_vm7 = vmmov %vm7627_vm5 }
 0x266   : > { %7598 = vst [vmem:[#allocation208_spill] sm:$0xff] %v5223_v35  ;;  %vm7633_vm8 = vmmov %vm7627_vm5 }
 0x267   : > { %7600 = vst [vmem:[#allocation209_spill] sm:$0xff] %v5227_v42 }
 0x268   : > { %1605 = vst [vmem:[%s4026_s23 + $0x4a0] sm:$0xff] %v1155_v36 }
 0x269   : > { %7602 = vst [vmem:[#allocation210_spill] sm:$0xff] %v5232_v10 }
 0x26a   : > { %1606 = vst [vmem:[%s4026_s23 + $0x4a8] sm:$0xff] %v1244_v11  ;;  %v1333_v32 = vpop.f32.mrf.mxu2 }
 0x26b   : > { %1607 = vst [vmem:[%s4026_s23 + $0x4b0] sm:$0xff] %v1333_v32  ;;  %v5238_v24 = vsel %vm7603_vm9, %v1333_v32, 0.0  ;;  %v1422_v33 = vpop.f32.mrf.mxu3  ;;  %v1157_v35 = vpop.f32.mrf.mxu0  ;;  %vm7635_vm9 = vcmp.lt.s32.totalorder %v4613_v50, 400 }
 0x26c   : > { %7604 = vst [vmem:[#allocation211_spill] sm:$0xff] %v5238_v24  ;;  %v5243_v36 = vsel %vm7605_vm10, %v1422_v33, 0.0  ;;  %v5247_v42 = vsel %vm7607_vm11, %v1157_v35, 0.0  ;;  %v1246_v11 = vpop.f32.mrf.mxu1  ;;  %vm7637_vm10 = vmmov %vm7635_vm9 }
 0x26d   : > { %1608 = vst [vmem:[%s4026_s23 + $0x4b8] sm:$0xff] %v1422_v33  ;;  %v5252_v32 = vsel %vm7609_vm12, %v1246_v11, 0.0  ;;  %vm7639_vm11 = vmmov %vm7635_vm9 }
 0x26e   : > { %7606 = vst [vmem:[#allocation212_spill] sm:$0xff] %v5243_v36  ;;  %vm7641_vm12 = vmmov %vm7635_vm9 }
 0x26f   : > { %7608 = vst [vmem:[#allocation213_spill] sm:$0xff] %v5247_v42 }
 0x270   : > { %1613 = vst [vmem:[%s4026_s23 + $0x4e0] sm:$0xff] %v1157_v35 }
 0x271   : > { %7610 = vst [vmem:[#allocation214_spill] sm:$0xff] %v5252_v32 }
 0x272   : > { %1614 = vst [vmem:[%s4026_s23 + $0x4e8] sm:$0xff] %v1246_v11  ;;  %v1335_v24 = vpop.f32.mrf.mxu2 }
 0x273   : > { %1615 = vst [vmem:[%s4026_s23 + $0x4f0] sm:$0xff] %v1335_v24  ;;  %v5258_v20 = vsel %vm7611_vm0, %v1335_v24, 0.0  ;;  %v1424_v33 = vpop.f32.mrf.mxu3  ;;  %v1160_v36 = vpop.f32.mrf.mxu0  ;;  %vm7643_vm0 = vcmp.lt.s32.totalorder %v4642_v55, 400 }
 0x274   : > { %7612 = vst [vmem:[#allocation215_spill] sm:$0xff] %v5258_v20  ;;  %v5263_v35 = vsel %vm7613_vm1, %v1424_v33, 0.0  ;;  %v5267_v42 = vsel %vm1800_vm13, %v1160_v36, 0.0  ;;  %v1249_v11 = vpop.f32.mrf.mxu1  ;;  %vm7645_vm1 = vmmov %vm7643_vm0 }
 0x275   : > { %1616 = vst [vmem:[%s4026_s23 + $0x4f8] sm:$0xff] %v1424_v33  ;;  %v5272_v24 = vsel %vm1800_vm13, %v1249_v11, 0.0 }
 0x276   : > { %7614 = vst [vmem:[#allocation216_spill] sm:$0xff] %v5263_v35 }
 0x277   : > { %7615 = vst [vmem:[#allocation217_spill] sm:$0xff] %v5267_v42 }
 0x278   : > { %1621 = vst [vmem:[%s4026_s23 + $0x520] sm:$0xff] %v1160_v36 }
 0x279   : > { %7616 = vst [vmem:[#allocation218_spill] sm:$0xff] %v5272_v24 }
 0x27a   : > { %1622 = vst [vmem:[%s4026_s23 + $0x528] sm:$0xff] %v1249_v11  ;;  %v1338_v20 = vpop.f32.mrf.mxu2 }
 0x27b   : > { %1623 = vst [vmem:[%s4026_s23 + $0x530] sm:$0xff] %v1338_v20  ;;  %v5278_v48 = vsel %vm1800_vm13, %v1338_v20, 0.0  ;;  %v1427_v33 = vpop.f32.mrf.mxu3  ;;  %v1162_v35 = vpop.f32.mrf.mxu0 }
 0x27c   : > { %7617 = vst [vmem:[#allocation219_spill] sm:$0xff] %v5278_v48  ;;  %v5283_v36 = vsel %vm1800_vm13, %v1427_v33, 0.0  ;;  %v5287_v42 = vsel %vm7619_vm2, %v1162_v35, 0.0  ;;  %v1251_v11 = vpop.f32.mrf.mxu1  ;;  %vm7625_vm13 = vmmov %vm7619_vm2 }
 0x27d   : > { %1624 = vst [vmem:[%s4026_s23 + $0x538] sm:$0xff] %v1427_v33  ;;  %v5292_v20 = vsel %vm7621_vm3, %v1251_v11, 0.0  ;;  %vm7647_vm2 = vmmov %vm7643_vm0 }
 0x27e   : > { %7618 = vst [vmem:[#allocation220_spill] sm:$0xff] %v5283_v36  ;;  %vm7649_vm3 = vmmov %vm7643_vm0 }
 0x27f   : > { %7620 = vst [vmem:[#allocation221_spill] sm:$0xff] %v5287_v42 }
 0x280   : > { %1629 = vst [vmem:[%s4026_s23 + $0x560] sm:$0xff] %v1162_v35 }
 0x281   : > { %7622 = vst [vmem:[#allocation222_spill] sm:$0xff] %v5292_v20 }
 0x282   : > { %1630 = vst [vmem:[%s4026_s23 + $0x568] sm:$0xff] %v1251_v11  ;;  %v1340_v48 = vpop.f32.mrf.mxu2 }
 0x283   : > { %1631 = vst [vmem:[%s4026_s23 + $0x570] sm:$0xff] %v1340_v48  ;;  %v5298_v13 = vsel %vm7623_vm4, %v1340_v48, 0.0  ;;  %v1429_v33 = vpop.f32.mrf.mxu3  ;;  %v1165_v36 = vpop.f32.mrf.mxu0  ;;  %vm7651_vm4 = vcmp.lt.s32.totalorder %v4667_v14, 400 }
 0x284   : > { %7624 = vst [vmem:[#allocation223_spill] sm:$0xff] %v5298_v13  ;;  %v5303_v35 = vsel %vm7625_vm13, %v1429_v33, 0.0  ;;  %v5307_v42 = vsel %vm7627_vm5, %v1165_v36, 0.0  ;;  %v1254_v11 = vpop.f32.mrf.mxu1  ;;  %vm7653_vm13 = vmmov %vm7651_vm4 }
 0x285   : > { %1632 = vst [vmem:[%s4026_s23 + $0x578] sm:$0xff] %v1429_v33  ;;  %v5312_v48 = vsel %vm7629_vm6, %v1254_v11, 0.0  ;;  %vm7655_vm5 = vmmov %vm7651_vm4 }
 0x286   : > { %7626 = vst [vmem:[#allocation224_spill] sm:$0xff] %v5303_v35  ;;  %vm7657_vm6 = vmmov %vm7651_vm4 }
 0x287   : > { %7628 = vst [vmem:[#allocation225_spill] sm:$0xff] %v5307_v42 }
 0x288   : > { %1637 = vst [vmem:[%s4026_s23 + $0x5a0] sm:$0xff] %v1165_v36 }
 0x289   : > { %7630 = vst [vmem:[#allocation226_spill] sm:$0xff] %v5312_v48 }
 0x28a   : > { %1638 = vst [vmem:[%s4026_s23 + $0x5a8] sm:$0xff] %v1254_v11  ;;  %v1343_v13 = vpop.f32.mrf.mxu2 }
 0x28b   : > { %1639 = vst [vmem:[%s4026_s23 + $0x5b0] sm:$0xff] %v1343_v13  ;;  %v5318_v63 = vsel %vm7631_vm7, %v1343_v13, 0.0  ;;  %v1432_v33 = vpop.f32.mrf.mxu3  ;;  %v1167_v35 = vpop.f32.mrf.mxu0  ;;  %vm7659_vm7 = vcmp.lt.s32.totalorder %v4693_v53, 400 }
 0x28c   : > { %7632 = vst [vmem:[#allocation227_spill] sm:$0xff] %v5318_v63  ;;  %v5323_v36 = vsel %vm7633_vm8, %v1432_v33, 0.0  ;;  %v5327_v42 = vsel %vm7635_vm9, %v1167_v35, 0.0  ;;  %v1256_v11 = vpop.f32.mrf.mxu1  ;;  %vm7661_vm8 = vmmov %vm7659_vm7 }
 0x28d   : > { %1640 = vst [vmem:[%s4026_s23 + $0x5b8] sm:$0xff] %v1432_v33  ;;  %v5332_v13 = vsel %vm7637_vm10, %v1256_v11, 0.0  ;;  %vm7663_vm9 = vmmov %vm7659_vm7 }
 0x28e   : > { %7634 = vst [vmem:[#allocation228_spill] sm:$0xff] %v5323_v36  ;;  %vm7665_vm10 = vmmov %vm7659_vm7 }
 0x28f   : > { %7636 = vst [vmem:[#allocation229_spill] sm:$0xff] %v5327_v42 }
 0x290   : > { %1645 = vst [vmem:[%s4026_s23 + $0x5e0] sm:$0xff] %v1167_v35 }
 0x291   : > { %7638 = vst [vmem:[#allocation230_spill] sm:$0xff] %v5332_v13 }
 0x292   : > { %1646 = vst [vmem:[%s4026_s23 + $0x5e8] sm:$0xff] %v1256_v11  ;;  %v1345_v63 = vpop.f32.mrf.mxu2 }
 0x293   : > { %1647 = vst [vmem:[%s4026_s23 + $0x5f0] sm:$0xff] %v1345_v63  ;;  %v5338_v9 = vsel %vm7639_vm11, %v1345_v63, 0.0  ;;  %v1434_v33 = vpop.f32.mrf.mxu3  ;;  %v1170_v36 = vpop.f32.mrf.mxu0  ;;  %vm7667_vm11 = vcmp.lt.s32.totalorder %v4718_v8, 400 }
 0x294   : > { %7640 = vst [vmem:[#allocation231_spill] sm:$0xff] %v5338_v9  ;;  %v5343_v35 = vsel %vm7641_vm12, %v1434_v33, 0.0  ;;  %v5347_v42 = vsel %vm7643_vm0, %v1170_v36, 0.0  ;;  %v1259_v11 = vpop.f32.mrf.mxu1  ;;  %vm7669_vm12 = vmmov %vm7667_vm11 }
 0x295   : > { %1648 = vst [vmem:[%s4026_s23 + $0x5f8] sm:$0xff] %v1434_v33  ;;  %v5352_v63 = vsel %vm7645_vm1, %v1259_v11, 0.0  ;;  %vm7671_vm0 = vmmov %vm7667_vm11 }
 0x296   : > { %7642 = vst [vmem:[#allocation232_spill] sm:$0xff] %v5343_v35  ;;  %vm7673_vm1 = vmmov %vm7671_vm0 }
 0x297   : > { %7644 = vst [vmem:[#allocation233_spill] sm:$0xff] %v5347_v42 }
 0x298   : > { %1653 = vst [vmem:[%s4026_s23 + $0x620] sm:$0xff] %v1170_v36 }
 0x299   : > { %7646 = vst [vmem:[#allocation234_spill] sm:$0xff] %v5352_v63 }
 0x29a   : > { %1654 = vst [vmem:[%s4026_s23 + $0x628] sm:$0xff] %v1259_v11  ;;  %v1348_v9 = vpop.f32.mrf.mxu2 }
 0x29b   : > { %1655 = vst [vmem:[%s4026_s23 + $0x630] sm:$0xff] %v1348_v9  ;;  %v5358_v50 = vsel %vm7647_vm2, %v1348_v9, 0.0  ;;  %v1437_v33 = vpop.f32.mrf.mxu3  ;;  %v1172_v35 = vpop.f32.mrf.mxu0  ;;  %vm7675_vm2 = vcmp.lt.s32.totalorder %v4744_v58, 400 }
 0x29c   : > { %7648 = vst [vmem:[#allocation235_spill] sm:$0xff] %v5358_v50  ;;  %v5363_v36 = vsel %vm7649_vm3, %v1437_v33, 0.0  ;;  %v5367_v42 = vsel %vm7651_vm4, %v1172_v35, 0.0  ;;  %v1261_v11 = vpop.f32.mrf.mxu1  ;;  %vm7677_vm3 = vmmov %vm7675_vm2 }
 0x29d   : > { %1656 = vst [vmem:[%s4026_s23 + $0x638] sm:$0xff] %v1437_v33  ;;  %v5372_v9 = vsel %vm7653_vm13, %v1261_v11, 0.0  ;;  %vm7679_vm4 = vmmov %vm7675_vm2 }
 0x29e   : > { %7650 = vst [vmem:[#allocation236_spill] sm:$0xff] %v5363_v36  ;;  %vm7681_vm13 = vmmov %vm7675_vm2 }
 0x29f   : > { %7652 = vst [vmem:[#allocation237_spill] sm:$0xff] %v5367_v42 }
 0x2a0   : > { %1661 = vst [vmem:[%s4026_s23 + $0x660] sm:$0xff] %v1172_v35 }
 0x2a1   : > { %7654 = vst [vmem:[#allocation238_spill] sm:$0xff] %v5372_v9 }
 0x2a2   : > { %1662 = vst [vmem:[%s4026_s23 + $0x668] sm:$0xff] %v1261_v11  ;;  %v1350_v50 = vpop.f32.mrf.mxu2 }
 0x2a3   : > { %1663 = vst [vmem:[%s4026_s23 + $0x670] sm:$0xff] %v1350_v50  ;;  %v5378_v55 = vsel %vm7655_vm5, %v1350_v50, 0.0  ;;  %v1439_v33 = vpop.f32.mrf.mxu3  ;;  %v1175_v36 = vpop.f32.mrf.mxu0  ;;  %vm7683_vm5 = vcmp.lt.s32.totalorder %v4769_v39, 400 }
 0x2a4   : > { %7656 = vst [vmem:[#allocation239_spill] sm:$0xff] %v5378_v55  ;;  %v5383_v35 = vsel %vm7657_vm6, %v1439_v33, 0.0  ;;  %v5387_v42 = vsel %vm7659_vm7, %v1175_v36, 0.0  ;;  %v1264_v11 = vpop.f32.mrf.mxu1  ;;  %vm7685_vm6 = vmmov %vm7683_vm5 }
 0x2a5   : > { %1664 = vst [vmem:[%s4026_s23 + $0x678] sm:$0xff] %v1439_v33  ;;  %v5392_v50 = vsel %vm7661_vm8, %v1264_v11, 0.0  ;;  %vm7687_vm7 = vmmov %vm7683_vm5 }
 0x2a6   : > { %7658 = vst [vmem:[#allocation240_spill] sm:$0xff] %v5383_v35  ;;  %vm7689_vm8 = vmmov %vm7683_vm5 }
 0x2a7   : > { %7660 = vst [vmem:[#allocation241_spill] sm:$0xff] %v5387_v42 }
 0x2a8   : > { %1669 = vst [vmem:[%s4026_s23 + $0x6a0] sm:$0xff] %v1175_v36 }
 0x2a9   : > { %7662 = vst [vmem:[#allocation242_spill] sm:$0xff] %v5392_v50 }
 0x2aa   : > { %1670 = vst [vmem:[%s4026_s23 + $0x6a8] sm:$0xff] %v1264_v11  ;;  %v1353_v55 = vpop.f32.mrf.mxu2 }
 0x2ab   : > { %1671 = vst [vmem:[%s4026_s23 + $0x6b0] sm:$0xff] %v1353_v55  ;;  %v5398_v14 = vsel %vm7663_vm9, %v1353_v55, 0.0  ;;  %v1442_v33 = vpop.f32.mrf.mxu3  ;;  %v1177_v35 = vpop.f32.mrf.mxu0 }
 0x2ac   : > { %7664 = vst [vmem:[#allocation243_spill] sm:$0xff] %v5398_v14  ;;  %v5403_v36 = vsel %vm7665_vm10, %v1442_v33, 0.0  ;;  %v5407_v42 = vsel %vm7667_vm11, %v1177_v35, 0.0  ;;  %v1266_v11 = vpop.f32.mrf.mxu1 }
 0x2ad   : > { %1672 = vst [vmem:[%s4026_s23 + $0x6b8] sm:$0xff] %v1442_v33  ;;  %v5412_v55 = vsel %vm7669_vm12, %v1266_v11, 0.0 }
 0x2ae   : > { %7666 = vst [vmem:[#allocation244_spill] sm:$0xff] %v5403_v36 }
 0x2af   : > { %7668 = vst [vmem:[#allocation245_spill] sm:$0xff] %v5407_v42 }
 0x2b0   : > { %1677 = vst [vmem:[%s4026_s23 + $0x6e0] sm:$0xff] %v1177_v35 }
 0x2b1   : > { %7670 = vst [vmem:[#allocation246_spill] sm:$0xff] %v5412_v55 }
 0x2b2   : > { %1678 = vst [vmem:[%s4026_s23 + $0x6e8] sm:$0xff] %v1266_v11  ;;  %v1355_v14 = vpop.f32.mrf.mxu2 }
 0x2b3   : > { %1679 = vst [vmem:[%s4026_s23 + $0x6f0] sm:$0xff] %v1355_v14  ;;  %v5418_v53 = vsel %vm7671_vm0, %v1355_v14, 0.0  ;;  %v1444_v33 = vpop.f32.mrf.mxu3  ;;  %v1180_v36 = vpop.f32.mrf.mxu0 }
 0x2b4   : > { %7672 = vst [vmem:[#allocation247_spill] sm:$0xff] %v5418_v53  ;;  %v5423_v35 = vsel %vm7673_vm1, %v1444_v33, 0.0  ;;  %v5427_v42 = vsel %vm7675_vm2, %v1180_v36, 0.0  ;;  %v1269_v11 = vpop.f32.mrf.mxu1 }
 0x2b5   : > { %1680 = vst [vmem:[%s4026_s23 + $0x6f8] sm:$0xff] %v1444_v33  ;;  %v5432_v14 = vsel %vm7677_vm3, %v1269_v11, 0.0 }
 0x2b6   : > { %7674 = vst [vmem:[#allocation248_spill] sm:$0xff] %v5423_v35 }
 0x2b7   : > { %7676 = vst [vmem:[#allocation249_spill] sm:$0xff] %v5427_v42 }
 0x2b8   : > { %1685 = vst [vmem:[%s4026_s23 + $0x720] sm:$0xff] %v1180_v36 }
 0x2b9   : > { %7678 = vst [vmem:[#allocation250_spill] sm:$0xff] %v5432_v14 }
 0x2ba   : > { %1686 = vst [vmem:[%s4026_s23 + $0x728] sm:$0xff] %v1269_v11  ;;  %v1358_v53 = vpop.f32.mrf.mxu2 }
 0x2bb   : > { %1687 = vst [vmem:[%s4026_s23 + $0x730] sm:$0xff] %v1358_v53  ;;  %v5438_v8 = vsel %vm7679_vm4, %v1358_v53, 0.0  ;;  %v1447_v33 = vpop.f32.mrf.mxu3  ;;  %v1182_v35 = vpop.f32.mrf.mxu0 }
 0x2bc   : > { %7680 = vst [vmem:[#allocation251_spill] sm:$0xff] %v5438_v8  ;;  %v5443_v36 = vsel %vm7681_vm13, %v1447_v33, 0.0  ;;  %v5447_v42 = vsel %vm7683_vm5, %v1182_v35, 0.0  ;;  %v1271_v11 = vpop.f32.mrf.mxu1 }
 0x2bd   : > { %1688 = vst [vmem:[%s4026_s23 + $0x738] sm:$0xff] %v1447_v33  ;;  %v5452_v53 = vsel %vm7685_vm6, %v1271_v11, 0.0 }
 0x2be   : > { %7682 = vst [vmem:[#allocation252_spill] sm:$0xff] %v5443_v36 }
 0x2bf   : > { %7684 = vst [vmem:[#allocation253_spill] sm:$0xff] %v5447_v42 }
 0x2c0   : > { %1693 = vst [vmem:[%s4026_s23 + $0x760] sm:$0xff] %v1182_v35 }
 0x2c1   : > { %7686 = vst [vmem:[#allocation254_spill] sm:$0xff] %v5452_v53 }
 0x2c2   : > { %1694 = vst [vmem:[%s4026_s23 + $0x768] sm:$0xff] %v1271_v11  ;;  %v1360_v8 = vpop.f32.mrf.mxu2 }
 0x2c3   : > { %1695 = vst [vmem:[%s4026_s23 + $0x770] sm:$0xff] %v1360_v8  ;;  %v5458_v58 = vsel %vm7687_vm7, %v1360_v8, 0.0  ;;  %v1449_v33 = vpop.f32.mrf.mxu3  ;;  %v1185_v36 = vpop.f32.mrf.mxu0 }
 0x2c4   : > { %7688 = vst [vmem:[#allocation255_spill] sm:$0xff] %v5458_v58  ;;  %v5463_v35 = vsel %vm7689_vm8, %v1449_v33, 0.0  ;;  %v5467_v42 = vsel %vm1810_vm14, %v1185_v36, 0.0  ;;  %v1274_v11 = vpop.f32.mrf.mxu1 }
 0x2c5   : > { %1696 = vst [vmem:[%s4026_s23 + $0x778] sm:$0xff] %v1449_v33  ;;  %v5472_v8 = vsel %vm1810_vm14, %v1274_v11, 0.0 }
 0x2c6   : > { %7690 = vst [vmem:[#allocation256_spill] sm:$0xff] %v5463_v35 }
 0x2c7   : > { %7691 = vst [vmem:[#allocation257_spill] sm:$0xff] %v5467_v42 }
 0x2c8   : > { %1701 = vst [vmem:[%s4026_s23 + $0x7a0] sm:$0xff] %v1185_v36 }
 0x2c9   : > { %7692 = vst [vmem:[#allocation258_spill] sm:$0xff] %v5472_v8 }
 0x2ca   : > { %1702 = vst [vmem:[%s4026_s23 + $0x7a8] sm:$0xff] %v1274_v11  ;;  %v1363_v58 = vpop.f32.mrf.mxu2 }
 0x2cb   : > { %1703 = vst [vmem:[%s4026_s23 + $0x7b0] sm:$0xff] %v1363_v58  ;;  %v5478_v39 = vsel %vm1810_vm14, %v1363_v58, 0.0  ;;  %v1452_v33 = vpop.f32.mrf.mxu3  ;;  %v1187_v35 = vpop.f32.mrf.mxu0 }
 0x2cc   : > { %7693 = vst [vmem:[#allocation259_spill] sm:$0xff] %v5478_v39  ;;  %v5483_v42 = vsel %vm1810_vm14, %v1452_v33, 0.0  ;;  %v5487_v36 = vsel %vm1811_vm15, %v1187_v35, 0.0  ;;  %v1276_v8 = vpop.f32.mrf.mxu1 }
 0x2cd   : > { %1704 = vst [vmem:[%s4026_s23 + $0x7b8] sm:$0xff] %v1452_v33  ;;  %v5492_v11 = vsel %vm1811_vm15, %v1276_v8, 0.0 }
 0x2ce   : > { %7694 = vst [vmem:[#allocation260_spill] sm:$0xff] %v5483_v42 }
 0x2cf   : > { %7695 = vst [vmem:[#allocation261_spill] sm:$0xff] %v5487_v36 }
 0x2d0   : > { %1709 = vst [vmem:[%s4026_s23 + $0x7e0] sm:$0xff] %v1187_v35 }
 0x2d1   : > { %7696 = vst [vmem:[#allocation262_spill] sm:$0xff] %v5492_v11 }
 0x2d2   : > { %1710 = vst [vmem:[%s4026_s23 + $0x7e8] sm:$0xff] %v1276_v8  ;;  %v1365_v58 = vpop.f32.mrf.mxu2  ;;  %2071 = sbr.rel (%p7699_p1) target bundleno = 730 (0x2da), region = 40 }
 0x2d3   : > { %1711 = vst [vmem:[%s4026_s23 + $0x7f0] sm:$0xff] %v1365_v58  ;;  %v5498_v39 = vsel %vm1811_vm15, %v1365_v58, 0.0  ;;  %v1454_v49 = vpop.f32.mrf.mxu3 }
 0x2d4   : > { %7697 = vst [vmem:[#allocation263_spill] sm:$0xff] %v5498_v39  ;;  %v5503_v33 = vsel %vm1811_vm15, %v1454_v49, 0.0 }
 0x2d5   : > { %1712 = vst [vmem:[%s4026_s23 + $0x7f8] sm:$0xff] %v1454_v49 }
 0x2d6   : > { %7698 = vst [vmem:[#allocation264_spill] sm:$0xff] %v5503_v33 }
 0x2d7   : > { %v3841_v35 = vmov 0.0  }
 0x2d8   : > { %2072 = vst [vmem:[#allocation8] sm:$0xff] %v3841_v35 }
 0x2d9   : > { %2073 = vst [vmem:[#allocation10] sm:$0xff] %v3841_v35 }
 0x2da PF: > { %v2075_v8 = vadd.f32 %v4055_v62, %v4031_v44  ;;  %v2112_v58 = vadd.f32 %v4060_v0, %v4036_v46  ;;  %v2149_v39 = vadd.f32 %v4072_v12, %v4046_v56  ;;  %v2186_v57 = vadd.f32 %v4077_v15, %v4051_v61  ;;  %s3553_s25 = sshll.u32 %s3892_s19, 11  ;;  %s3842_s27 = smov [#allocation8]  }
 0x2db   : > { %v2223_v49 = vadd.f32 %v4878_v34, %v4857_v54  ;;  %v2260_v33 = vadd.f32 %v4883_v38, %v4862_v31  ;;  %v2297_v35 = vadd.f32 %v4889_v40, %v4869_v7  ;;  %v2334_v62 = vadd.f32 %v4894_v2, %v4874_v37  ;;  %v7700_v37 = vld [vmem:[#allocation26_spill] sm:$0xff]  ;;  %s3010_s28 = sshll.u32 %s3842_s27, 4  ;;  %s3012_s11 = sshll.u32 %s7111_s3, 4  ;;  %s3011_s28 = int_to_ptr.vmem [resolvable:$true] %s3010_s28  ;;  %s3013_s11 = int_to_ptr.hbm [resolvable:$true] %s3012_s11 }
 0x2dc   : > { %v2076_v0 = vadd.f32 %v2075_v8, %v4081_v16  ;;  %v2113_v46 = vadd.f32 %v2112_v58, %v4086_v18  ;;  %v2150_v12 = vadd.f32 %v2149_v39, %v4097_v22  ;;  %v2187_v15 = vadd.f32 %v2186_v57, %v4102_v25  ;;  %v7701_v16 = vld [vmem:[#allocation27_spill] sm:$0xff]  ;;  %v7702_v18 = vld [vmem:[#allocation149_spill] sm:$0xff]  ;;  %v7703_v22 = vld [vmem:[#allocation150_spill] sm:$0xff]  ;;  %p8004_p2 = scmp.eq.s32.totalorder %s3892_s19, 1  ;;  %s2994_s10 = scalar_lea.hbm %s7110_s2, %s3553_s25 }
 0x2dd   : > { %v2224_v61 = vadd.f32 %v2223_v49, %v4898_v52  ;;  %v2261_v34 = vadd.f32 %v2260_v33, %v4903_v59  ;;  %v2298_v38 = vadd.f32 %v2297_v35, %v4910_v23  ;;  %v2335_v31 = vadd.f32 %v2334_v62, %v4915_v30  ;;  %v7704_v59 = vld [vmem:[#allocation28_spill] sm:$0xff]  ;;  %v7705_v23 = vld [vmem:[#allocation29_spill] sm:$0xff]  ;;  %v7706_v30 = vld [vmem:[#allocation30_spill] sm:$0xff]  ;;  %s2995_s14 = sshll.u32 %s4026_s23, 4  ;;  %s2997_s24 = sshll.u32 %s2994_s10, 4  ;;  %s6140_s14 = int_to_ptr.vmem [resolvable:$true] %s2995_s14  ;;  %s2998_s24 = int_to_ptr.hbm [resolvable:$true] %s2997_s24 }
 0x2de   : > { %v2077_v40 = vadd.f32 %v2076_v0, %v4106_v26  ;;  %v2114_v2 = vadd.f32 %v2113_v46, %v4111_v28  ;;  %v2151_v8 = vadd.f32 %v2150_v12, %v7700_v37  ;;  %v2188_v58 = vadd.f32 %v2187_v15, %v7701_v16  ;;  %v7707_v26 = vld [vmem:[#allocation31_spill] sm:$0xff]  ;;  %v7708_v28 = vld [vmem:[#allocation153_spill] sm:$0xff]  ;;  %v7709_v37 = vld [vmem:[#allocation154_spill] sm:$0xff]  ;;  %s2982_s30 = scalar_lea.sflag [#allocation4], %s3967_s20  ;;  %s3746_s5 = sshra.s32 %s2998_s24, 4  ;;  %s3747_s5 = int_to_ptr.hbm [resolvable:$true] %s3746_s5 }
 0x2df   : > { %v2225_v39 = vadd.f32 %v2224_v61, %v7702_v18  ;;  %v2262_v57 = vadd.f32 %v2261_v34, %v7703_v22  ;;  %v2299_v49 = vadd.f32 %v2298_v38, %v4930_v1  ;;  %v2336_v33 = vadd.f32 %v2335_v31, %v4935_v41  ;;  %v7710_v16 = vld [vmem:[#allocation155_spill] sm:$0xff]  ;;  %v7711_v18 = vld [vmem:[#allocation156_spill] sm:$0xff]  ;;  %v7713_v1 = vld [vmem:[#allocation33_spill] sm:$0xff]  ;;  %s3748_s21 = scalar_lea.hbm %s3747_s5, 2048  ;;  %s3752_s25 = scalar_lea.hbm %s7110_s2, 4096 }
 0x2e0   : > { %v2078_v35 = vadd.f32 %v2077_v40, %v7704_v59  ;;  %v2115_v62 = vadd.f32 %v2114_v2, %v7705_v23  ;;  %v2152_v0 = vadd.f32 %v2151_v8, %v7706_v30  ;;  %v2189_v46 = vadd.f32 %v2188_v58, %v7707_v26  ;;  %v7712_v22 = vld [vmem:[#allocation32_spill] sm:$0xff]  ;;  %v7714_v41 = vld [vmem:[#allocation34_spill] sm:$0xff]  ;;  %v7715_v59 = vld [vmem:[#allocation35_spill] sm:$0xff]  ;;  %p3749_p4 = scmp.ne.s32.totalorder %s3747_s5, %s3748_s21  ;;  %p3753_p12 = scmp.lt.s32.totalorder %s3747_s5, %s7110_s2 }
 0x2e1   : > { %v2226_v12 = vadd.f32 %v2225_v39, %v7708_v28  ;;  %v2263_v15 = vadd.f32 %v2262_v57, %v7709_v37  ;;  %v2300_v61 = vadd.f32 %v2299_v49, %v7710_v16  ;;  %v2337_v34 = vadd.f32 %v2336_v33, %v7711_v18  ;;  %v7716_v23 = vld [vmem:[#allocation157_spill] sm:$0xff]  ;;  %v7717_v30 = vld [vmem:[#allocation158_spill] sm:$0xff]  ;;  %v7718_v37 = vld [vmem:[#allocation36_spill] sm:$0xff]  ;;  %p3754_p11 = scmp.lt.s32.totalorder %s3752_s25, %s3748_s21 }
 0x2e2   : > { %v2079_v38 = vadd.f32 %v2078_v35, %v7712_v22  ;;  %v2116_v31 = vadd.f32 %v2115_v62, %v7713_v1  ;;  %v2153_v40 = vadd.f32 %v2152_v0, %v7714_v41  ;;  %v2190_v2 = vadd.f32 %v2189_v46, %v7715_v59  ;;  %v7719_v16 = vld [vmem:[#allocation37_spill] sm:$0xff]  ;;  %v7720_v18 = vld [vmem:[#allocation38_spill] sm:$0xff]  ;;  %v7721_v22 = vld [vmem:[#allocation39_spill] sm:$0xff]  ;;  %p3750_p8 = pnand %p3749_p4, %p3939_p10 }
 0x2e3   : > { %v2227_v8 = vadd.f32 %v2226_v12, %v7716_v23  ;;  %v2264_v58 = vadd.f32 %v2263_v15, %v7717_v30  ;;  %v2301_v39 = vadd.f32 %v2300_v61, %v4971_v29  ;;  %v2338_v57 = vadd.f32 %v2337_v34, %v4976_v47  ;;  %v7722_v1 = vld [vmem:[#allocation161_spill] sm:$0xff]  ;;  %v7723_v41 = vld [vmem:[#allocation162_spill] sm:$0xff]  ;;  %v7724_v59 = vld [vmem:[#allocation163_spill] sm:$0xff]  ;;  %p3755_p13 = por %p3754_p11, %p3753_p12 }
 0x2e4   : > { %v2080_v49 = vadd.f32 %v2079_v38, %v7718_v37  ;;  %v2117_v33 = vadd.f32 %v2116_v31, %v7719_v16  ;;  %v2154_v35 = vadd.f32 %v2153_v40, %v7720_v18  ;;  %v2191_v62 = vadd.f32 %v2190_v2, %v7721_v22  ;;  %v7725_v23 = vld [vmem:[#allocation164_spill] sm:$0xff]  ;;  %v7727_v29 = vld [vmem:[#allocation41_spill] sm:$0xff]  ;;  %v7728_v47 = vld [vmem:[#allocation42_spill] sm:$0xff]  ;;  %p3751_p9 = pneg %p3750_p8 }
 0x2e5   : > { %v2228_v0 = vadd.f32 %v2227_v8, %v7722_v1  ;;  %v2265_v46 = vadd.f32 %v2264_v58, %v7723_v41  ;;  %v2302_v12 = vadd.f32 %v2301_v39, %v7724_v59  ;;  %v2339_v15 = vadd.f32 %v2338_v57, %v7725_v23  ;;  %v7726_v30 = vld [vmem:[#allocation40_spill] sm:$0xff]  ;;  %v7729_v37 = vld [vmem:[#allocation43_spill] sm:$0xff]  ;;  %v7730_v16 = vld [vmem:[#allocation165_spill] sm:$0xff] }
 0x2e6   : > { %v2081_v61 = vadd.f32 %v2080_v49, %v7726_v30  ;;  %v2118_v34 = vadd.f32 %v2117_v33, %v7727_v29  ;;  %v2155_v38 = vadd.f32 %v2154_v35, %v7728_v47  ;;  %v2192_v31 = vadd.f32 %v2191_v62, %v7729_v37  ;;  %v7731_v18 = vld [vmem:[#allocation166_spill] sm:$0xff]  ;;  %v7732_v41 = vld [vmem:[#allocation44_spill] sm:$0xff]  ;;  %v7733_v59 = vld [vmem:[#allocation45_spill] sm:$0xff]  ;;  %p3756_p0 = pnand %p3755_p13, %p3751_p9 }
 0x2e7   : > { %v2229_v40 = vadd.f32 %v2228_v0, %v7730_v16  ;;  %v2266_v2 = vadd.f32 %v2265_v46, %v7731_v18  ;;  %v2303_v8 = vadd.f32 %v2302_v12, %v5012_v6  ;;  %v2340_v58 = vadd.f32 %v2339_v15, %v5017_v19  ;;  %v7734_v23 = vld [vmem:[#allocation46_spill] sm:$0xff]  ;;  %v7735_v30 = vld [vmem:[#allocation47_spill] sm:$0xff]  ;;  %v7736_v29 = vld [vmem:[#allocation169_spill] sm:$0xff] }
 0x2e8   : > { %v2082_v39 = vadd.f32 %v2081_v61, %v7732_v41  ;;  %v2119_v57 = vadd.f32 %v2118_v34, %v7733_v59  ;;  %v2156_v49 = vadd.f32 %v2155_v38, %v7734_v23  ;;  %v2193_v33 = vadd.f32 %v2192_v31, %v7735_v30  ;;  %v7737_v47 = vld [vmem:[#allocation170_spill] sm:$0xff]  ;;  %v7738_v37 = vld [vmem:[#allocation171_spill] sm:$0xff]  ;;  %v7739_v16 = vld [vmem:[#allocation172_spill] sm:$0xff] }
 0x2e9   : > { %v2230_v35 = vadd.f32 %v2229_v40, %v7736_v29  ;;  %v2267_v62 = vadd.f32 %v2266_v2, %v7737_v47  ;;  %v2304_v0 = vadd.f32 %v2303_v8, %v7738_v37  ;;  %v2341_v46 = vadd.f32 %v2340_v58, %v7739_v16  ;;  %v7740_v18 = vld [vmem:[#allocation48_spill] sm:$0xff]  ;;  %v7741_v6 = vld [vmem:[#allocation49_spill] sm:$0xff]  ;;  %v7742_v19 = vld [vmem:[#allocation50_spill] sm:$0xff] }
 0x2ea   : > { %v2083_v12 = vadd.f32 %v2082_v39, %v7740_v18  ;;  %v2120_v15 = vadd.f32 %v2119_v57, %v7741_v6  ;;  %v2157_v61 = vadd.f32 %v2156_v49, %v7742_v19  ;;  %v7743_v41 = vld [vmem:[#allocation51_spill] sm:$0xff]  ;;  %v7744_v59 = vld [vmem:[#allocation173_spill] sm:$0xff]  ;;  %v7745_v23 = vld [vmem:[#allocation174_spill] sm:$0xff]  ;;  %vm2386_vm14 = vcmask 1040384  }
 0x2eb   : > { %v2194_v34 = vadd.f32 %v2193_v33, %v7743_v41  ;;  %v2231_v38 = vadd.f32 %v2230_v35, %v7744_v59  ;;  %v2268_v31 = vadd.f32 %v2267_v62, %v7745_v23  ;;  %v2305_v40 = vadd.f32 %v2304_v0, %v5053_v60  ;;  %v7746_v47 = vld [vmem:[#allocation52_spill] sm:$0xff]  ;;  %v7747_v37 = vld [vmem:[#allocation53_spill] sm:$0xff]  ;;  %v7748_v16 = vld [vmem:[#allocation54_spill] sm:$0xff] }
 0x2ec   : > { %v2342_v2 = vadd.f32 %v2341_v46, %v5058_v45  ;;  %v2084_v8 = vadd.f32 %v2083_v12, %v7746_v47  ;;  %v2121_v58 = vadd.f32 %v2120_v15, %v7747_v37  ;;  %v2158_v39 = vadd.f32 %v2157_v61, %v7748_v16  ;;  %v7749_v18 = vld [vmem:[#allocation55_spill] sm:$0xff]  ;;  %v7750_v6 = vld [vmem:[#allocation177_spill] sm:$0xff]  ;;  %v7751_v19 = vld [vmem:[#allocation178_spill] sm:$0xff] }
 0x2ed   : > { %v2195_v57 = vadd.f32 %v2194_v34, %v7749_v18  ;;  %v2232_v49 = vadd.f32 %v2231_v38, %v7750_v6  ;;  %v2269_v33 = vadd.f32 %v2268_v31, %v7751_v19  ;;  %v7752_v41 = vld [vmem:[#allocation179_spill] sm:$0xff]  ;;  %v7753_v59 = vld [vmem:[#allocation180_spill] sm:$0xff]  ;;  %v7755_v60 = vld [vmem:[#allocation57_spill] sm:$0xff]  ;;  %vm2388_vm15 = vcmask 1042434  }
 0x2ee   : > { %v2306_v35 = vadd.f32 %v2305_v40, %v7752_v41  ;;  %v2343_v62 = vadd.f32 %v2342_v2, %v7753_v59  ;;  %v7754_v23 = vld [vmem:[#allocation56_spill] sm:$0xff]  ;;  %v2122_v46 = vadd.f32 %v2121_v58, %v7755_v60  ;;  %v7756_v45 = vld [vmem:[#allocation58_spill] sm:$0xff]  ;;  %v7757_v47 = vld [vmem:[#allocation59_spill] sm:$0xff]  ;;  %vm2390_vm9 = vcmask 1041408  }
 0x2ef   : > { %v2085_v0 = vadd.f32 %v2084_v8, %v7754_v23  ;;  %v2159_v12 = vadd.f32 %v2158_v39, %v7756_v45  ;;  %v2196_v15 = vadd.f32 %v2195_v57, %v7757_v47  ;;  %v7758_v37 = vld [vmem:[#allocation181_spill] sm:$0xff]  ;;  %v7759_v16 = vld [vmem:[#allocation182_spill] sm:$0xff]  ;;  %v7760_v6 = vld [vmem:[#allocation184_spill] sm:$0xff]  ;;  %vm2392_vm10 = vcmask 1044484  }
 0x2f0   : > { %v2233_v61 = vadd.f32 %v2232_v49, %v7758_v37  ;;  %v2270_v34 = vadd.f32 %v2269_v33, %v7759_v16  ;;  %v2307_v38 = vadd.f32 %v2306_v35, %v5094_v27  ;;  %v2344_v31 = vadd.f32 %v2343_v62, %v7760_v6  ;;  %v7761_v19 = vld [vmem:[#allocation60_spill] sm:$0xff]  ;;  %v7762_v41 = vld [vmem:[#allocation61_spill] sm:$0xff]  ;;  %v7763_v59 = vld [vmem:[#allocation62_spill] sm:$0xff] }
 0x2f1   : > { %v2086_v40 = vadd.f32 %v2085_v0, %v7761_v19  ;;  %v2123_v2 = vadd.f32 %v2122_v46, %v7762_v41  ;;  %v2160_v8 = vadd.f32 %v2159_v12, %v7763_v59  ;;  %v7764_v23 = vld [vmem:[#allocation63_spill] sm:$0xff]  ;;  %v7765_v60 = vld [vmem:[#allocation185_spill] sm:$0xff]  ;;  %v7766_v45 = vld [vmem:[#allocation186_spill] sm:$0xff]  ;;  %vm2394_vm11 = vcmask 1046534  }
 0x2f2   : > { %v2197_v58 = vadd.f32 %v2196_v15, %v7764_v23  ;;  %v2234_v39 = vadd.f32 %v2233_v61, %v7765_v60  ;;  %v2271_v57 = vadd.f32 %v2270_v34, %v7766_v45  ;;  %v2308_v49 = vadd.f32 %v2307_v38, %v5115_v3  ;;  %v7767_v37 = vld [vmem:[#allocation188_spill] sm:$0xff]  ;;  %v7769_v27 = vld [vmem:[#allocation65_spill] sm:$0xff]  ;;  %v7770_v6 = vld [vmem:[#allocation66_spill] sm:$0xff] }
 0x2f3   : > { %v2345_v33 = vadd.f32 %v2344_v31, %v7767_v37  ;;  %v7768_v16 = vld [vmem:[#allocation64_spill] sm:$0xff]  ;;  %v2124_v62 = vadd.f32 %v2123_v2, %v7769_v27  ;;  %v2161_v0 = vadd.f32 %v2160_v8, %v7770_v6  ;;  %v7771_v19 = vld [vmem:[#allocation67_spill] sm:$0xff]  ;;  %v7772_v41 = vld [vmem:[#allocation189_spill] sm:$0xff]  ;;  %vm2396_vm12 = vcmask 1045508  }
 0x2f4   : > { %v2087_v35 = vadd.f32 %v2086_v40, %v7768_v16  ;;  %v2198_v46 = vadd.f32 %v2197_v58, %v7771_v19  ;;  %v2235_v12 = vadd.f32 %v2234_v39, %v7772_v41  ;;  %v7773_v59 = vld [vmem:[#allocation190_spill] sm:$0xff]  ;;  %v2309_v61 = vadd.f32 %v2308_v49, %v5135_v17  ;;  %v7774_v45 = vld [vmem:[#allocation68_spill] sm:$0xff]  ;;  %v7775_v3 = vld [vmem:[#allocation69_spill] sm:$0xff] }
 0x2f5   : > { %v2272_v15 = vadd.f32 %v2271_v57, %v7773_v59  ;;  %v2346_v34 = vadd.f32 %v2345_v33, %v5140_v21  ;;  %v2125_v31 = vadd.f32 %v2124_v62, %v7775_v3  ;;  %v7776_v37 = vld [vmem:[#allocation70_spill] sm:$0xff]  ;;  %v7777_v16 = vld [vmem:[#allocation71_spill] sm:$0xff]  ;;  %v7780_v41 = vld [vmem:[#allocation196_spill] sm:$0xff]  ;;  %vm2398_vm0 = vcmask 1043456  }
 0x2f6   : > { %v2088_v38 = vadd.f32 %v2087_v35, %v7774_v45  ;;  %v2162_v40 = vadd.f32 %v2161_v0, %v7776_v37  ;;  %v2199_v2 = vadd.f32 %v2198_v46, %v7777_v16  ;;  %v2236_v8 = vadd.f32 %v2235_v12, %v5144_v43  ;;  %v7778_v6 = vld [vmem:[#allocation194_spill] sm:$0xff]  ;;  %v7779_v19 = vld [vmem:[#allocation195_spill] sm:$0xff]  ;;  %v7781_v59 = vld [vmem:[#allocation72_spill] sm:$0xff] }
 0x2f7   : > { %v2273_v58 = vadd.f32 %v2272_v15, %v7778_v6  ;;  %v2310_v39 = vadd.f32 %v2309_v61, %v7779_v19  ;;  %v2347_v57 = vadd.f32 %v2346_v34, %v7780_v41  ;;  %v7782_v17 = vld [vmem:[#allocation73_spill] sm:$0xff]  ;;  %v7783_v21 = vld [vmem:[#allocation74_spill] sm:$0xff]  ;;  %v7784_v45 = vld [vmem:[#allocation75_spill] sm:$0xff] }
 0x2f8   : > { %v2089_v49 = vadd.f32 %v2088_v38, %v7781_v59  ;;  %v2126_v33 = vadd.f32 %v2125_v31, %v7782_v17  ;;  %v2163_v35 = vadd.f32 %v2162_v40, %v7783_v21  ;;  %v2200_v62 = vadd.f32 %v2199_v2, %v7784_v45  ;;  %v7785_v3 = vld [vmem:[#allocation197_spill] sm:$0xff]  ;;  %v7786_v16 = vld [vmem:[#allocation199_spill] sm:$0xff]  ;;  %v7787_v43 = vld [vmem:[#allocation200_spill] sm:$0xff] }
 0x2f9   : > { %v2237_v0 = vadd.f32 %v2236_v8, %v7785_v3  ;;  %v2274_v46 = vadd.f32 %v2273_v58, %v5172_v4  ;;  %v2311_v12 = vadd.f32 %v2310_v39, %v7786_v16  ;;  %v2348_v15 = vadd.f32 %v2347_v57, %v7787_v43  ;;  %v7788_v6 = vld [vmem:[#allocation76_spill] sm:$0xff]  ;;  %v7789_v19 = vld [vmem:[#allocation77_spill] sm:$0xff]  ;;  %v7790_v41 = vld [vmem:[#allocation78_spill] sm:$0xff] }
 0x2fa   : > { %v2090_v61 = vadd.f32 %v2089_v49, %v7788_v6  ;;  %v2127_v34 = vadd.f32 %v2126_v33, %v7789_v19  ;;  %v2164_v38 = vadd.f32 %v2163_v35, %v7790_v41  ;;  %v7791_v59 = vld [vmem:[#allocation79_spill] sm:$0xff]  ;;  %v7792_v17 = vld [vmem:[#allocation201_spill] sm:$0xff]  ;;  %v7794_v3 = vld [vmem:[#allocation204_spill] sm:$0xff] }
 0x2fb   : > { %v2201_v31 = vadd.f32 %v2200_v62, %v7791_v59  ;;  %v2238_v40 = vadd.f32 %v2237_v0, %v7792_v17  ;;  %v2275_v2 = vadd.f32 %v2274_v46, %v5192_v5  ;;  %v7793_v45 = vld [vmem:[#allocation203_spill] sm:$0xff]  ;;  %v2349_v58 = vadd.f32 %v2348_v15, %v7794_v3  ;;  %v7795_v4 = vld [vmem:[#allocation80_spill] sm:$0xff]  ;;  %v7796_v16 = vld [vmem:[#allocation81_spill] sm:$0xff] }
 0x2fc   : > { %v2312_v8 = vadd.f32 %v2311_v12, %v7793_v45  ;;  %v2091_v39 = vadd.f32 %v2090_v61, %v7795_v4  ;;  %v2128_v57 = vadd.f32 %v2127_v34, %v7796_v16  ;;  %v7797_v43 = vld [vmem:[#allocation82_spill] sm:$0xff]  ;;  %v7798_v6 = vld [vmem:[#allocation83_spill] sm:$0xff]  ;;  %v7799_v19 = vld [vmem:[#allocation205_spill] sm:$0xff] }
 0x2fd   : > { %v2165_v49 = vadd.f32 %v2164_v38, %v7797_v43  ;;  %v2202_v33 = vadd.f32 %v2201_v31, %v7798_v6  ;;  %v2239_v35 = vadd.f32 %v2238_v40, %v7799_v19  ;;  %v2276_v62 = vadd.f32 %v2275_v2, %v5212_v51  ;;  %v7800_v59 = vld [vmem:[#allocation207_spill] sm:$0xff]  ;;  %v7801_v17 = vld [vmem:[#allocation208_spill] sm:$0xff]  ;;  %v7803_v45 = vld [vmem:[#allocation85_spill] sm:$0xff] }
 0x2fe   : > { %v2313_v0 = vadd.f32 %v2312_v8, %v7800_v59  ;;  %v2350_v46 = vadd.f32 %v2349_v58, %v7801_v17  ;;  %v7802_v5 = vld [vmem:[#allocation84_spill] sm:$0xff]  ;;  %v2129_v15 = vadd.f32 %v2128_v57, %v7803_v45  ;;  %v7804_v3 = vld [vmem:[#allocation86_spill] sm:$0xff]  ;;  %v7805_v4 = vld [vmem:[#allocation87_spill] sm:$0xff] }
 0x2ff   : > { %v2092_v12 = vadd.f32 %v2091_v39, %v7802_v5  ;;  %v2166_v61 = vadd.f32 %v2165_v49, %v7804_v3  ;;  %v2203_v34 = vadd.f32 %v2202_v33, %v7805_v4  ;;  %v7806_v16 = vld [vmem:[#allocation209_spill] sm:$0xff]  ;;  %v2277_v31 = vadd.f32 %v2276_v62, %v5232_v10  ;;  %v7807_v6 = vld [vmem:[#allocation211_spill] sm:$0xff]  ;;  %v7808_v19 = vld [vmem:[#allocation212_spill] sm:$0xff] }
 0x300   : > { %v2240_v38 = vadd.f32 %v2239_v35, %v7806_v16  ;;  %v2314_v40 = vadd.f32 %v2313_v0, %v7807_v6  ;;  %v2351_v2 = vadd.f32 %v2350_v46, %v7808_v19  ;;  %v7809_v51 = vld [vmem:[#allocation88_spill] sm:$0xff]  ;;  %v7810_v59 = vld [vmem:[#allocation89_spill] sm:$0xff]  ;;  %v7811_v17 = vld [vmem:[#allocation90_spill] sm:$0xff] }
 0x301   : > { %v2093_v8 = vadd.f32 %v2092_v12, %v7809_v51  ;;  %v2130_v58 = vadd.f32 %v2129_v15, %v7810_v59  ;;  %v2167_v39 = vadd.f32 %v2166_v61, %v7811_v17  ;;  %v7812_v5 = vld [vmem:[#allocation91_spill] sm:$0xff]  ;;  %v7813_v45 = vld [vmem:[#allocation213_spill] sm:$0xff]  ;;  %v2278_v33 = vadd.f32 %v2277_v31, %v5252_v32  ;;  %v7815_v16 = vld [vmem:[#allocation216_spill] sm:$0xff] }
 0x302   : > { %v2204_v57 = vadd.f32 %v2203_v34, %v7812_v5  ;;  %v2241_v49 = vadd.f32 %v2240_v38, %v7813_v45  ;;  %v7814_v4 = vld [vmem:[#allocation215_spill] sm:$0xff]  ;;  %v2352_v62 = vadd.f32 %v2351_v2, %v7815_v16  ;;  %v7816_v10 = vld [vmem:[#allocation92_spill] sm:$0xff]  ;;  %v7817_v6 = vld [vmem:[#allocation93_spill] sm:$0xff] }
 0x303   : > { %v2315_v35 = vadd.f32 %v2314_v40, %v7814_v4  ;;  %v2094_v0 = vadd.f32 %v2093_v8, %v7816_v10  ;;  %v2131_v46 = vadd.f32 %v2130_v58, %v7817_v6  ;;  %v7818_v19 = vld [vmem:[#allocation94_spill] sm:$0xff]  ;;  %v7819_v51 = vld [vmem:[#allocation95_spill] sm:$0xff]  ;;  %v7820_v59 = vld [vmem:[#allocation217_spill] sm:$0xff]  ;;  %v2279_v34 = vadd.f32 %v2278_v33, %v5272_v24 }
 0x304   : > { %v2168_v12 = vadd.f32 %v2167_v39, %v7818_v19  ;;  %v2205_v15 = vadd.f32 %v2204_v57, %v7819_v51  ;;  %v2242_v61 = vadd.f32 %v2241_v49, %v7820_v59  ;;  %v7821_v5 = vld [vmem:[#allocation219_spill] sm:$0xff]  ;;  %v7822_v45 = vld [vmem:[#allocation220_spill] sm:$0xff]  ;;  %v7824_v4 = vld [vmem:[#allocation97_spill] sm:$0xff] }
 0x305   : > { %v2316_v38 = vadd.f32 %v2315_v35, %v7821_v5  ;;  %v2353_v31 = vadd.f32 %v2352_v62, %v7822_v45  ;;  %v7823_v32 = vld [vmem:[#allocation96_spill] sm:$0xff]  ;;  %v2132_v2 = vadd.f32 %v2131_v46, %v7824_v4  ;;  %v7825_v16 = vld [vmem:[#allocation98_spill] sm:$0xff]  ;;  %v7826_v10 = vld [vmem:[#allocation99_spill] sm:$0xff]  ;;  %v2280_v57 = vadd.f32 %v2279_v34, %v5292_v20 }
 0x306   : > { %v2095_v40 = vadd.f32 %v2094_v0, %v7823_v32  ;;  %v2169_v8 = vadd.f32 %v2168_v12, %v7825_v16  ;;  %v2206_v58 = vadd.f32 %v2205_v15, %v7826_v10  ;;  %v7827_v6 = vld [vmem:[#allocation221_spill] sm:$0xff]  ;;  %v7828_v51 = vld [vmem:[#allocation223_spill] sm:$0xff]  ;;  %v7829_v59 = vld [vmem:[#allocation224_spill] sm:$0xff] }
 0x307   : > { %v2243_v39 = vadd.f32 %v2242_v61, %v7827_v6  ;;  %v2317_v49 = vadd.f32 %v2316_v38, %v7828_v51  ;;  %v2354_v33 = vadd.f32 %v2353_v31, %v7829_v59  ;;  %v7830_v24 = vld [vmem:[#allocation100_spill] sm:$0xff]  ;;  %v7831_v5 = vld [vmem:[#allocation101_spill] sm:$0xff]  ;;  %v7832_v45 = vld [vmem:[#allocation102_spill] sm:$0xff]  ;;  %v2281_v15 = vadd.f32 %v2280_v57, %v5312_v48 }
 0x308   : > { %v2096_v35 = vadd.f32 %v2095_v40, %v7830_v24  ;;  %v2133_v62 = vadd.f32 %v2132_v2, %v7831_v5  ;;  %v2170_v0 = vadd.f32 %v2169_v8, %v7832_v45  ;;  %v7833_v32 = vld [vmem:[#allocation103_spill] sm:$0xff]  ;;  %v7834_v4 = vld [vmem:[#allocation225_spill] sm:$0xff]  ;;  %v7836_v6 = vld [vmem:[#allocation228_spill] sm:$0xff] }
 0x309   : > { %v2207_v46 = vadd.f32 %v2206_v58, %v7833_v32  ;;  %v2244_v12 = vadd.f32 %v2243_v39, %v7834_v4  ;;  %v7835_v10 = vld [vmem:[#allocation227_spill] sm:$0xff]  ;;  %v2355_v34 = vadd.f32 %v2354_v33, %v7836_v6  ;;  %v7837_v20 = vld [vmem:[#allocation104_spill] sm:$0xff]  ;;  %v7838_v51 = vld [vmem:[#allocation105_spill] sm:$0xff]  ;;  %v2282_v58 = vadd.f32 %v2281_v15, %v5332_v13 }
 0x30a   : > { %v2318_v61 = vadd.f32 %v2317_v49, %v7835_v10  ;;  %v2097_v38 = vadd.f32 %v2096_v35, %v7837_v20  ;;  %v2134_v31 = vadd.f32 %v2133_v62, %v7838_v51  ;;  %v7839_v59 = vld [vmem:[#allocation106_spill] sm:$0xff]  ;;  %v7840_v24 = vld [vmem:[#allocation107_spill] sm:$0xff]  ;;  %v7841_v5 = vld [vmem:[#allocation229_spill] sm:$0xff] }
 0x30b   : > { %v2171_v40 = vadd.f32 %v2170_v0, %v7839_v59  ;;  %v2208_v2 = vadd.f32 %v2207_v46, %v7840_v24  ;;  %v2245_v8 = vadd.f32 %v2244_v12, %v7841_v5  ;;  %v7842_v32 = vld [vmem:[#allocation231_spill] sm:$0xff]  ;;  %v7843_v4 = vld [vmem:[#allocation232_spill] sm:$0xff]  ;;  %v7845_v10 = vld [vmem:[#allocation109_spill] sm:$0xff]  ;;  %v2283_v46 = vadd.f32 %v2282_v58, %v5352_v63 }
 0x30c   : > { %v2319_v39 = vadd.f32 %v2318_v61, %v7842_v32  ;;  %v2356_v57 = vadd.f32 %v2355_v34, %v7843_v4  ;;  %v7844_v48 = vld [vmem:[#allocation108_spill] sm:$0xff]  ;;  %v2135_v33 = vadd.f32 %v2134_v31, %v7845_v10  ;;  %v7846_v6 = vld [vmem:[#allocation110_spill] sm:$0xff]  ;;  %v7847_v20 = vld [vmem:[#allocation111_spill] sm:$0xff] }
 0x30d   : > { %v2098_v49 = vadd.f32 %v2097_v38, %v7844_v48  ;;  %v2172_v35 = vadd.f32 %v2171_v40, %v7846_v6  ;;  %v2209_v62 = vadd.f32 %v2208_v2, %v7847_v20  ;;  %v7848_v51 = vld [vmem:[#allocation233_spill] sm:$0xff]  ;;  %v7849_v24 = vld [vmem:[#allocation235_spill] sm:$0xff]  ;;  %v7850_v5 = vld [vmem:[#allocation236_spill] sm:$0xff]  ;;  %v2284_v2 = vadd.f32 %v2283_v46, %v5372_v9 }
 0x30e   : > { %v2246_v0 = vadd.f32 %v2245_v8, %v7848_v51  ;;  %v2320_v12 = vadd.f32 %v2319_v39, %v7849_v24  ;;  %v2357_v15 = vadd.f32 %v2356_v57, %v7850_v5  ;;  %v7851_v13 = vld [vmem:[#allocation112_spill] sm:$0xff]  ;;  %v7852_v32 = vld [vmem:[#allocation113_spill] sm:$0xff]  ;;  %v7853_v4 = vld [vmem:[#allocation114_spill] sm:$0xff] }
 0x30f   : > { %v2099_v61 = vadd.f32 %v2098_v49, %v7851_v13  ;;  %v2136_v34 = vadd.f32 %v2135_v33, %v7852_v32  ;;  %v2173_v38 = vadd.f32 %v2172_v35, %v7853_v4  ;;  %v7854_v48 = vld [vmem:[#allocation115_spill] sm:$0xff]  ;;  %v7855_v10 = vld [vmem:[#allocation237_spill] sm:$0xff]  ;;  %v7857_v51 = vld [vmem:[#allocation240_spill] sm:$0xff] }
 0x310   : > { %v2210_v31 = vadd.f32 %v2209_v62, %v7854_v48  ;;  %v2247_v40 = vadd.f32 %v2246_v0, %v7855_v10  ;;  %v7856_v20 = vld [vmem:[#allocation239_spill] sm:$0xff]  ;;  %v2358_v58 = vadd.f32 %v2357_v15, %v7857_v51  ;;  %v7858_v63 = vld [vmem:[#allocation116_spill] sm:$0xff]  ;;  %v7859_v24 = vld [vmem:[#allocation117_spill] sm:$0xff]  ;;  %v2285_v62 = vadd.f32 %v2284_v2, %v5392_v50 }
 0x311   : > { %v2321_v8 = vadd.f32 %v2320_v12, %v7856_v20  ;;  %v2100_v39 = vadd.f32 %v2099_v61, %v7858_v63  ;;  %v2137_v57 = vadd.f32 %v2136_v34, %v7859_v24  ;;  %v7860_v5 = vld [vmem:[#allocation118_spill] sm:$0xff]  ;;  %v7861_v13 = vld [vmem:[#allocation119_spill] sm:$0xff]  ;;  %v7862_v32 = vld [vmem:[#allocation241_spill] sm:$0xff] }
 0x312   : > { %v2174_v49 = vadd.f32 %v2173_v38, %v7860_v5  ;;  %v2211_v33 = vadd.f32 %v2210_v31, %v7861_v13  ;;  %v2248_v35 = vadd.f32 %v2247_v40, %v7862_v32  ;;  %v7863_v48 = vld [vmem:[#allocation243_spill] sm:$0xff]  ;;  %v7864_v10 = vld [vmem:[#allocation244_spill] sm:$0xff]  ;;  %v7866_v20 = vld [vmem:[#allocation121_spill] sm:$0xff]  ;;  %v2286_v31 = vadd.f32 %v2285_v62, %v5412_v55 }
 0x313   : > { %v2322_v0 = vadd.f32 %v2321_v8, %v7863_v48  ;;  %v2359_v46 = vadd.f32 %v2358_v58, %v7864_v10  ;;  %v7865_v9 = vld [vmem:[#allocation120_spill] sm:$0xff]  ;;  %v2138_v15 = vadd.f32 %v2137_v57, %v7866_v20  ;;  %v7867_v51 = vld [vmem:[#allocation122_spill] sm:$0xff]  ;;  %v7868_v63 = vld [vmem:[#allocation123_spill] sm:$0xff] }
 0x314   : > { %v2101_v12 = vadd.f32 %v2100_v39, %v7865_v9  ;;  %v2175_v61 = vadd.f32 %v2174_v49, %v7867_v51  ;;  %v2212_v34 = vadd.f32 %v2211_v33, %v7868_v63  ;;  %v7869_v24 = vld [vmem:[#allocation245_spill] sm:$0xff]  ;;  %v7870_v13 = vld [vmem:[#allocation247_spill] sm:$0xff]  ;;  %v7871_v32 = vld [vmem:[#allocation248_spill] sm:$0xff]  ;;  %v2287_v33 = vadd.f32 %v2286_v31, %v5432_v14 }
 0x315   : > { %v2249_v38 = vadd.f32 %v2248_v35, %v7869_v24  ;;  %v2323_v40 = vadd.f32 %v2322_v0, %v7870_v13  ;;  %v2360_v2 = vadd.f32 %v2359_v46, %v7871_v32  ;;  %v7872_v50 = vld [vmem:[#allocation124_spill] sm:$0xff]  ;;  %v7873_v48 = vld [vmem:[#allocation125_spill] sm:$0xff]  ;;  %v7874_v10 = vld [vmem:[#allocation126_spill] sm:$0xff] }
 0x316   : > { %v2102_v8 = vadd.f32 %v2101_v12, %v7872_v50  ;;  %v2139_v58 = vadd.f32 %v2138_v15, %v7873_v48  ;;  %v2176_v39 = vadd.f32 %v2175_v61, %v7874_v10  ;;  %v7875_v9 = vld [vmem:[#allocation127_spill] sm:$0xff]  ;;  %v7876_v20 = vld [vmem:[#allocation249_spill] sm:$0xff]  ;;  %v7878_v24 = vld [vmem:[#allocation252_spill] sm:$0xff] }
 0x317   : > { %v2213_v57 = vadd.f32 %v2212_v34, %v7875_v9  ;;  %v2250_v49 = vadd.f32 %v2249_v38, %v7876_v20  ;;  %v7877_v63 = vld [vmem:[#allocation251_spill] sm:$0xff]  ;;  %v2361_v62 = vadd.f32 %v2360_v2, %v7878_v24  ;;  %v7879_v55 = vld [vmem:[#allocation128_spill] sm:$0xff]  ;;  %v7880_v13 = vld [vmem:[#allocation129_spill] sm:$0xff]  ;;  %v2288_v34 = vadd.f32 %v2287_v33, %v5452_v53 }
 0x318   : > { %v2324_v35 = vadd.f32 %v2323_v40, %v7877_v63  ;;  %v2103_v0 = vadd.f32 %v2102_v8, %v7879_v55  ;;  %v2140_v46 = vadd.f32 %v2139_v58, %v7880_v13  ;;  %v7881_v32 = vld [vmem:[#allocation130_spill] sm:$0xff]  ;;  %v7882_v50 = vld [vmem:[#allocation131_spill] sm:$0xff]  ;;  %v7883_v48 = vld [vmem:[#allocation253_spill] sm:$0xff] }
 0x319   : > { %v2177_v12 = vadd.f32 %v2176_v39, %v7881_v32  ;;  %v2214_v15 = vadd.f32 %v2213_v57, %v7882_v50  ;;  %v2251_v61 = vadd.f32 %v2250_v49, %v7883_v48  ;;  %v7884_v9 = vld [vmem:[#allocation255_spill] sm:$0xff]  ;;  %v7885_v20 = vld [vmem:[#allocation256_spill] sm:$0xff]  ;;  %v7887_v63 = vld [vmem:[#allocation133_spill] sm:$0xff] }
 0x31a   : > { %v2325_v38 = vadd.f32 %v2324_v35, %v7884_v9  ;;  %v2362_v31 = vadd.f32 %v2361_v62, %v7885_v20  ;;  %v7886_v14 = vld [vmem:[#allocation132_spill] sm:$0xff]  ;;  %v2141_v2 = vadd.f32 %v2140_v46, %v7887_v63  ;;  %v7888_v24 = vld [vmem:[#allocation134_spill] sm:$0xff]  ;;  %v7889_v55 = vld [vmem:[#allocation135_spill] sm:$0xff] }
 0x31b   : > { %v2104_v40 = vadd.f32 %v2103_v0, %v7886_v14  ;;  %v2178_v8 = vadd.f32 %v2177_v12, %v7888_v24  ;;  %v2215_v58 = vadd.f32 %v2214_v15, %v7889_v55  ;;  %v7890_v13 = vld [vmem:[#allocation257_spill] sm:$0xff]  ;;  %v7891_v32 = vld [vmem:[#allocation258_spill] sm:$0xff]  ;;  %v7892_v50 = vld [vmem:[#allocation259_spill] sm:$0xff] }
 0x31c   : > { %v2252_v39 = vadd.f32 %v2251_v61, %v7890_v13  ;;  %v2289_v57 = vadd.f32 %v2288_v34, %v7891_v32  ;;  %v2326_v49 = vadd.f32 %v2325_v38, %v7892_v50  ;;  %v2363_v33 = vadd.f32 %v2362_v31, %v5483_v42  ;;  %v7893_v53 = vld [vmem:[#allocation136_spill] sm:$0xff]  ;;  %v7894_v9 = vld [vmem:[#allocation137_spill] sm:$0xff]  ;;  %v7895_v20 = vld [vmem:[#allocation138_spill] sm:$0xff] }
 0x31d   : > { %v2105_v35 = vadd.f32 %v2104_v40, %v7893_v53  ;;  %v2142_v62 = vadd.f32 %v2141_v2, %v7894_v9  ;;  %v2179_v0 = vadd.f32 %v2178_v8, %v7895_v20  ;;  %v7896_v14 = vld [vmem:[#allocation139_spill] sm:$0xff]  ;;  %v7898_v13 = vld [vmem:[#allocation264_spill] sm:$0xff] }
 0x31e   : > { %v2216_v46 = vadd.f32 %v2215_v58, %v7896_v14  ;;  %v2253_v12 = vadd.f32 %v2252_v39, %v5487_v36  ;;  %v2290_v15 = vadd.f32 %v2289_v57, %v5492_v11  ;;  %v7897_v55 = vld [vmem:[#allocation263_spill] sm:$0xff]  ;;  %v2364_v34 = vadd.f32 %v2363_v33, %v7898_v13 }
 0x31f   : > { %v2327_v61 = vadd.f32 %v2326_v49, %v7897_v55  ;;  %v2106_v32 = vrot.slane %v2105_v35, 4  ;;  %v2143_v38 = vrot.slane %v2142_v62, 4  ;;  %v2180_v50 = vrot.slane %v2179_v0, 4 }
 0x320   : > { %v2217_v31 = vrot.slane %v2216_v46, 4  ;;  %v2254_v42 = vrot.slane %v2253_v12, 4  ;;  %v2291_v40 = vrot.slane %v2290_v15, 4  ;;  %v2365_v2 = vrot.slane %v2364_v34, 4 }
 0x321   : > { %v2328_v53 = vrot.slane %v2327_v61, 4  ;;  %v2107_v9 = vadd.f32 %v2106_v32, %v2105_v35  ;;  %v2144_v8 = vadd.f32 %v2143_v38, %v2142_v62  ;;  %v2181_v20 = vadd.f32 %v2180_v50, %v2179_v0 }
 0x322   : > { %v2218_v58 = vadd.f32 %v2217_v31, %v2216_v46  ;;  %v2255_v14 = vadd.f32 %v2254_v42, %v2253_v12  ;;  %v2292_v39 = vadd.f32 %v2291_v40, %v2290_v15  ;;  %v2366_v57 = vadd.f32 %v2365_v2, %v2364_v34 }
 0x323   : > { %v2329_v36 = vadd.f32 %v2328_v53, %v2327_v61  ;;  %v2108_v11 = vrot.slane %v2107_v9, 2  ;;  %v2145_v49 = vrot.slane %v2144_v8, 2  ;;  %v2182_v55 = vrot.slane %v2181_v20, 2 }
 0x324   : > { %v2219_v33 = vrot.slane %v2218_v58, 2  ;;  %v2256_v13 = vrot.slane %v2255_v14, 2  ;;  %v2293_v24 = vrot.slane %v2292_v39, 2  ;;  %v2367_v48 = vrot.slane %v2366_v57, 2 }
 0x325   : > { %v2330_v63 = vrot.slane %v2329_v36, 2  ;;  %v2109_v10 = vadd.f32 %v2108_v11, %v2107_v9  ;;  %v2146_v51 = vadd.f32 %v2145_v49, %v2144_v8  ;;  %v2183_v5 = vadd.f32 %v2182_v55, %v2181_v20 }
 0x326   : > { %v2220_v4 = vadd.f32 %v2219_v33, %v2218_v58  ;;  %v2257_v32 = vadd.f32 %v2256_v13, %v2255_v14  ;;  %v2294_v35 = vadd.f32 %v2293_v24, %v2292_v39  ;;  %v2368_v62 = vadd.f32 %v2367_v48, %v2366_v57  ;;  %v7899_v33 = vld [vmem:[#allocation15_spill] sm:$0xff] }
 0x327   : > { %v2331_v50 = vadd.f32 %v2330_v63, %v2329_v36  ;;  %v2110_v42 = vrot.slane %v2109_v10, 1  ;;  %v2147_v0 = vrot.slane %v2146_v51, 1  ;;  %v2184_v53 = vrot.slane %v2183_v5, 1 }
 0x328   : > { %v2221_v46 = vrot.slane %v2220_v4, 1  ;;  %v2258_v12 = vrot.slane %v2257_v32, 1  ;;  %v2295_v15 = vrot.slane %v2294_v35, 1  ;;  %v2369_v34 = vrot.slane %v2368_v62, 1 }
 0x329   : > { %v2332_v61 = vrot.slane %v2331_v50, 1  ;;  %v2111_v38 = vadd.f32 %v2110_v42, %v2109_v10  ;;  %v2148_v31 = vadd.f32 %v2147_v0, %v2146_v51  ;;  %v2185_v40 = vadd.f32 %v2184_v53, %v2183_v5  ;;  %v2074_v51 = vld [vmem:[#allocation8] sm:$0xff]  ;;  %v7901_v0 = vld [vmem:[#allocation140_spill] sm:$0xff] }
 0x32a   : > { %v2222_v2 = vadd.f32 %v2221_v46, %v2220_v4  ;;  %v2259_v9 = vadd.f32 %v2258_v12, %v2257_v32  ;;  %v2296_v11 = vadd.f32 %v2295_v15, %v2294_v35  ;;  %v2370_v55 = vadd.f32 %v2369_v34, %v2368_v62  ;;  %v7902_v12 = vld [vmem:[#allocation141_spill] sm:$0xff] }
 0x32b   : > { %v2333_v20 = vadd.f32 %v2332_v61, %v2331_v50  ;;  %v2379_v13 = vrot.slane %v2148_v31, 7  ;;  %v2380_v24 = vrot.slane %v2185_v40, 6  ;;  %v5770_v57 = vmul.f32 %v4031_v44, %v4031_v44  ;;  %v7900_v50 = vld [vmem:[#allocation16_spill] sm:$0xff]  ;;  %v7903_v61 = vld [vmem:[#allocation17_spill] sm:$0xff]  ;;  %v7905_v31 = vld [vmem:[#allocation19_spill] sm:$0xff] }
 0x32c   : > { %v2381_v63 = vrot.slane %v2222_v2, 5  ;;  %v2382_v48 = vrot.slane %v2259_v9, 4  ;;  %v2383_v14 = vrot.slane %v2296_v11, 3  ;;  %v2385_v8 = vrot.slane %v2370_v55, 1  ;;  %v7906_v2 = vld [vmem:[#allocation20_spill] sm:$0xff]  ;;  %v7907_v9 = vld [vmem:[#allocation142_spill] sm:$0xff] }
 0x32d   : > { %v2384_v36 = vrot.slane %v2333_v20, 2  ;;  %v2387_v58 = vsel %vm2386_vm14, %v2111_v38, %v2379_v13  ;;  %v5775_v32 = vmul.f32 %v7899_v33, %v7899_v33  ;;  %v5779_v35 = vmul.f32 %v4046_v56, %v4046_v56  ;;  %v7904_v38 = vld [vmem:[#allocation18_spill] sm:$0xff]  ;;  %v7908_v20 = vld [vmem:[#allocation143_spill] sm:$0xff]  ;;  %v7909_v13 = vld [vmem:[#allocation144_spill] sm:$0xff] }
 0x32e   : > { %v2389_v5 = vsel %vm2388_vm15, %v2380_v24, %v2381_v63  ;;  %v2393_v4 = vsel %vm2392_vm10, %v2382_v48, %v2383_v14  ;;  %v5783_v62 = vmul.f32 %v7900_v50, %v7900_v50  ;;  %v5788_v44 = vmul.f32 %v4857_v54, %v4857_v54  ;;  %v7910_v63 = vld [vmem:[#allocation145_spill] sm:$0xff]  ;;  %v7915_v33 = vld [vmem:[#allocation147_spill] sm:$0xff] }
 0x32f   : > { %v2391_v10 = vsel %vm2390_vm9, %v2387_v58, %v2389_v5  ;;  %v2395_v39 = vsel %vm2394_vm11, %v2384_v36, %v2385_v8  ;;  %v5792_v53 = vmul.f32 %v7901_v0, %v7901_v0  ;;  %v5796_v46 = vmul.f32 %v4869_v7, %v4869_v7  ;;  %v7911_v14 = vld [vmem:[#allocation21_spill] sm:$0xff]  ;;  %v7912_v8 = vld [vmem:[#allocation22_spill] sm:$0xff]  ;;  %v7913_v5 = vld [vmem:[#allocation23_spill] sm:$0xff] }
 0x330   : > { %v2397_v49 = vsel %vm2396_vm12, %v2393_v4, %v2395_v39  ;;  %v5800_v15 = vmul.f32 %v7902_v12, %v7902_v12  ;;  %v5804_v34 = vmul.f32 %v7903_v61, %v7903_v61  ;;  %v5808_v54 = vmul.f32 %v7904_v38, %v7904_v38  ;;  %v7914_v39 = vld [vmem:[#allocation146_spill] sm:$0xff]  ;;  %v7918_v12 = vld [vmem:[#allocation25_spill] sm:$0xff] }
 0x331   : > { %v2399_v42 = vsel %vm2398_vm0, %v2391_v10, %v2397_v49  ;;  %v5812_v40 = vmul.f32 %v7905_v31, %v7905_v31  ;;  %v5816_v7 = vmul.f32 %v7906_v2, %v7906_v2  ;;  %v5820_v11 = vmul.f32 %v7907_v9, %v7907_v9  ;;  %v7919_v61 = vld [vmem:[#allocation26_spill] sm:$0xff]  ;;  %v7920_v31 = vld [vmem:[#allocation27_spill] sm:$0xff]  ;;  %v7921_v9 = vld [vmem:[#allocation149_spill] sm:$0xff] }
 0x332   : > { %v2401_v56 = vadd.f32 %v2399_v42, %v2074_v51  ;;  %v5824_v55 = vmul.f32 %v7908_v20, %v7908_v20  ;;  %v5828_v24 = vmul.f32 %v7909_v13, %v7909_v13  ;;  %v5832_v48 = vmul.f32 %v7910_v63, %v7910_v63  ;;  %v7916_v42 = vld [vmem:[#allocation148_spill] sm:$0xff]  ;;  %v7922_v13 = vld [vmem:[#allocation150_spill] sm:$0xff] }
 0x333   : > { %v5836_v36 = vmul.f32 %v7911_v14, %v7911_v14  ;;  %v5840_v58 = vmul.f32 %v7912_v8, %v7912_v8  ;;  %v5844_v4 = vmul.f32 %v7913_v5, %v7913_v5  ;;  %v5848_v51 = vmul.f32 %v4102_v25, %v4102_v25  ;;  %v7923_v14 = vld [vmem:[#allocation151_spill] sm:$0xff]  ;;  %v7924_v5 = vld [vmem:[#allocation152_spill] sm:$0xff] }
 0x334   : > { %2402 = vst [vmem:[#allocation8] sm:$0xff] %v2401_v56  ;;  %v5852_v10 = vmul.f32 %v4898_v52, %v4898_v52  ;;  %v5856_v49 = vmul.f32 %v7914_v39, %v7914_v39  ;;  %v5860_v50 = vmul.f32 %v7915_v33, %v7915_v33  ;;  %v5864_v0 = vmul.f32 %v7916_v42, %v7916_v42  ;;  %v7917_v56 = vld [vmem:[#allocation24_spill] sm:$0xff] }
 0x335   : > { %v5868_v25 = vmul.f32 %v7917_v56, %v7917_v56  ;;  %v5872_v52 = vmul.f32 %v7918_v12, %v7918_v12  ;;  %v5876_v38 = vmul.f32 %v7919_v61, %v7919_v61  ;;  %v5880_v2 = vmul.f32 %v7920_v31, %v7920_v31  ;;  %v7926_v33 = vld [vmem:[#allocation28_spill] sm:$0xff]  ;;  %v7927_v56 = vld [vmem:[#allocation29_spill] sm:$0xff]  ;;  %v7928_v61 = vld [vmem:[#allocation30_spill] sm:$0xff]  ;;  %3562 = dma.vmem_to_hbm [thread:$0]  (%p8004_p2), %s3011_s28, 128, %s3013_s11, [#allocation9]  }
 0x336   : > { %v5884_v20 = vmul.f32 %v7921_v9, %v7921_v9  ;;  %v5888_v63 = vmul.f32 %v7922_v13, %v7922_v13  ;;  %v5892_v8 = vmul.f32 %v7923_v14, %v7923_v14  ;;  %v5896_v39 = vmul.f32 %v7924_v5, %v7924_v5  ;;  %v7932_v14 = vld [vmem:[#allocation154_spill] sm:$0xff] }
 0x337   : > { %v5900_v42 = vmul.f32 %v7926_v33, %v7926_v33  ;;  %v5904_v12 = vmul.f32 %v7927_v56, %v7927_v56  ;;  %v5908_v31 = vmul.f32 %v7928_v61, %v7928_v61  ;;  %v5912_v9 = vmul.f32 %v7707_v26, %v7707_v26  ;;  %v7934_v33 = vld [vmem:[#allocation155_spill] sm:$0xff] }
 0x338   : > { %7925 = vst [vmem:[#allocation31_spill] sm:$0xff] %v5896_v39  ;;  %v5916_v13 = vmul.f32 %v7708_v28, %v7708_v28  ;;  %v5920_v5 = vmul.f32 %v7932_v14, %v7932_v14  ;;  %v5924_v56 = vmul.f32 %v7934_v33, %v7934_v33  ;;  %v7936_v39 = vld [vmem:[#allocation156_spill] sm:$0xff] }
 0x339   : > { %7929 = vst [vmem:[#allocation153_spill] sm:$0xff] %v5908_v31  ;;  %v5928_v61 = vmul.f32 %v7936_v39, %v7936_v39  ;;  %v7938_v31 = vld [vmem:[#allocation32_spill] sm:$0xff] }
 0x33a   : > { %7930 = vst [vmem:[#allocation39_spill] sm:$0xff] %v5912_v9  ;;  %v5932_v26 = vmul.f32 %v7938_v31, %v7938_v31  ;;  %v7940_v9 = vld [vmem:[#allocation33_spill] sm:$0xff] }
 0x33b   : > { %7931 = vst [vmem:[#allocation161_spill] sm:$0xff] %v5916_v13  ;;  %v5936_v28 = vmul.f32 %v7940_v9, %v7940_v9  ;;  %v7942_v13 = vld [vmem:[#allocation34_spill] sm:$0xff] }
 0x33c   : > { %7933 = vst [vmem:[#allocation47_spill] sm:$0xff] %v5920_v5  ;;  %v5940_v14 = vmul.f32 %v7942_v13, %v7942_v13  ;;  %v7944_v5 = vld [vmem:[#allocation35_spill] sm:$0xff] }
 0x33d   : > { %7935 = vst [vmem:[#allocation169_spill] sm:$0xff] %v5924_v56  ;;  %v5944_v33 = vmul.f32 %v7944_v5, %v7944_v5  ;;  %v7946_v56 = vld [vmem:[#allocation157_spill] sm:$0xff] }
 0x33e   : > { %7937 = vst [vmem:[#allocation55_spill] sm:$0xff] %v5928_v61  ;;  %v5948_v39 = vmul.f32 %v7946_v56, %v7946_v56  ;;  %v7948_v61 = vld [vmem:[#allocation158_spill] sm:$0xff] }
 0x33f   : > { %7939 = vst [vmem:[#allocation59_spill] sm:$0xff] %v5932_v26  ;;  %v5952_v31 = vmul.f32 %v7948_v61, %v7948_v61  ;;  %v7949_v26 = vld [vmem:[#allocation159_spill] sm:$0xff] }
 0x340   : > { %7941 = vst [vmem:[#allocation63_spill] sm:$0xff] %v5936_v28  ;;  %v5956_v9 = vmul.f32 %v7949_v26, %v7949_v26  ;;  %v7951_v28 = vld [vmem:[#allocation160_spill] sm:$0xff]  ;;  %v5976_v26 = vmul.f32 %v7721_v22, %v7721_v22 }
 0x341   : > { %7943 = vst [vmem:[#allocation185_spill] sm:$0xff] %v5940_v14  ;;  %v5960_v13 = vmul.f32 %v7951_v28, %v7951_v28  ;;  %v7953_v14 = vld [vmem:[#allocation36_spill] sm:$0xff]  ;;  %v5980_v28 = vmul.f32 %v7722_v1, %v7722_v1 }
 0x342   : > { %7945 = vst [vmem:[#allocation65_spill] sm:$0xff] %v5944_v33  ;;  %v5964_v5 = vmul.f32 %v7953_v14, %v7953_v14  ;;  %v7954_v33 = vld [vmem:[#allocation37_spill] sm:$0xff] }
 0x343   : > { %7947 = vst [vmem:[#allocation70_spill] sm:$0xff] %v5948_v39  ;;  %v5968_v56 = vmul.f32 %v7954_v33, %v7954_v33  ;;  %v7956_v39 = vld [vmem:[#allocation38_spill] sm:$0xff] }
 0x344   : > { %7950 = vst [vmem:[#allocation74_spill] sm:$0xff] %v5956_v9  ;;  %v5972_v61 = vmul.f32 %v7956_v39, %v7956_v39  ;;  %v7962_v9 = vld [vmem:[#allocation163_spill] sm:$0xff] }
 0x345   : > { %7952 = vst [vmem:[#allocation78_spill] sm:$0xff] %v5960_v13  ;;  %v7960_v13 = vld [vmem:[#allocation162_spill] sm:$0xff]  ;;  %v5988_v33 = vmul.f32 %v7962_v9, %v7962_v9 }
 0x346   : > { %7955 = vst [vmem:[#allocation82_spill] sm:$0xff] %v5968_v56  ;;  %v5984_v14 = vmul.f32 %v7960_v13, %v7960_v13  ;;  %v7964_v56 = vld [vmem:[#allocation164_spill] sm:$0xff] }
 0x347   : > { %7957 = vst [vmem:[#allocation86_spill] sm:$0xff] %v5972_v61  ;;  %v5992_v39 = vmul.f32 %v7964_v56, %v7964_v56  ;;  %v7966_v61 = vld [vmem:[#allocation40_spill] sm:$0xff] }
 0x348   : > { %7958 = vst [vmem:[#allocation90_spill] sm:$0xff] %v5976_v26  ;;  %v5996_v22 = vmul.f32 %v7966_v61, %v7966_v61  ;;  %v7968_v26 = vld [vmem:[#allocation41_spill] sm:$0xff] }
 0x349   : > { %7959 = vst [vmem:[#allocation94_spill] sm:$0xff] %v5980_v28  ;;  %v6000_v1 = vmul.f32 %v7968_v26, %v7968_v26  ;;  %v7970_v28 = vld [vmem:[#allocation42_spill] sm:$0xff] }
 0x34a   : > { %7961 = vst [vmem:[#allocation98_spill] sm:$0xff] %v5984_v14  ;;  %v6004_v13 = vmul.f32 %v7970_v28, %v7970_v28  ;;  %v7972_v14 = vld [vmem:[#allocation43_spill] sm:$0xff] }
 0x34b   : > { %7963 = vst [vmem:[#allocation102_spill] sm:$0xff] %v5988_v33  ;;  %v6008_v9 = vmul.f32 %v7972_v14, %v7972_v14  ;;  %v7974_v33 = vld [vmem:[#allocation165_spill] sm:$0xff] }
 0x34c   : > { %7965 = vst [vmem:[#allocation106_spill] sm:$0xff] %v5992_v39  ;;  %v6012_v56 = vmul.f32 %v7974_v33, %v7974_v33  ;;  %v7976_v39 = vld [vmem:[#allocation166_spill] sm:$0xff] }
 0x34d   : > { %7967 = vst [vmem:[#allocation110_spill] sm:$0xff] %v5996_v22  ;;  %v6016_v61 = vmul.f32 %v7976_v39, %v7976_v39  ;;  %v7977_v22 = vld [vmem:[#allocation167_spill] sm:$0xff] }
 0x34e   : > { %7969 = vst [vmem:[#allocation15_spill] sm:$0xff] %v6000_v1  ;;  %v6020_v26 = vmul.f32 %v7977_v22, %v7977_v22  ;;  %v7979_v1 = vld [vmem:[#allocation168_spill] sm:$0xff]  ;;  %v6041_v22 = vmul.f32 %v7735_v30, %v7735_v30 }
 0x34f   : > { %7971 = vst [vmem:[#allocation16_spill] sm:$0xff] %v6004_v13  ;;  %v6024_v28 = vmul.f32 %v7979_v1, %v7979_v1  ;;  %v7981_v13 = vld [vmem:[#allocation44_spill] sm:$0xff]  ;;  %v6045_v1 = vmul.f32 %v7736_v29, %v7736_v29 }
 0x350   : > { %7973 = vst [vmem:[#allocation140_spill] sm:$0xff] %v6008_v9  ;;  %v6028_v14 = vmul.f32 %v7981_v13, %v7981_v13  ;;  %v7982_v9 = vld [vmem:[#allocation45_spill] sm:$0xff]  ;;  %v7987_v13 = vld [vmem:[#allocation170_spill] sm:$0xff]  ;;  %v7991_v30 = vld [vmem:[#allocation172_spill] sm:$0xff] }
 0x351   : > { %7975 = vst [vmem:[#allocation141_spill] sm:$0xff] %v6012_v56  ;;  %v6032_v33 = vmul.f32 %v7982_v9, %v7982_v9  ;;  %v7983_v56 = vld [vmem:[#allocation46_spill] sm:$0xff]  ;;  %v7989_v9 = vld [vmem:[#allocation171_spill] sm:$0xff]  ;;  %v7993_v29 = vld [vmem:[#allocation48_spill] sm:$0xff] }
 0x352   : > { %7978 = vst [vmem:[#allocation17_spill] sm:$0xff] %v6020_v26  ;;  %v6037_v39 = vmul.f32 %v7983_v56, %v7983_v56  ;;  %v6056_v56 = vmul.f32 %v7989_v9, %v7989_v9  ;;  %v7999_v9 = vld [vmem:[#allocation51_spill] sm:$0xff] }
 0x353   : > { %7980 = vst [vmem:[#allocation18_spill] sm:$0xff] %v6024_v28  ;;  %v6049_v28 = vmul.f32 %v7987_v13, %v7987_v13  ;;  %v7995_v13 = vld [vmem:[#allocation49_spill] sm:$0xff] }
 0x354   : > { %7984 = vst [vmem:[#allocation19_spill] sm:$0xff] %v6037_v39  ;;  %v7997_v39 = vld [vmem:[#allocation50_spill] sm:$0xff] }
 0x355   : > { %7985 = vst [vmem:[#allocation20_spill] sm:$0xff] %v6041_v22  ;;  %v6060_v22 = vmul.f32 %v7991_v30, %v7991_v30  ;;  %v6072_v26 = vmul.f32 %v7997_v39, %v7997_v39  ;;  %v8001_v30 = vld [vmem:[#allocation173_spill] sm:$0xff]  ;;  %v8007_v39 = vld [vmem:[#allocation176_spill] sm:$0xff] }
 0x356   : > { %7986 = vst [vmem:[#allocation142_spill] sm:$0xff] %v6045_v1  ;;  %v6064_v1 = vmul.f32 %v7993_v29, %v7993_v29  ;;  %v8003_v29 = vld [vmem:[#allocation174_spill] sm:$0xff] }
 0x357   : > { %7988 = vst [vmem:[#allocation143_spill] sm:$0xff] %v6049_v28  ;;  %v6068_v28 = vmul.f32 %v7995_v13, %v7995_v13  ;;  %v8005_v13 = vld [vmem:[#allocation175_spill] sm:$0xff] }
 0x358   : > { %7990 = vst [vmem:[#allocation144_spill] sm:$0xff] %v6056_v56  ;;  %v6076_v56 = vmul.f32 %v7999_v9, %v7999_v9  ;;  %v8009_v9 = vld [vmem:[#allocation52_spill] sm:$0xff] }
 0x359   : > { %7992 = vst [vmem:[#allocation145_spill] sm:$0xff] %v6060_v22  ;;  %v6080_v22 = vmul.f32 %v8001_v30, %v8001_v30  ;;  %v8011_v30 = vld [vmem:[#allocation53_spill] sm:$0xff] }
 0x35a   : > { %7994 = vst [vmem:[#allocation21_spill] sm:$0xff] %v6064_v1  ;;  %v6084_v1 = vmul.f32 %v8003_v29, %v8003_v29  ;;  %v8013_v29 = vld [vmem:[#allocation54_spill] sm:$0xff] }
 0x35b   : > { %7996 = vst [vmem:[#allocation22_spill] sm:$0xff] %v6068_v28  ;;  %v6090_v28 = vmul.f32 %v8005_v13, %v8005_v13  ;;  %v6109_v13 = vmul.f32 %v8013_v29, %v8013_v29  ;;  %v8022_v29 = vld [vmem:[#allocation180_spill] sm:$0xff] }
 0x35c   : > { %7998 = vst [vmem:[#allocation23_spill] sm:$0xff] %v6072_v26  ;;  %v6094_v26 = vmul.f32 %v8007_v39, %v8007_v39  ;;  %v6113_v39 = vmul.f32 %v7749_v18, %v7749_v18  ;;  %v8024_v18 = vld [vmem:[#allocation56_spill] sm:$0xff] }
 0x35d   : > { %8000 = vst [vmem:[#allocation146_spill] sm:$0xff] %v6076_v56  ;;  %v6098_v56 = vmul.f32 %v8009_v9, %v8009_v9 }
 0x35e   : > { %8002 = vst [vmem:[#allocation147_spill] sm:$0xff] %v6080_v22  ;;  %v6102_v22 = vmul.f32 %v8011_v30, %v8011_v30 }
 0x35f   : > { %8006 = vst [vmem:[#allocation148_spill] sm:$0xff] %v6090_v28  ;;  %v8018_v28 = vld [vmem:[#allocation178_spill] sm:$0xff] }
 0x360   : > { %8008 = vst [vmem:[#allocation24_spill] sm:$0xff] %v6094_v26  ;;  %v8016_v26 = vld [vmem:[#allocation177_spill] sm:$0xff]  ;;  %v6121_v30 = vmul.f32 %v8018_v28, %v8018_v28  ;;  %v8028_v28 = vld [vmem:[#allocation58_spill] sm:$0xff] }
 0x361   : > { %8010 = vst [vmem:[#allocation25_spill] sm:$0xff] %v6098_v56  ;;  %v6117_v9 = vmul.f32 %v8016_v26, %v8016_v26  ;;  %v8026_v26 = vld [vmem:[#allocation57_spill] sm:$0xff] }
 0x362   : > { %8012 = vst [vmem:[#allocation26_spill] sm:$0xff] %v6102_v22  ;;  %v8020_v22 = vld [vmem:[#allocation179_spill] sm:$0xff] }
 0x363   : > { %8014 = vst [vmem:[#allocation27_spill] sm:$0xff] %v6109_v13  ;;  %v6126_v56 = vmul.f32 %v8020_v22, %v8020_v22  ;;  %v6130_v13 = vmul.f32 %v8022_v29, %v8022_v29  ;;  %v6144_v22 = vmul.f32 %v8028_v28, %v8028_v28  ;;  %v6148_v29 = vmul.f32 %v7757_v47, %v7757_v47 }
 0x364   : > { %8015 = vst [vmem:[#allocation149_spill] sm:$0xff] %v6113_v39  ;;  %v6134_v39 = vmul.f32 %v8024_v18, %v8024_v18 }
 0x365   : > { %8017 = vst [vmem:[#allocation150_spill] sm:$0xff] %v6117_v9  ;;  %v6138_v9 = vmul.f32 %v8026_v26, %v8026_v26 }
 0x366   : > { %8019 = vst [vmem:[#allocation151_spill] sm:$0xff] %v6121_v30  ;;  %v8035_v30 = vld [vmem:[#allocation184_spill] sm:$0xff] }
 0x367   : > { %8021 = vst [vmem:[#allocation152_spill] sm:$0xff] %v6126_v56  ;;  %v8032_v56 = vld [vmem:[#allocation182_spill] sm:$0xff]  ;;  %v6164_v28 = vmul.f32 %v8035_v30, %v8035_v30 }
 0x368   : > { %8023 = vst [vmem:[#allocation28_spill] sm:$0xff] %v6130_v13  ;;  %v8031_v13 = vld [vmem:[#allocation181_spill] sm:$0xff]  ;;  %v6156_v26 = vmul.f32 %v8032_v56, %v8032_v56 }
 0x369   : > { %8025 = vst [vmem:[#allocation29_spill] sm:$0xff] %v6134_v39  ;;  %v6152_v18 = vmul.f32 %v8031_v13, %v8031_v13 }
 0x36a   : > { %8027 = vst [vmem:[#allocation30_spill] sm:$0xff] %v6138_v9  ;;  %v8033_v9 = vld [vmem:[#allocation183_spill] sm:$0xff] }
 0x36b   : > { %8029 = vst [vmem:[#allocation154_spill] sm:$0xff] %v6144_v22  ;;  %v6160_v39 = vmul.f32 %v8033_v9, %v8033_v9  ;;  %v8037_v22 = vld [vmem:[#allocation60_spill] sm:$0xff] }
 0x36c   : > { %8030 = vst [vmem:[#allocation155_spill] sm:$0xff] %v6148_v29  ;;  %v6168_v47 = vmul.f32 %v8037_v22, %v8037_v22  ;;  %v8039_v29 = vld [vmem:[#allocation61_spill] sm:$0xff] }
 0x36d   : > { %8034 = vst [vmem:[#allocation156_spill] sm:$0xff] %v6160_v39  ;;  %v6172_v13 = vmul.f32 %v8039_v29, %v8039_v29 }
 0x36e   : > { %8036 = vst [vmem:[#allocation32_spill] sm:$0xff] %v6164_v28 }
 0x36f   : > { %8038 = vst [vmem:[#allocation33_spill] sm:$0xff] %v6168_v47 }
 0x370   : > { %8040 = vst [vmem:[#allocation34_spill] sm:$0xff] %v6172_v13 }
 0x371   : > { %3759 = shalt.err (!%p3756_p0)
}
 0x372   : > { %s3843_s20 = smov 1024   ;;  %s3844_s6 = smov 64   ;;  %v8041_v56 = vld [vmem:[#allocation62_spill] sm:$0xff]  ;;  %v6192_v30 = vmul.f32 %v7764_v23, %v7764_v23  ;;  %v6196_v22 = vmul.f32 %v7765_v60, %v7765_v60  ;;  %v8046_v39 = vld [vmem:[#allocation187_spill] sm:$0xff]  ;;  %v8048_v47 = vld [vmem:[#allocation188_spill] sm:$0xff]  ;;  %v6216_v60 = vmul.f32 %v7769_v27, %v7769_v27 }
 0x373   : > { %3560 = dma.vmem_to_hbm [thread:$0]  (%p3939_p10), %s6140_s14, 32768, %s2998_s24, %s2982_s30, %s3843_s20, %s3843_s20, %s3844_s6   ;;  %v6188_v9 = vmul.f32 %v8041_v56, %v8041_v56  ;;  %v8044_v29 = vld [vmem:[#allocation186_spill] sm:$0xff]  ;;  %v6204_v13 = vmul.f32 %v8046_v39, %v8046_v39  ;;  %v6208_v56 = vmul.f32 %v8048_v47, %v8048_v47 }
 0x374   : > { %8043 = vst [vmem:[#allocation157_spill] sm:$0xff] %v6196_v22  ;;  %v6200_v28 = vmul.f32 %v8044_v29, %v8044_v29  ;;  %v8053_v22 = vld [vmem:[#allocation66_spill] sm:$0xff]  ;;  %s3845_s9 = smov [#allocation10]   ;;  %s3024_s13 = sshll.u32 %s7112_s4, 4  ;;  %s3025_s13 = int_to_ptr.hbm [resolvable:$true] %s3024_s13 }
 0x375   : > { %8042 = vst [vmem:[#allocation35_spill] sm:$0xff] %v6188_v9  ;;  %v8050_v9 = vld [vmem:[#allocation64_spill] sm:$0xff]  ;;  %v6220_v29 = vmul.f32 %v8053_v22, %v8053_v22  ;;  %s3022_s7 = sshll.u32 %s3845_s9, 4  ;;  %p8528_p10 = pmov %p8004_p2  ;;  %s3023_s7 = int_to_ptr.vmem [resolvable:$true] %s3022_s7 }
 0x376   : > { %8045 = vst [vmem:[#allocation158_spill] sm:$0xff] %v6200_v28  ;;  %v6212_v23 = vmul.f32 %v8050_v9, %v8050_v9  ;;  %v8055_v28 = vld [vmem:[#allocation67_spill] sm:$0xff]  ;;  %p8529_p3 = pmov %p8004_p2 }
 0x377   : > { %8047 = vst [vmem:[#allocation159_spill] sm:$0xff] %v6204_v13  ;;  %v6224_v39 = vmul.f32 %v8055_v28, %v8055_v28  ;;  %v8057_v13 = vld [vmem:[#allocation189_spill] sm:$0xff] }
 0x378   : > { %8049 = vst [vmem:[#allocation160_spill] sm:$0xff] %v6208_v56  ;;  %v6228_v47 = vmul.f32 %v8057_v13, %v8057_v13  ;;  %v8058_v56 = vld [vmem:[#allocation190_spill] sm:$0xff] }
 0x379   : > { %8051 = vst [vmem:[#allocation36_spill] sm:$0xff] %v6212_v23  ;;  %v6232_v9 = vmul.f32 %v8058_v56, %v8058_v56  ;;  %v8060_v23 = vld [vmem:[#allocation191_spill] sm:$0xff]  ;;  %v6252_v56 = vmul.f32 %v7776_v37, %v7776_v37 }
 0x37a   : > { %8052 = vst [vmem:[#allocation37_spill] sm:$0xff] %v6216_v60  ;;  %v6236_v27 = vmul.f32 %v8060_v23, %v8060_v23  ;;  %v8062_v60 = vld [vmem:[#allocation192_spill] sm:$0xff] }
 0x37b   : > { %8054 = vst [vmem:[#allocation38_spill] sm:$0xff] %v6220_v29  ;;  %v6240_v22 = vmul.f32 %v8062_v60, %v8062_v60  ;;  %v8064_v29 = vld [vmem:[#allocation68_spill] sm:$0xff] }
 0x37c   : > { %8056 = vst [vmem:[#allocation162_spill] sm:$0xff] %v6224_v39  ;;  %v6244_v28 = vmul.f32 %v8064_v29, %v8064_v29  ;;  %v8066_v39 = vld [vmem:[#allocation69_spill] sm:$0xff] }
 0x37d   : > { %8059 = vst [vmem:[#allocation163_spill] sm:$0xff] %v6232_v9  ;;  %v6248_v13 = vmul.f32 %v8066_v39, %v8066_v39  ;;  %v8069_v9 = vld [vmem:[#allocation71_spill] sm:$0xff] }
 0x37e   : > { %8061 = vst [vmem:[#allocation164_spill] sm:$0xff] %v6236_v27  ;;  %v6256_v23 = vmul.f32 %v8069_v9, %v8069_v9  ;;  %v8071_v27 = vld [vmem:[#allocation193_spill] sm:$0xff] }
 0x37f   : > { %8063 = vst [vmem:[#allocation40_spill] sm:$0xff] %v6240_v22  ;;  %v6260_v60 = vmul.f32 %v8071_v27, %v8071_v27  ;;  %v8072_v22 = vld [vmem:[#allocation194_spill] sm:$0xff] }
 0x380   : > { %8065 = vst [vmem:[#allocation41_spill] sm:$0xff] %v6244_v28  ;;  %v6264_v29 = vmul.f32 %v8072_v22, %v8072_v22  ;;  %v8074_v28 = vld [vmem:[#allocation195_spill] sm:$0xff]  ;;  %v6284_v22 = vmul.f32 %v7783_v21, %v7783_v21 }
 0x381   : > { %8067 = vst [vmem:[#allocation42_spill] sm:$0xff] %v6248_v13  ;;  %v6268_v39 = vmul.f32 %v8074_v28, %v8074_v28  ;;  %v8076_v13 = vld [vmem:[#allocation196_spill] sm:$0xff] }
 0x382   : > { %8068 = vst [vmem:[#allocation43_spill] sm:$0xff] %v6252_v56  ;;  %v6272_v37 = vmul.f32 %v8076_v13, %v8076_v13  ;;  %v8078_v56 = vld [vmem:[#allocation72_spill] sm:$0xff] }
 0x383   : > { %8070 = vst [vmem:[#allocation165_spill] sm:$0xff] %v6256_v23  ;;  %v6276_v9 = vmul.f32 %v8078_v56, %v8078_v56  ;;  %v8080_v23 = vld [vmem:[#allocation73_spill] sm:$0xff] }
 0x384   : > { %8073 = vst [vmem:[#allocation166_spill] sm:$0xff] %v6264_v29  ;;  %v6280_v27 = vmul.f32 %v8080_v23, %v8080_v23  ;;  %v8083_v29 = vld [vmem:[#allocation75_spill] sm:$0xff] }
 0x385   : > { %8075 = vst [vmem:[#allocation167_spill] sm:$0xff] %v6268_v39  ;;  %v6288_v28 = vmul.f32 %v8083_v29, %v8083_v29  ;;  %v8085_v39 = vld [vmem:[#allocation197_spill] sm:$0xff] }
 0x386   : > { %8077 = vst [vmem:[#allocation168_spill] sm:$0xff] %v6272_v37  ;;  %v6292_v13 = vmul.f32 %v8085_v39, %v8085_v39  ;;  %v8086_v37 = vld [vmem:[#allocation198_spill] sm:$0xff] }
 0x387   : > { %8079 = vst [vmem:[#allocation44_spill] sm:$0xff] %v6276_v9  ;;  %v6296_v56 = vmul.f32 %v8086_v37, %v8086_v37  ;;  %v8088_v9 = vld [vmem:[#allocation199_spill] sm:$0xff]  ;;  %v6316_v37 = vmul.f32 %v7790_v41, %v7790_v41 }
 0x388   : > { %8081 = vst [vmem:[#allocation45_spill] sm:$0xff] %v6280_v27  ;;  %v6300_v23 = vmul.f32 %v8088_v9, %v8088_v9  ;;  %v8090_v27 = vld [vmem:[#allocation200_spill] sm:$0xff] }
 0x389   : > { %8082 = vst [vmem:[#allocation46_spill] sm:$0xff] %v6284_v22  ;;  %v6304_v21 = vmul.f32 %v8090_v27, %v8090_v27  ;;  %v8092_v22 = vld [vmem:[#allocation76_spill] sm:$0xff] }
 0x38a   : > { %8084 = vst [vmem:[#allocation170_spill] sm:$0xff] %v6288_v28  ;;  %v6308_v29 = vmul.f32 %v8092_v22, %v8092_v22  ;;  %v8094_v28 = vld [vmem:[#allocation77_spill] sm:$0xff] }
 0x38b   : > { %8087 = vst [vmem:[#allocation171_spill] sm:$0xff] %v6296_v56  ;;  %v6312_v39 = vmul.f32 %v8094_v28, %v8094_v28  ;;  %v8097_v56 = vld [vmem:[#allocation79_spill] sm:$0xff] }
 0x38c   : > { %8089 = vst [vmem:[#allocation172_spill] sm:$0xff] %v6300_v23  ;;  %v6320_v9 = vmul.f32 %v8097_v56, %v8097_v56  ;;  %v8099_v23 = vld [vmem:[#allocation201_spill] sm:$0xff] }
 0x38d   : > { %8091 = vst [vmem:[#allocation48_spill] sm:$0xff] %v6304_v21  ;;  %v6324_v27 = vmul.f32 %v8099_v23, %v8099_v23  ;;  %v8100_v21 = vld [vmem:[#allocation202_spill] sm:$0xff] }
 0x38e   : > { %8093 = vst [vmem:[#allocation49_spill] sm:$0xff] %v6308_v29  ;;  %v6328_v22 = vmul.f32 %v8100_v21, %v8100_v21  ;;  %v8102_v29 = vld [vmem:[#allocation203_spill] sm:$0xff]  ;;  %v6348_v21 = vmul.f32 %v7797_v43, %v7797_v43 }
 0x38f   : > { %8095 = vst [vmem:[#allocation50_spill] sm:$0xff] %v6312_v39  ;;  %v6332_v28 = vmul.f32 %v8102_v29, %v8102_v29  ;;  %v8104_v39 = vld [vmem:[#allocation204_spill] sm:$0xff] }
 0x390   : > { %8096 = vst [vmem:[#allocation51_spill] sm:$0xff] %v6316_v37  ;;  %v6336_v41 = vmul.f32 %v8104_v39, %v8104_v39  ;;  %v8106_v37 = vld [vmem:[#allocation80_spill] sm:$0xff] }
 0x391   : > { %8098 = vst [vmem:[#allocation173_spill] sm:$0xff] %v6320_v9  ;;  %v6340_v56 = vmul.f32 %v8106_v37, %v8106_v37  ;;  %v8108_v9 = vld [vmem:[#allocation81_spill] sm:$0xff] }
 0x392   : > { %8101 = vst [vmem:[#allocation174_spill] sm:$0xff] %v6328_v22  ;;  %v6344_v23 = vmul.f32 %v8108_v9, %v8108_v9  ;;  %v8111_v22 = vld [vmem:[#allocation83_spill] sm:$0xff] }
 0x393   : > { %8103 = vst [vmem:[#allocation175_spill] sm:$0xff] %v6332_v28  ;;  %v6352_v29 = vmul.f32 %v8111_v22, %v8111_v22  ;;  %v8113_v28 = vld [vmem:[#allocation205_spill] sm:$0xff] }
 0x394   : > { %8105 = vst [vmem:[#allocation176_spill] sm:$0xff] %v6336_v41  ;;  %v6356_v39 = vmul.f32 %v8113_v28, %v8113_v28  ;;  %v8114_v41 = vld [vmem:[#allocation206_spill] sm:$0xff] }
 0x395   : > { %8107 = vst [vmem:[#allocation52_spill] sm:$0xff] %v6340_v56  ;;  %v6360_v37 = vmul.f32 %v8114_v41, %v8114_v41  ;;  %v8116_v56 = vld [vmem:[#allocation207_spill] sm:$0xff]  ;;  %v6380_v41 = vmul.f32 %v7804_v3, %v7804_v3 }
 0x396   : > { %8109 = vst [vmem:[#allocation53_spill] sm:$0xff] %v6344_v23  ;;  %v6364_v9 = vmul.f32 %v8116_v56, %v8116_v56  ;;  %v8118_v23 = vld [vmem:[#allocation208_spill] sm:$0xff] }
 0x397   : > { %8110 = vst [vmem:[#allocation54_spill] sm:$0xff] %v6348_v21  ;;  %v6368_v43 = vmul.f32 %v8118_v23, %v8118_v23  ;;  %v8120_v21 = vld [vmem:[#allocation84_spill] sm:$0xff] }
 0x398   : > { %8112 = vst [vmem:[#allocation177_spill] sm:$0xff] %v6352_v29  ;;  %v6372_v22 = vmul.f32 %v8120_v21, %v8120_v21  ;;  %v8122_v29 = vld [vmem:[#allocation85_spill] sm:$0xff] }
 0x399   : > { %8115 = vst [vmem:[#allocation178_spill] sm:$0xff] %v6360_v37  ;;  %v6376_v28 = vmul.f32 %v8122_v29, %v8122_v29  ;;  %v8125_v37 = vld [vmem:[#allocation87_spill] sm:$0xff] }
 0x39a   : > { %8117 = vst [vmem:[#allocation179_spill] sm:$0xff] %v6364_v9  ;;  %v6384_v56 = vmul.f32 %v8125_v37, %v8125_v37  ;;  %v8127_v9 = vld [vmem:[#allocation209_spill] sm:$0xff] }
 0x39b   : > { %8119 = vst [vmem:[#allocation180_spill] sm:$0xff] %v6368_v43  ;;  %v6388_v23 = vmul.f32 %v8127_v9, %v8127_v9  ;;  %v8128_v43 = vld [vmem:[#allocation210_spill] sm:$0xff] }
 0x39c   : > { %8121 = vst [vmem:[#allocation56_spill] sm:$0xff] %v6372_v22  ;;  %v6392_v21 = vmul.f32 %v8128_v43, %v8128_v43  ;;  %v8130_v22 = vld [vmem:[#allocation211_spill] sm:$0xff]  ;;  %v6412_v43 = vmul.f32 %v7811_v17, %v7811_v17 }
 0x39d   : > { %8123 = vst [vmem:[#allocation57_spill] sm:$0xff] %v6376_v28  ;;  %v6396_v29 = vmul.f32 %v8130_v22, %v8130_v22  ;;  %v8132_v28 = vld [vmem:[#allocation212_spill] sm:$0xff] }
 0x39e   : > { %8124 = vst [vmem:[#allocation58_spill] sm:$0xff] %v6380_v41  ;;  %v6400_v3 = vmul.f32 %v8132_v28, %v8132_v28  ;;  %v8134_v41 = vld [vmem:[#allocation88_spill] sm:$0xff] }
 0x39f   : > { %8126 = vst [vmem:[#allocation181_spill] sm:$0xff] %v6384_v56  ;;  %v6404_v37 = vmul.f32 %v8134_v41, %v8134_v41  ;;  %v8136_v56 = vld [vmem:[#allocation89_spill] sm:$0xff] }
 0x3a0   : > { %8129 = vst [vmem:[#allocation182_spill] sm:$0xff] %v6392_v21  ;;  %v6408_v9 = vmul.f32 %v8136_v56, %v8136_v56  ;;  %v8139_v21 = vld [vmem:[#allocation91_spill] sm:$0xff] }
 0x3a1   : > { %8131 = vst [vmem:[#allocation183_spill] sm:$0xff] %v6396_v29  ;;  %v6416_v22 = vmul.f32 %v8139_v21, %v8139_v21  ;;  %v8141_v29 = vld [vmem:[#allocation213_spill] sm:$0xff] }
 0x3a2   : > { %8133 = vst [vmem:[#allocation184_spill] sm:$0xff] %v6400_v3  ;;  %v6420_v28 = vmul.f32 %v8141_v29, %v8141_v29  ;;  %v8142_v3 = vld [vmem:[#allocation214_spill] sm:$0xff] }
 0x3a3   : > { %8135 = vst [vmem:[#allocation60_spill] sm:$0xff] %v6404_v37  ;;  %v6424_v41 = vmul.f32 %v8142_v3, %v8142_v3  ;;  %v8144_v37 = vld [vmem:[#allocation215_spill] sm:$0xff]  ;;  %v6444_v3 = vmul.f32 %v7818_v19, %v7818_v19 }
 0x3a4   : > { %8137 = vst [vmem:[#allocation61_spill] sm:$0xff] %v6408_v9  ;;  %v6428_v56 = vmul.f32 %v8144_v37, %v8144_v37  ;;  %v8146_v9 = vld [vmem:[#allocation216_spill] sm:$0xff] }
 0x3a5   : > { %8138 = vst [vmem:[#allocation62_spill] sm:$0xff] %v6412_v43  ;;  %v6432_v17 = vmul.f32 %v8146_v9, %v8146_v9  ;;  %v8148_v43 = vld [vmem:[#allocation92_spill] sm:$0xff] }
 0x3a6   : > { %8140 = vst [vmem:[#allocation186_spill] sm:$0xff] %v6416_v22  ;;  %v6436_v21 = vmul.f32 %v8148_v43, %v8148_v43  ;;  %v8150_v22 = vld [vmem:[#allocation93_spill] sm:$0xff] }
 0x3a7   : > { %8143 = vst [vmem:[#allocation187_spill] sm:$0xff] %v6424_v41  ;;  %v6440_v29 = vmul.f32 %v8150_v22, %v8150_v22  ;;  %v8153_v41 = vld [vmem:[#allocation95_spill] sm:$0xff] }
 0x3a8   : > { %8145 = vst [vmem:[#allocation188_spill] sm:$0xff] %v6428_v56  ;;  %v6448_v37 = vmul.f32 %v8153_v41, %v8153_v41  ;;  %v8155_v56 = vld [vmem:[#allocation217_spill] sm:$0xff] }
 0x3a9   : > { %8147 = vst [vmem:[#allocation64_spill] sm:$0xff] %v6432_v17  ;;  %v6452_v9 = vmul.f32 %v8155_v56, %v8155_v56  ;;  %v8156_v17 = vld [vmem:[#allocation218_spill] sm:$0xff] }
 0x3aa   : > { %8149 = vst [vmem:[#allocation66_spill] sm:$0xff] %v6436_v21  ;;  %v6456_v43 = vmul.f32 %v8156_v17, %v8156_v17  ;;  %v8158_v21 = vld [vmem:[#allocation219_spill] sm:$0xff]  ;;  %v6476_v17 = vmul.f32 %v7825_v16, %v7825_v16 }
 0x3ab   : > { %8151 = vst [vmem:[#allocation67_spill] sm:$0xff] %v6440_v29  ;;  %v6460_v22 = vmul.f32 %v8158_v21, %v8158_v21  ;;  %v8160_v29 = vld [vmem:[#allocation220_spill] sm:$0xff] }
 0x3ac   : > { %8152 = vst [vmem:[#allocation189_spill] sm:$0xff] %v6444_v3  ;;  %v6464_v19 = vmul.f32 %v8160_v29, %v8160_v29  ;;  %v8162_v3 = vld [vmem:[#allocation96_spill] sm:$0xff] }
 0x3ad   : > { %8154 = vst [vmem:[#allocation190_spill] sm:$0xff] %v6448_v37  ;;  %v6468_v41 = vmul.f32 %v8162_v3, %v8162_v3  ;;  %v8164_v37 = vld [vmem:[#allocation97_spill] sm:$0xff] }
 0x3ae   : > { %8157 = vst [vmem:[#allocation191_spill] sm:$0xff] %v6456_v43  ;;  %v6472_v56 = vmul.f32 %v8164_v37, %v8164_v37  ;;  %v8167_v43 = vld [vmem:[#allocation99_spill] sm:$0xff] }
 0x3af   : > { %8159 = vst [vmem:[#allocation192_spill] sm:$0xff] %v6460_v22  ;;  %v6480_v21 = vmul.f32 %v8167_v43, %v8167_v43  ;;  %v8169_v22 = vld [vmem:[#allocation221_spill] sm:$0xff] }
 0x3b0   : > { %8161 = vst [vmem:[#allocation68_spill] sm:$0xff] %v6464_v19  ;;  %v6484_v29 = vmul.f32 %v8169_v22, %v8169_v22  ;;  %v8170_v19 = vld [vmem:[#allocation222_spill] sm:$0xff] }
 0x3b1   : > { %8163 = vst [vmem:[#allocation69_spill] sm:$0xff] %v6468_v41  ;;  %v6488_v3 = vmul.f32 %v8170_v19, %v8170_v19  ;;  %v8172_v41 = vld [vmem:[#allocation223_spill] sm:$0xff]  ;;  %v6508_v19 = vmul.f32 %v7832_v45, %v7832_v45 }
 0x3b2   : > { %8165 = vst [vmem:[#allocation71_spill] sm:$0xff] %v6472_v56  ;;  %v6492_v37 = vmul.f32 %v8172_v41, %v8172_v41  ;;  %v8174_v56 = vld [vmem:[#allocation224_spill] sm:$0xff] }
 0x3b3   : > { %8166 = vst [vmem:[#allocation193_spill] sm:$0xff] %v6476_v17  ;;  %v6496_v16 = vmul.f32 %v8174_v56, %v8174_v56  ;;  %v8176_v17 = vld [vmem:[#allocation100_spill] sm:$0xff] }
 0x3b4   : > { %8168 = vst [vmem:[#allocation194_spill] sm:$0xff] %v6480_v21  ;;  %v6500_v43 = vmul.f32 %v8176_v17, %v8176_v17  ;;  %v8178_v21 = vld [vmem:[#allocation101_spill] sm:$0xff] }
 0x3b5   : > { %8171 = vst [vmem:[#allocation195_spill] sm:$0xff] %v6488_v3  ;;  %v6504_v22 = vmul.f32 %v8178_v21, %v8178_v21  ;;  %v8181_v3 = vld [vmem:[#allocation103_spill] sm:$0xff] }
 0x3b6   : > { %8173 = vst [vmem:[#allocation196_spill] sm:$0xff] %v6492_v37  ;;  %v6512_v41 = vmul.f32 %v8181_v3, %v8181_v3  ;;  %v8183_v37 = vld [vmem:[#allocation225_spill] sm:$0xff] }
 0x3b7   : > { %8175 = vst [vmem:[#allocation72_spill] sm:$0xff] %v6496_v16  ;;  %v6516_v56 = vmul.f32 %v8183_v37, %v8183_v37  ;;  %v8184_v16 = vld [vmem:[#allocation226_spill] sm:$0xff] }
 0x3b8   : > { %8177 = vst [vmem:[#allocation73_spill] sm:$0xff] %v6500_v43  ;;  %v6520_v17 = vmul.f32 %v8184_v16, %v8184_v16  ;;  %v8186_v43 = vld [vmem:[#allocation227_spill] sm:$0xff]  ;;  %v6540_v16 = vmul.f32 %v7839_v59, %v7839_v59 }
 0x3b9   : > { %8179 = vst [vmem:[#allocation75_spill] sm:$0xff] %v6504_v22  ;;  %v6524_v21 = vmul.f32 %v8186_v43, %v8186_v43  ;;  %v8188_v22 = vld [vmem:[#allocation228_spill] sm:$0xff] }
 0x3ba   : > { %8180 = vst [vmem:[#allocation197_spill] sm:$0xff] %v6508_v19  ;;  %v6528_v45 = vmul.f32 %v8188_v22, %v8188_v22  ;;  %v8190_v19 = vld [vmem:[#allocation104_spill] sm:$0xff] }
 0x3bb   : > { %8182 = vst [vmem:[#allocation198_spill] sm:$0xff] %v6512_v41  ;;  %v6532_v3 = vmul.f32 %v8190_v19, %v8190_v19  ;;  %v8192_v41 = vld [vmem:[#allocation105_spill] sm:$0xff] }
 0x3bc   : > { %8185 = vst [vmem:[#allocation199_spill] sm:$0xff] %v6520_v17  ;;  %v6536_v37 = vmul.f32 %v8192_v41, %v8192_v41  ;;  %v8195_v17 = vld [vmem:[#allocation107_spill] sm:$0xff] }
 0x3bd   : > { %8187 = vst [vmem:[#allocation200_spill] sm:$0xff] %v6524_v21  ;;  %v6544_v43 = vmul.f32 %v8195_v17, %v8195_v17  ;;  %v8197_v21 = vld [vmem:[#allocation229_spill] sm:$0xff] }
 0x3be   : > { %8189 = vst [vmem:[#allocation76_spill] sm:$0xff] %v6528_v45  ;;  %v6548_v22 = vmul.f32 %v8197_v21, %v8197_v21  ;;  %v8198_v45 = vld [vmem:[#allocation230_spill] sm:$0xff] }
 0x3bf   : > { %8191 = vst [vmem:[#allocation77_spill] sm:$0xff] %v6532_v3  ;;  %v6552_v19 = vmul.f32 %v8198_v45, %v8198_v45  ;;  %v8200_v3 = vld [vmem:[#allocation231_spill] sm:$0xff]  ;;  %v6572_v45 = vmul.f32 %v7846_v6, %v7846_v6 }
 0x3c0   : > { %8193 = vst [vmem:[#allocation79_spill] sm:$0xff] %v6536_v37  ;;  %v6556_v41 = vmul.f32 %v8200_v3, %v8200_v3  ;;  %v8202_v37 = vld [vmem:[#allocation232_spill] sm:$0xff] }
 0x3c1   : > { %8194 = vst [vmem:[#allocation201_spill] sm:$0xff] %v6540_v16  ;;  %v6560_v59 = vmul.f32 %v8202_v37, %v8202_v37  ;;  %v8204_v16 = vld [vmem:[#allocation108_spill] sm:$0xff] }
 0x3c2   : > { %8196 = vst [vmem:[#allocation202_spill] sm:$0xff] %v6544_v43  ;;  %v6564_v17 = vmul.f32 %v8204_v16, %v8204_v16  ;;  %v8206_v43 = vld [vmem:[#allocation109_spill] sm:$0xff] }
 0x3c3   : > { %8199 = vst [vmem:[#allocation203_spill] sm:$0xff] %v6552_v19  ;;  %v6568_v21 = vmul.f32 %v8206_v43, %v8206_v43  ;;  %v8209_v19 = vld [vmem:[#allocation111_spill] sm:$0xff] }
 0x3c4   : > { %8201 = vst [vmem:[#allocation204_spill] sm:$0xff] %v6556_v41  ;;  %v6576_v3 = vmul.f32 %v8209_v19, %v8209_v19  ;;  %v8211_v41 = vld [vmem:[#allocation233_spill] sm:$0xff] }
 0x3c5   : > { %8203 = vst [vmem:[#allocation80_spill] sm:$0xff] %v6560_v59  ;;  %v6580_v37 = vmul.f32 %v8211_v41, %v8211_v41  ;;  %v8213_v59 = vld [vmem:[#allocation234_spill] sm:$0xff] }
 0x3c6   : > { %8205 = vst [vmem:[#allocation81_spill] sm:$0xff] %v6564_v17  ;;  %v6584_v16 = vmul.f32 %v8213_v59, %v8213_v59  ;;  %v8215_v17 = vld [vmem:[#allocation235_spill] sm:$0xff] }
 0x3c7   : > { %8207 = vst [vmem:[#allocation83_spill] sm:$0xff] %v6568_v21  ;;  %v6588_v43 = vmul.f32 %v8215_v17, %v8215_v17  ;;  %v8217_v21 = vld [vmem:[#allocation236_spill] sm:$0xff] }
 0x3c8   : > { %8208 = vst [vmem:[#allocation205_spill] sm:$0xff] %v6572_v45  ;;  %v6592_v6 = vmul.f32 %v8217_v21, %v8217_v21  ;;  %v8219_v45 = vld [vmem:[#allocation112_spill] sm:$0xff] }
 0x3c9   : > { %8210 = vst [vmem:[#allocation206_spill] sm:$0xff] %v6576_v3  ;;  %v6596_v19 = vmul.f32 %v8219_v45, %v8219_v45  ;;  %v8221_v3 = vld [vmem:[#allocation113_spill] sm:$0xff] }
 0x3ca   : > { %8212 = vst [vmem:[#allocation207_spill] sm:$0xff] %v6580_v37  ;;  %v6600_v41 = vmul.f32 %v8221_v3, %v8221_v3  ;;  %v8223_v37 = vld [vmem:[#allocation114_spill] sm:$0xff] }
 0x3cb   : > { %8214 = vst [vmem:[#allocation208_spill] sm:$0xff] %v6584_v16  ;;  %v6604_v59 = vmul.f32 %v8223_v37, %v8223_v37  ;;  %v8225_v16 = vld [vmem:[#allocation115_spill] sm:$0xff] }
 0x3cc   : > { %8216 = vst [vmem:[#allocation84_spill] sm:$0xff] %v6588_v43  ;;  %v6608_v17 = vmul.f32 %v8225_v16, %v8225_v16  ;;  %v8227_v43 = vld [vmem:[#allocation237_spill] sm:$0xff] }
 0x3cd   : > { %8218 = vst [vmem:[#allocation85_spill] sm:$0xff] %v6592_v6  ;;  %v6612_v21 = vmul.f32 %v8227_v43, %v8227_v43  ;;  %v8229_v6 = vld [vmem:[#allocation238_spill] sm:$0xff] }
 0x3ce   : > { %8220 = vst [vmem:[#allocation87_spill] sm:$0xff] %v6596_v19  ;;  %v6616_v45 = vmul.f32 %v8229_v6, %v8229_v6  ;;  %v8231_v19 = vld [vmem:[#allocation239_spill] sm:$0xff] }
 0x3cf   : > { %8222 = vst [vmem:[#allocation209_spill] sm:$0xff] %v6600_v41  ;;  %v6620_v3 = vmul.f32 %v8231_v19, %v8231_v19  ;;  %v8233_v41 = vld [vmem:[#allocation240_spill] sm:$0xff] }
 0x3d0   : > { %8224 = vst [vmem:[#allocation210_spill] sm:$0xff] %v6604_v59  ;;  %v6624_v37 = vmul.f32 %v8233_v41, %v8233_v41  ;;  %v8235_v59 = vld [vmem:[#allocation116_spill] sm:$0xff] }
 0x3d1   : > { %8226 = vst [vmem:[#allocation211_spill] sm:$0xff] %v6608_v17  ;;  %v6628_v16 = vmul.f32 %v8235_v59, %v8235_v59  ;;  %v8237_v17 = vld [vmem:[#allocation117_spill] sm:$0xff] }
 0x3d2   : > { %8228 = vst [vmem:[#allocation212_spill] sm:$0xff] %v6612_v21  ;;  %v6632_v43 = vmul.f32 %v8237_v17, %v8237_v17  ;;  %v8239_v21 = vld [vmem:[#allocation118_spill] sm:$0xff] }
 0x3d3   : > { %8230 = vst [vmem:[#allocation88_spill] sm:$0xff] %v6616_v45  ;;  %v6636_v6 = vmul.f32 %v8239_v21, %v8239_v21  ;;  %v8241_v45 = vld [vmem:[#allocation119_spill] sm:$0xff] }
 0x3d4   : > { %8232 = vst [vmem:[#allocation89_spill] sm:$0xff] %v6620_v3  ;;  %v6640_v19 = vmul.f32 %v8241_v45, %v8241_v45  ;;  %v8243_v3 = vld [vmem:[#allocation241_spill] sm:$0xff] }
 0x3d5   : > { %8234 = vst [vmem:[#allocation91_spill] sm:$0xff] %v6624_v37  ;;  %v6644_v41 = vmul.f32 %v8243_v3, %v8243_v3  ;;  %v8245_v37 = vld [vmem:[#allocation242_spill] sm:$0xff] }
 0x3d6   : > { %8236 = vst [vmem:[#allocation213_spill] sm:$0xff] %v6628_v16  ;;  %v6648_v59 = vmul.f32 %v8245_v37, %v8245_v37  ;;  %v8247_v16 = vld [vmem:[#allocation243_spill] sm:$0xff] }
 0x3d7   : > { %8238 = vst [vmem:[#allocation214_spill] sm:$0xff] %v6632_v43  ;;  %v6652_v17 = vmul.f32 %v8247_v16, %v8247_v16  ;;  %v8249_v43 = vld [vmem:[#allocation244_spill] sm:$0xff] }
 0x3d8   : > { %8240 = vst [vmem:[#allocation215_spill] sm:$0xff] %v6636_v6  ;;  %v6656_v21 = vmul.f32 %v8249_v43, %v8249_v43  ;;  %v8251_v6 = vld [vmem:[#allocation120_spill] sm:$0xff] }
 0x3d9   : > { %8242 = vst [vmem:[#allocation216_spill] sm:$0xff] %v6640_v19  ;;  %v6660_v45 = vmul.f32 %v8251_v6, %v8251_v6  ;;  %v8253_v19 = vld [vmem:[#allocation121_spill] sm:$0xff] }
 0x3da   : > { %8244 = vst [vmem:[#allocation92_spill] sm:$0xff] %v6644_v41  ;;  %v6664_v3 = vmul.f32 %v8253_v19, %v8253_v19  ;;  %v8255_v41 = vld [vmem:[#allocation122_spill] sm:$0xff] }
 0x3db   : > { %8246 = vst [vmem:[#allocation93_spill] sm:$0xff] %v6648_v59  ;;  %v6668_v37 = vmul.f32 %v8255_v41, %v8255_v41  ;;  %v8257_v59 = vld [vmem:[#allocation123_spill] sm:$0xff] }
 0x3dc   : > { %8248 = vst [vmem:[#allocation95_spill] sm:$0xff] %v6652_v17  ;;  %v6672_v16 = vmul.f32 %v8257_v59, %v8257_v59  ;;  %v8259_v17 = vld [vmem:[#allocation245_spill] sm:$0xff] }
 0x3dd   : > { %8250 = vst [vmem:[#allocation217_spill] sm:$0xff] %v6656_v21  ;;  %v6676_v43 = vmul.f32 %v8259_v17, %v8259_v17  ;;  %v8261_v21 = vld [vmem:[#allocation246_spill] sm:$0xff] }
 0x3de   : > { %8252 = vst [vmem:[#allocation218_spill] sm:$0xff] %v6660_v45  ;;  %v6680_v6 = vmul.f32 %v8261_v21, %v8261_v21  ;;  %v8263_v45 = vld [vmem:[#allocation247_spill] sm:$0xff] }
 0x3df   : > { %8254 = vst [vmem:[#allocation219_spill] sm:$0xff] %v6664_v3  ;;  %v6684_v19 = vmul.f32 %v8263_v45, %v8263_v45  ;;  %v8265_v3 = vld [vmem:[#allocation248_spill] sm:$0xff] }
 0x3e0   : > { %8256 = vst [vmem:[#allocation220_spill] sm:$0xff] %v6668_v37  ;;  %v6688_v41 = vmul.f32 %v8265_v3, %v8265_v3  ;;  %v8267_v37 = vld [vmem:[#allocation124_spill] sm:$0xff] }
 0x3e1   : > { %8258 = vst [vmem:[#allocation96_spill] sm:$0xff] %v6672_v16  ;;  %v6692_v59 = vmul.f32 %v8267_v37, %v8267_v37  ;;  %v8269_v16 = vld [vmem:[#allocation125_spill] sm:$0xff] }
 0x3e2   : > { %8260 = vst [vmem:[#allocation97_spill] sm:$0xff] %v6676_v43  ;;  %v6696_v17 = vmul.f32 %v8269_v16, %v8269_v16  ;;  %v8271_v43 = vld [vmem:[#allocation126_spill] sm:$0xff] }
 0x3e3   : > { %8262 = vst [vmem:[#allocation99_spill] sm:$0xff] %v6680_v6  ;;  %v6700_v21 = vmul.f32 %v8271_v43, %v8271_v43  ;;  %v8273_v6 = vld [vmem:[#allocation127_spill] sm:$0xff] }
 0x3e4   : > { %8264 = vst [vmem:[#allocation221_spill] sm:$0xff] %v6684_v19  ;;  %v6704_v45 = vmul.f32 %v8273_v6, %v8273_v6  ;;  %v8275_v19 = vld [vmem:[#allocation249_spill] sm:$0xff] }
 0x3e5   : > { %8266 = vst [vmem:[#allocation222_spill] sm:$0xff] %v6688_v41  ;;  %v6708_v3 = vmul.f32 %v8275_v19, %v8275_v19  ;;  %v8277_v41 = vld [vmem:[#allocation250_spill] sm:$0xff] }
 0x3e6   : > { %8268 = vst [vmem:[#allocation223_spill] sm:$0xff] %v6692_v59  ;;  %v6712_v37 = vmul.f32 %v8277_v41, %v8277_v41  ;;  %v8279_v59 = vld [vmem:[#allocation251_spill] sm:$0xff] }
 0x3e7   : > { %8270 = vst [vmem:[#allocation224_spill] sm:$0xff] %v6696_v17  ;;  %v6716_v16 = vmul.f32 %v8279_v59, %v8279_v59  ;;  %v8281_v17 = vld [vmem:[#allocation252_spill] sm:$0xff] }
 0x3e8   : > { %8272 = vst [vmem:[#allocation100_spill] sm:$0xff] %v6700_v21  ;;  %v6720_v43 = vmul.f32 %v8281_v17, %v8281_v17  ;;  %v8283_v21 = vld [vmem:[#allocation128_spill] sm:$0xff] }
 0x3e9   : > { %8274 = vst [vmem:[#allocation101_spill] sm:$0xff] %v6704_v45  ;;  %v6724_v6 = vmul.f32 %v8283_v21, %v8283_v21  ;;  %v8285_v45 = vld [vmem:[#allocation129_spill] sm:$0xff] }
 0x3ea   : > { %8276 = vst [vmem:[#allocation103_spill] sm:$0xff] %v6708_v3  ;;  %v6728_v19 = vmul.f32 %v8285_v45, %v8285_v45  ;;  %v8287_v3 = vld [vmem:[#allocation130_spill] sm:$0xff] }
 0x3eb   : > { %8278 = vst [vmem:[#allocation225_spill] sm:$0xff] %v6712_v37  ;;  %v6732_v41 = vmul.f32 %v8287_v3, %v8287_v3  ;;  %v8289_v37 = vld [vmem:[#allocation131_spill] sm:$0xff] }
 0x3ec   : > { %8280 = vst [vmem:[#allocation226_spill] sm:$0xff] %v6716_v16  ;;  %v6736_v59 = vmul.f32 %v8289_v37, %v8289_v37  ;;  %v8291_v16 = vld [vmem:[#allocation253_spill] sm:$0xff] }
 0x3ed   : > { %8282 = vst [vmem:[#allocation227_spill] sm:$0xff] %v6720_v43  ;;  %v6740_v17 = vmul.f32 %v8291_v16, %v8291_v16  ;;  %v8293_v43 = vld [vmem:[#allocation254_spill] sm:$0xff] }
 0x3ee   : > { %8284 = vst [vmem:[#allocation228_spill] sm:$0xff] %v6724_v6  ;;  %v6744_v21 = vmul.f32 %v8293_v43, %v8293_v43  ;;  %v8295_v6 = vld [vmem:[#allocation255_spill] sm:$0xff] }
 0x3ef   : > { %8286 = vst [vmem:[#allocation104_spill] sm:$0xff] %v6728_v19  ;;  %v6748_v45 = vmul.f32 %v8295_v6, %v8295_v6  ;;  %v8297_v19 = vld [vmem:[#allocation256_spill] sm:$0xff] }
 0x3f0   : > { %8288 = vst [vmem:[#allocation105_spill] sm:$0xff] %v6732_v41  ;;  %v6752_v3 = vmul.f32 %v8297_v19, %v8297_v19  ;;  %v8299_v41 = vld [vmem:[#allocation132_spill] sm:$0xff] }
 0x3f1   : > { %8290 = vst [vmem:[#allocation107_spill] sm:$0xff] %v6736_v59  ;;  %v6756_v37 = vmul.f32 %v8299_v41, %v8299_v41  ;;  %v8301_v59 = vld [vmem:[#allocation133_spill] sm:$0xff] }
 0x3f2   : > { %8292 = vst [vmem:[#allocation229_spill] sm:$0xff] %v6740_v17  ;;  %v6760_v16 = vmul.f32 %v8301_v59, %v8301_v59  ;;  %v8303_v17 = vld [vmem:[#allocation134_spill] sm:$0xff] }
 0x3f3   : > { %8294 = vst [vmem:[#allocation230_spill] sm:$0xff] %v6744_v21  ;;  %v6764_v43 = vmul.f32 %v8303_v17, %v8303_v17  ;;  %v8305_v21 = vld [vmem:[#allocation135_spill] sm:$0xff] }
 0x3f4   : > { %8296 = vst [vmem:[#allocation231_spill] sm:$0xff] %v6748_v45  ;;  %v6768_v6 = vmul.f32 %v8305_v21, %v8305_v21  ;;  %v8307_v45 = vld [vmem:[#allocation257_spill] sm:$0xff] }
 0x3f5   : > { %8298 = vst [vmem:[#allocation232_spill] sm:$0xff] %v6752_v3  ;;  %v6772_v19 = vmul.f32 %v8307_v45, %v8307_v45  ;;  %v8309_v3 = vld [vmem:[#allocation258_spill] sm:$0xff] }
 0x3f6   : > { %8300 = vst [vmem:[#allocation108_spill] sm:$0xff] %v6756_v37  ;;  %v6776_v41 = vmul.f32 %v8309_v3, %v8309_v3  ;;  %v8311_v37 = vld [vmem:[#allocation259_spill] sm:$0xff] }
 0x3f7   : > { %8302 = vst [vmem:[#allocation109_spill] sm:$0xff] %v6760_v16  ;;  %v6780_v59 = vmul.f32 %v8311_v37, %v8311_v37  ;;  %v8313_v16 = vld [vmem:[#allocation260_spill] sm:$0xff] }
 0x3f8   : > { %8304 = vst [vmem:[#allocation111_spill] sm:$0xff] %v6764_v43  ;;  %v6784_v17 = vmul.f32 %v8313_v16, %v8313_v16  ;;  %v8315_v43 = vld [vmem:[#allocation136_spill] sm:$0xff] }
 0x3f9   : > { %8306 = vst [vmem:[#allocation233_spill] sm:$0xff] %v6768_v6  ;;  %v6788_v21 = vmul.f32 %v8315_v43, %v8315_v43  ;;  %v8317_v6 = vld [vmem:[#allocation137_spill] sm:$0xff] }
 0x3fa   : > { %8308 = vst [vmem:[#allocation234_spill] sm:$0xff] %v6772_v19  ;;  %v6792_v45 = vmul.f32 %v8317_v6, %v8317_v6  ;;  %v8319_v19 = vld [vmem:[#allocation138_spill] sm:$0xff] }
 0x3fb   : > { %8310 = vst [vmem:[#allocation235_spill] sm:$0xff] %v6776_v41  ;;  %v6796_v3 = vmul.f32 %v8319_v19, %v8319_v19  ;;  %v8320_v41 = vld [vmem:[#allocation139_spill] sm:$0xff] }
 0x3fc   : > { %8312 = vst [vmem:[#allocation236_spill] sm:$0xff] %v6780_v59  ;;  %v6800_v37 = vmul.f32 %v8320_v41, %v8320_v41  ;;  %v8322_v59 = vld [vmem:[#allocation261_spill] sm:$0xff]  ;;  %v2660_v41 = vadd.f32 %v5804_v34, %v5770_v57  ;;  %v2882_v57 = vadd.f32 %v5828_v24, %v5796_v46 }
 0x3fd   : > { %8314 = vst [vmem:[#allocation112_spill] sm:$0xff] %v6784_v17  ;;  %v6804_v16 = vmul.f32 %v8322_v59, %v8322_v59  ;;  %v8323_v17 = vld [vmem:[#allocation262_spill] sm:$0xff]  ;;  %v2734_v59 = vadd.f32 %v5812_v40, %v5779_v35 }
 0x3fe   : > { %8316 = vst [vmem:[#allocation113_spill] sm:$0xff] %v6788_v21  ;;  %v6808_v43 = vmul.f32 %v8323_v17, %v8323_v17  ;;  %v8324_v21 = vld [vmem:[#allocation263_spill] sm:$0xff]  ;;  %v2771_v17 = vadd.f32 %v5816_v7, %v5783_v62  ;;  %v2883_v40 = vadd.f32 %v2882_v57, %v5860_v50 }
 0x3ff   : > { %8318 = vst [vmem:[#allocation114_spill] sm:$0xff] %v6792_v45  ;;  %v6812_v6 = vmul.f32 %v8324_v21, %v8324_v21  ;;  %v8326_v45 = vld [vmem:[#allocation264_spill] sm:$0xff]  ;;  %v2808_v21 = vadd.f32 %v5820_v11, %v5788_v44  ;;  %v2735_v35 = vadd.f32 %v2734_v59, %v5844_v4  ;;  %v8338_v59 = vld [vmem:[#allocation65_spill] sm:$0xff] }
 0x400   : > { %8321 = vst [vmem:[#allocation115_spill] sm:$0xff] %v6800_v37  ;;  %v6816_v19 = vmul.f32 %v8326_v45, %v8326_v45  ;;  %v2697_v37 = vadd.f32 %v5808_v54, %v5775_v32  ;;  %v2661_v45 = vadd.f32 %v2660_v41, %v5836_v36  ;;  %v2919_v32 = vadd.f32 %v5832_v48, %v5800_v15  ;;  %v8337_v41 = vld [vmem:[#allocation185_spill] sm:$0xff] }
 0x401   : > { %8325 = vst [vmem:[#allocation237_spill] sm:$0xff] %v6812_v6  ;;  %v2845_v6 = vadd.f32 %v5824_v55, %v5792_v53  ;;  %v2772_v62 = vadd.f32 %v2771_v17, %v5848_v51  ;;  %v2809_v34 = vadd.f32 %v2808_v21, %v5852_v10  ;;  %v2736_v46 = vadd.f32 %v2735_v35, %v5876_v38  ;;  %v8329_v51 = vld [vmem:[#allocation153_spill] sm:$0xff]  ;;  %v8339_v21 = vld [vmem:[#allocation70_spill] sm:$0xff] }
 0x402   : > { %8327 = vst [vmem:[#allocation238_spill] sm:$0xff] %v6816_v19  ;;  %v2698_v19 = vadd.f32 %v2697_v37, %v5840_v58  ;;  %v2662_v53 = vadd.f32 %v2661_v45, %v5868_v25  ;;  %v2920_v7 = vadd.f32 %v2919_v32, %v5864_v0  ;;  %v2884_v36 = vadd.f32 %v2883_v40, %v5892_v8  ;;  %v8328_v58 = vld [vmem:[#allocation31_spill] sm:$0xff]  ;;  %v8331_v0 = vld [vmem:[#allocation161_spill] sm:$0xff]  ;;  %v8340_v35 = vld [vmem:[#allocation82_spill] sm:$0xff] }
 0x403   : > { %v2846_v44 = vadd.f32 %v2845_v6, %v5856_v49  ;;  %v2773_v15 = vadd.f32 %v2772_v62, %v5880_v2  ;;  %v2810_v11 = vadd.f32 %v2809_v34, %v5884_v20  ;;  %v2737_v10 = vadd.f32 %v2736_v46, %v8329_v51  ;;  %v8330_v49 = vld [vmem:[#allocation39_spill] sm:$0xff]  ;;  %v8335_v6 = vld [vmem:[#allocation169_spill] sm:$0xff]  ;;  %v8341_v34 = vld [vmem:[#allocation74_spill] sm:$0xff] }
 0x404   : > { %v2699_v54 = vadd.f32 %v2698_v19, %v5872_v52  ;;  %v2663_v24 = vadd.f32 %v2662_v53, %v5900_v42  ;;  %v2921_v4 = vadd.f32 %v2920_v7, %v8328_v58  ;;  %v8332_v52 = vld [vmem:[#allocation47_spill] sm:$0xff]  ;;  %v2885_v42 = vadd.f32 %v2884_v36, %v8335_v6  ;;  %v8342_v53 = vld [vmem:[#allocation78_spill] sm:$0xff]  ;;  %v8354_v6 = vld [vmem:[#allocation17_spill] sm:$0xff] }
 0x405   : > { %v2847_v55 = vadd.f32 %v2846_v44, %v5888_v63  ;;  %v2774_v50 = vadd.f32 %v2773_v15, %v8330_v49  ;;  %v2811_v25 = vadd.f32 %v2810_v11, %v8331_v0  ;;  %v8333_v2 = vld [vmem:[#allocation59_spill] sm:$0xff]  ;;  %v2738_v8 = vadd.f32 %v2737_v10, %v8337_v41  ;;  %v8343_v40 = vld [vmem:[#allocation86_spill] sm:$0xff] }
 0x406   : > { %v2700_v48 = vadd.f32 %v2699_v54, %v5904_v12  ;;  %v2664_v20 = vadd.f32 %v2663_v24, %v8333_v2  ;;  %v8334_v37 = vld [vmem:[#allocation63_spill] sm:$0xff]  ;;  %v2886_v44 = vadd.f32 %v2885_v42, %v8341_v34  ;;  %v8344_v46 = vld [vmem:[#allocation90_spill] sm:$0xff] }
 0x407   : > { %v2848_v38 = vadd.f32 %v2847_v55, %v8332_v52  ;;  %v8336_v19 = vld [vmem:[#allocation55_spill] sm:$0xff]  ;;  %v2775_v17 = vadd.f32 %v2774_v50, %v8338_v59  ;;  %v2812_v45 = vadd.f32 %v2811_v25, %v8339_v21  ;;  %v2739_v7 = vadd.f32 %v2738_v8, %v8343_v40  ;;  %v8345_v11 = vld [vmem:[#allocation94_spill] sm:$0xff]  ;;  %v8351_v50 = vld [vmem:[#allocation16_spill] sm:$0xff] }
 0x408   : > { %v2701_v63 = vadd.f32 %v2700_v48, %v8334_v37  ;;  %v2922_v12 = vadd.f32 %v2921_v4, %v8336_v19  ;;  %v2665_v32 = vadd.f32 %v2664_v20, %v5964_v5  ;;  %v8346_v24 = vld [vmem:[#allocation98_spill] sm:$0xff]  ;;  %v8348_v4 = vld [vmem:[#allocation15_spill] sm:$0xff]  ;;  %v8352_v25 = vld [vmem:[#allocation140_spill] sm:$0xff] }
 0x409   : > { %v2849_v57 = vadd.f32 %v2848_v38, %v5952_v31  ;;  %v2776_v15 = vadd.f32 %v2775_v17, %v8344_v46  ;;  %v2813_v55 = vadd.f32 %v2812_v45, %v8345_v11  ;;  %v8347_v36 = vld [vmem:[#allocation110_spill] sm:$0xff]  ;;  %v2740_v0 = vadd.f32 %v2739_v7, %v8351_v50  ;;  %v8353_v38 = vld [vmem:[#allocation141_spill] sm:$0xff]  ;;  %v8356_v41 = vld [vmem:[#allocation19_spill] sm:$0xff] }
 0x40a   : > { %v2702_v62 = vadd.f32 %v2701_v63, %v8340_v35  ;;  %v2923_v54 = vadd.f32 %v2922_v12, %v8342_v53  ;;  %v2666_v58 = vadd.f32 %v2665_v32, %v8347_v36  ;;  %v8349_v51 = vld [vmem:[#allocation102_spill] sm:$0xff]  ;;  %v8357_v59 = vld [vmem:[#allocation20_spill] sm:$0xff]  ;;  %v8360_v35 = vld [vmem:[#allocation21_spill] sm:$0xff] }
 0x40b   : > { %v2850_v48 = vadd.f32 %v2849_v57, %v8346_v24  ;;  %v2887_v5 = vadd.f32 %v2886_v44, %v8349_v51  ;;  %v8350_v10 = vld [vmem:[#allocation106_spill] sm:$0xff]  ;;  %v2777_v52 = vadd.f32 %v2776_v15, %v8352_v25  ;;  %v2814_v2 = vadd.f32 %v2813_v55, %v8353_v38  ;;  %v8359_v57 = vld [vmem:[#allocation143_spill] sm:$0xff]  ;;  %v8362_v44 = vld [vmem:[#allocation144_spill] sm:$0xff] }
 0x40c   : > { %v2703_v31 = vadd.f32 %v2702_v62, %v8348_v4  ;;  %v2924_v49 = vadd.f32 %v2923_v54, %v8350_v10  ;;  %v2667_v37 = vadd.f32 %v2666_v58, %v6028_v14  ;;  %v8355_v19 = vld [vmem:[#allocation18_spill] sm:$0xff]  ;;  %v2741_v8 = vadd.f32 %v2740_v0, %v8356_v41  ;;  %v8363_v53 = vld [vmem:[#allocation145_spill] sm:$0xff]  ;;  %v8364_v54 = vld [vmem:[#allocation23_spill] sm:$0xff] }
 0x40d   : > { %v2851_v20 = vadd.f32 %v2850_v48, %v6016_v61  ;;  %v2888_v42 = vadd.f32 %v2887_v5, %v8354_v6  ;;  %v2778_v17 = vadd.f32 %v2777_v52, %v8357_v59  ;;  %v8358_v21 = vld [vmem:[#allocation142_spill] sm:$0xff]  ;;  %v8366_v15 = vld [vmem:[#allocation147_spill] sm:$0xff]  ;;  %v8367_v24 = vld [vmem:[#allocation25_spill] sm:$0xff] }
 0x40e   : > { %v2704_v63 = vadd.f32 %v2703_v31, %v6032_v33  ;;  %v2925_v12 = vadd.f32 %v2924_v49, %v8355_v19  ;;  %v2815_v45 = vadd.f32 %v2814_v2, %v8358_v21  ;;  %v2668_v62 = vadd.f32 %v2667_v37, %v8360_v35  ;;  %v8361_v34 = vld [vmem:[#allocation22_spill] sm:$0xff]  ;;  %v8369_v4 = vld [vmem:[#allocation148_spill] sm:$0xff]  ;;  %v8371_v10 = vld [vmem:[#allocation27_spill] sm:$0xff] }
 0x40f   : > { %v2852_v32 = vadd.f32 %v2851_v20, %v8359_v57  ;;  %v2889_v14 = vadd.f32 %v2888_v42, %v8362_v44  ;;  %v2742_v40 = vadd.f32 %v2741_v8, %v8364_v54  ;;  %v8365_v7 = vld [vmem:[#allocation146_spill] sm:$0xff]  ;;  %v8370_v51 = vld [vmem:[#allocation24_spill] sm:$0xff]  ;;  %v8372_v50 = vld [vmem:[#allocation149_spill] sm:$0xff] }
 0x410   : > { %v2705_v61 = vadd.f32 %v2704_v63, %v8361_v34  ;;  %v2926_v33 = vadd.f32 %v2925_v12, %v8363_v53  ;;  %v2779_v46 = vadd.f32 %v2778_v17, %v8365_v7  ;;  %v2816_v11 = vadd.f32 %v2815_v45, %v8366_v15  ;;  %v8368_v36 = vld [vmem:[#allocation26_spill] sm:$0xff]  ;;  %v8374_v38 = vld [vmem:[#allocation151_spill] sm:$0xff]  ;;  %v8375_v20 = vld [vmem:[#allocation29_spill] sm:$0xff] }
 0x411   : > { %v2853_v55 = vadd.f32 %v2852_v32, %v6084_v1  ;;  %v2669_v48 = vadd.f32 %v2668_v62, %v8367_v24  ;;  %v2890_v31 = vadd.f32 %v2889_v14, %v8369_v4  ;;  %v2743_v49 = vadd.f32 %v2742_v40, %v8371_v10  ;;  %v8373_v25 = vld [vmem:[#allocation150_spill] sm:$0xff]  ;;  %v8377_v6 = vld [vmem:[#allocation152_spill] sm:$0xff]  ;;  %v8380_v59 = vld [vmem:[#allocation155_spill] sm:$0xff] }
 0x412   : > { %v2706_v58 = vadd.f32 %v2705_v61, %v8368_v36  ;;  %v2927_v5 = vadd.f32 %v2926_v33, %v8370_v51  ;;  %v2780_v0 = vadd.f32 %v2779_v46, %v8372_v50  ;;  %v2817_v52 = vadd.f32 %v2816_v11, %v8373_v25  ;;  %v8376_v63 = vld [vmem:[#allocation30_spill] sm:$0xff]  ;;  %v8378_v19 = vld [vmem:[#allocation28_spill] sm:$0xff]  ;;  %v8381_v57 = vld [vmem:[#allocation33_spill] sm:$0xff] }
 0x413   : > { %v2854_v2 = vadd.f32 %v2853_v55, %v8374_v38  ;;  %v2670_v37 = vadd.f32 %v2669_v48, %v8375_v20  ;;  %v2891_v42 = vadd.f32 %v2890_v31, %v8377_v6  ;;  %v8379_v41 = vld [vmem:[#allocation154_spill] sm:$0xff]  ;;  %v8383_v34 = vld [vmem:[#allocation156_spill] sm:$0xff]  ;;  %v8385_v53 = vld [vmem:[#allocation35_spill] sm:$0xff] }
 0x414   : > { %v2707_v1 = vadd.f32 %v2706_v58, %v8376_v63  ;;  %v2928_v12 = vadd.f32 %v2927_v5, %v8378_v19  ;;  %v2744_v8 = vadd.f32 %v2743_v49, %v8379_v41  ;;  %v2781_v17 = vadd.f32 %v2780_v0, %v8380_v59  ;;  %v8382_v35 = vld [vmem:[#allocation34_spill] sm:$0xff]  ;;  %v8384_v44 = vld [vmem:[#allocation32_spill] sm:$0xff]  ;;  %v8386_v40 = vld [vmem:[#allocation157_spill] sm:$0xff] }
 0x415   : > { %v2818_v21 = vadd.f32 %v2817_v52, %v6152_v18  ;;  %v2855_v45 = vadd.f32 %v2854_v2, %v6156_v26  ;;  %v2671_v32 = vadd.f32 %v2670_v37, %v8381_v57  ;;  %v2892_v61 = vadd.f32 %v2891_v42, %v8383_v34  ;;  %v8387_v46 = vld [vmem:[#allocation158_spill] sm:$0xff]  ;;  %v8388_v11 = vld [vmem:[#allocation36_spill] sm:$0xff]  ;;  %v8389_v55 = vld [vmem:[#allocation37_spill] sm:$0xff] }
 0x416   : > { %v2708_v62 = vadd.f32 %v2707_v1, %v8382_v35  ;;  %v2929_v14 = vadd.f32 %v2928_v12, %v8384_v44  ;;  %v2745_v33 = vadd.f32 %v2744_v8, %v8385_v53  ;;  %v2782_v54 = vadd.f32 %v2781_v17, %v6192_v30  ;;  %v8390_v24 = vld [vmem:[#allocation159_spill] sm:$0xff]  ;;  %v8391_v36 = vld [vmem:[#allocation160_spill] sm:$0xff]  ;;  %v8392_v4 = vld [vmem:[#allocation38_spill] sm:$0xff] }
 0x417   : > { %v2819_v7 = vadd.f32 %v2818_v21, %v8386_v40  ;;  %v2856_v15 = vadd.f32 %v2855_v45, %v8387_v46  ;;  %v2672_v18 = vadd.f32 %v2671_v32, %v8388_v11  ;;  %v2893_v48 = vadd.f32 %v2892_v61, %v8390_v24  ;;  %v8393_v51 = vld [vmem:[#allocation162_spill] sm:$0xff]  ;;  %v8394_v49 = vld [vmem:[#allocation163_spill] sm:$0xff]  ;;  %v8395_v50 = vld [vmem:[#allocation41_spill] sm:$0xff] }
 0x418   : > { %v2709_v26 = vadd.f32 %v2708_v62, %v8389_v55  ;;  %v2930_v58 = vadd.f32 %v2929_v14, %v8391_v36  ;;  %v2746_v31 = vadd.f32 %v2745_v33, %v8392_v4  ;;  %v2783_v5 = vadd.f32 %v2782_v54, %v8393_v51  ;;  %v8396_v25 = vld [vmem:[#allocation42_spill] sm:$0xff]  ;;  %v8397_v38 = vld [vmem:[#allocation164_spill] sm:$0xff]  ;;  %v8399_v63 = vld [vmem:[#allocation43_spill] sm:$0xff] }
 0x419   : > { %v2820_v10 = vadd.f32 %v2819_v7, %v6228_v47  ;;  %v2857_v30 = vadd.f32 %v2856_v15, %v8394_v49  ;;  %v2673_v0 = vadd.f32 %v2672_v18, %v8395_v50  ;;  %v2894_v2 = vadd.f32 %v2893_v48, %v8397_v38  ;;  %v8398_v20 = vld [vmem:[#allocation40_spill] sm:$0xff]  ;;  %v8400_v6 = vld [vmem:[#allocation165_spill] sm:$0xff]  ;;  %v8401_v12 = vld [vmem:[#allocation166_spill] sm:$0xff] }
 0x41a   : > { %v2710_v52 = vadd.f32 %v2709_v26, %v8396_v25  ;;  %v2931_v37 = vadd.f32 %v2930_v58, %v8398_v20  ;;  %v2747_v1 = vadd.f32 %v2746_v31, %v8399_v63  ;;  %v2784_v42 = vadd.f32 %v2783_v5, %v8400_v6  ;;  %v8402_v8 = vld [vmem:[#allocation44_spill] sm:$0xff]  ;;  %v8403_v59 = vld [vmem:[#allocation45_spill] sm:$0xff]  ;;  %v8404_v21 = vld [vmem:[#allocation167_spill] sm:$0xff] }
 0x41b   : > { %v2821_v19 = vadd.f32 %v2820_v10, %v6260_v60  ;;  %v2858_v41 = vadd.f32 %v2857_v30, %v8401_v12  ;;  %v2674_v47 = vadd.f32 %v2673_v0, %v8402_v8  ;;  %v2895_v45 = vadd.f32 %v2894_v2, %v8404_v21  ;;  %v8405_v57 = vld [vmem:[#allocation168_spill] sm:$0xff]  ;;  %v8406_v35 = vld [vmem:[#allocation46_spill] sm:$0xff]  ;;  %v8408_v14 = vld [vmem:[#allocation171_spill] sm:$0xff] }
 0x41c   : > { %v2711_v17 = vadd.f32 %v2710_v52, %v8403_v59  ;;  %v2932_v32 = vadd.f32 %v2931_v37, %v8405_v57  ;;  %v2748_v62 = vadd.f32 %v2747_v1, %v8406_v35  ;;  %v8407_v34 = vld [vmem:[#allocation170_spill] sm:$0xff]  ;;  %v8409_v33 = vld [vmem:[#allocation49_spill] sm:$0xff]  ;;  %v8411_v7 = vld [vmem:[#allocation172_spill] sm:$0xff] }
 0x41d   : > { %v2785_v61 = vadd.f32 %v2784_v42, %v8407_v34  ;;  %v2822_v44 = vadd.f32 %v2821_v19, %v6292_v13  ;;  %v2859_v53 = vadd.f32 %v2858_v41, %v8408_v14  ;;  %v2675_v60 = vadd.f32 %v2674_v47, %v8409_v33  ;;  %v8410_v54 = vld [vmem:[#allocation50_spill] sm:$0xff]  ;;  %v8412_v15 = vld [vmem:[#allocation48_spill] sm:$0xff]  ;;  %v8413_v18 = vld [vmem:[#allocation51_spill] sm:$0xff] }
 0x41e   : > { %v2712_v40 = vadd.f32 %v2711_v17, %v8410_v54  ;;  %v2896_v46 = vadd.f32 %v2895_v45, %v8411_v7  ;;  %v2933_v11 = vadd.f32 %v2932_v32, %v8412_v15  ;;  %v2749_v55 = vadd.f32 %v2748_v62, %v8413_v18  ;;  %v8414_v26 = vld [vmem:[#allocation173_spill] sm:$0xff]  ;;  %v8415_v36 = vld [vmem:[#allocation174_spill] sm:$0xff]  ;;  %v8416_v4 = vld [vmem:[#allocation52_spill] sm:$0xff] }
 0x41f   : > { %v2786_v24 = vadd.f32 %v2785_v61, %v8414_v26  ;;  %v2823_v48 = vadd.f32 %v2822_v44, %v6324_v27  ;;  %v2860_v58 = vadd.f32 %v2859_v53, %v8415_v36  ;;  %v2676_v13 = vadd.f32 %v2675_v60, %v8416_v4  ;;  %v8417_v31 = vld [vmem:[#allocation53_spill] sm:$0xff]  ;;  %v8418_v5 = vld [vmem:[#allocation175_spill] sm:$0xff]  ;;  %v8419_v49 = vld [vmem:[#allocation176_spill] sm:$0xff] }
 0x420   : > { %v2713_v51 = vadd.f32 %v2712_v40, %v8417_v31  ;;  %v2897_v10 = vadd.f32 %v2896_v46, %v8418_v5  ;;  %v2934_v30 = vadd.f32 %v2933_v11, %v8419_v49  ;;  %v8420_v50 = vld [vmem:[#allocation54_spill] sm:$0xff]  ;;  %v8421_v25 = vld [vmem:[#allocation177_spill] sm:$0xff]  ;;  %v8423_v37 = vld [vmem:[#allocation56_spill] sm:$0xff] }
 0x421   : > { %v2750_v0 = vadd.f32 %v2749_v55, %v8420_v50  ;;  %v2787_v52 = vadd.f32 %v2786_v24, %v8421_v25  ;;  %v2824_v38 = vadd.f32 %v2823_v48, %v6356_v39  ;;  %v8422_v2 = vld [vmem:[#allocation178_spill] sm:$0xff]  ;;  %v2677_v27 = vadd.f32 %v2676_v13, %v8423_v37  ;;  %v8424_v63 = vld [vmem:[#allocation57_spill] sm:$0xff]  ;;  %v8425_v6 = vld [vmem:[#allocation179_spill] sm:$0xff] }
 0x422   : > { %v2861_v20 = vadd.f32 %v2860_v58, %v8422_v2  ;;  %v2714_v1 = vadd.f32 %v2713_v51, %v8424_v63  ;;  %v2898_v42 = vadd.f32 %v2897_v10, %v8425_v6  ;;  %v8426_v19 = vld [vmem:[#allocation180_spill] sm:$0xff]  ;;  %v8427_v41 = vld [vmem:[#allocation58_spill] sm:$0xff]  ;;  %v8428_v47 = vld [vmem:[#allocation181_spill] sm:$0xff] }
 0x423   : > { %v2935_v12 = vadd.f32 %v2934_v30, %v8426_v19  ;;  %v2751_v8 = vadd.f32 %v2750_v0, %v8427_v41  ;;  %v2788_v59 = vadd.f32 %v2787_v52, %v8428_v47  ;;  %v2825_v17 = vadd.f32 %v2824_v38, %v6388_v23  ;;  %v8429_v21 = vld [vmem:[#allocation182_spill] sm:$0xff]  ;;  %v8430_v57 = vld [vmem:[#allocation60_spill] sm:$0xff]  ;;  %v8431_v32 = vld [vmem:[#allocation61_spill] sm:$0xff] }
 0x424   : > { %v2862_v45 = vadd.f32 %v2861_v20, %v8429_v21  ;;  %v2678_v39 = vadd.f32 %v2677_v27, %v8430_v57  ;;  %v2715_v35 = vadd.f32 %v2714_v1, %v8431_v32  ;;  %v8432_v62 = vld [vmem:[#allocation183_spill] sm:$0xff]  ;;  %v8433_v61 = vld [vmem:[#allocation184_spill] sm:$0xff]  ;;  %v8434_v14 = vld [vmem:[#allocation62_spill] sm:$0xff] }
 0x425   : > { %v2899_v34 = vadd.f32 %v2898_v42, %v8432_v62  ;;  %v2936_v44 = vadd.f32 %v2935_v12, %v8433_v61  ;;  %v2752_v53 = vadd.f32 %v2751_v8, %v8434_v14  ;;  %v8435_v33 = vld [vmem:[#allocation186_spill] sm:$0xff]  ;;  %v2826_v54 = vadd.f32 %v2825_v17, %v6420_v28  ;;  %v8436_v40 = vld [vmem:[#allocation187_spill] sm:$0xff]  ;;  %v8439_v18 = vld [vmem:[#allocation188_spill] sm:$0xff] }
 0x426   : > { %v2789_v60 = vadd.f32 %v2788_v59, %v8435_v33  ;;  %v2863_v7 = vadd.f32 %v2862_v45, %v8436_v40  ;;  %v8437_v46 = vld [vmem:[#allocation66_spill] sm:$0xff]  ;;  %v8438_v15 = vld [vmem:[#allocation67_spill] sm:$0xff]  ;;  %v8440_v26 = vld [vmem:[#allocation64_spill] sm:$0xff] }
 0x427   : > { %v2679_v23 = vadd.f32 %v2678_v39, %v8437_v46  ;;  %v2716_v11 = vadd.f32 %v2715_v35, %v8438_v15  ;;  %v2900_v55 = vadd.f32 %v2899_v34, %v8439_v18  ;;  %v2937_v24 = vadd.f32 %v2936_v44, %v8440_v26  ;;  %v8441_v48 = vld [vmem:[#allocation189_spill] sm:$0xff]  ;;  %v8442_v58 = vld [vmem:[#allocation190_spill] sm:$0xff]  ;;  %v8443_v31 = vld [vmem:[#allocation191_spill] sm:$0xff] }
 0x428   : > { %v2753_v36 = vadd.f32 %v2752_v53, %v8441_v48  ;;  %v2790_v4 = vadd.f32 %v2789_v60, %v8442_v58  ;;  %v2827_v13 = vadd.f32 %v2826_v54, %v6452_v9  ;;  %v2864_v51 = vadd.f32 %v2863_v7, %v8443_v31  ;;  %v8444_v5 = vld [vmem:[#allocation69_spill] sm:$0xff]  ;;  %v8445_v10 = vld [vmem:[#allocation71_spill] sm:$0xff]  ;;  %v8446_v30 = vld [vmem:[#allocation192_spill] sm:$0xff] }
 0x429   : > { %v2680_v28 = vadd.f32 %v2679_v23, %v8444_v5  ;;  %v2717_v49 = vadd.f32 %v2716_v11, %v8445_v10  ;;  %v2901_v50 = vadd.f32 %v2900_v55, %v8446_v30  ;;  %v8447_v0 = vld [vmem:[#allocation68_spill] sm:$0xff]  ;;  %v8448_v52 = vld [vmem:[#allocation193_spill] sm:$0xff]  ;;  %v8449_v2 = vld [vmem:[#allocation194_spill] sm:$0xff] }
 0x42a   : > { %v2938_v25 = vadd.f32 %v2937_v24, %v8447_v0  ;;  %v2754_v38 = vadd.f32 %v2753_v36, %v8448_v52  ;;  %v2791_v20 = vadd.f32 %v2790_v4, %v8449_v2  ;;  %v2828_v37 = vadd.f32 %v2827_v13, %v6484_v29  ;;  %v8450_v27 = vld [vmem:[#allocation195_spill] sm:$0xff]  ;;  %v8451_v1 = vld [vmem:[#allocation73_spill] sm:$0xff]  ;;  %v8453_v19 = vld [vmem:[#allocation196_spill] sm:$0xff] }
 0x42b   : > { %v2865_v63 = vadd.f32 %v2864_v51, %v8450_v27  ;;  %v2681_v9 = vadd.f32 %v2680_v28, %v8451_v1  ;;  %v8452_v6 = vld [vmem:[#allocation75_spill] sm:$0xff]  ;;  %v2902_v12 = vadd.f32 %v2901_v50, %v8453_v19  ;;  %v8454_v41 = vld [vmem:[#allocation72_spill] sm:$0xff]  ;;  %v8455_v47 = vld [vmem:[#allocation197_spill] sm:$0xff] }
 0x42c   : > { %v2718_v42 = vadd.f32 %v2717_v49, %v8452_v6  ;;  %v2939_v8 = vadd.f32 %v2938_v25, %v8454_v41  ;;  %v2755_v59 = vadd.f32 %v2754_v38, %v8455_v47  ;;  %v8456_v17 = vld [vmem:[#allocation198_spill] sm:$0xff]  ;;  %v2829_v45 = vadd.f32 %v2828_v37, %v6516_v56  ;;  %v8457_v57 = vld [vmem:[#allocation199_spill] sm:$0xff]  ;;  %v8458_v32 = vld [vmem:[#allocation77_spill] sm:$0xff] }
 0x42d   : > { %v2792_v21 = vadd.f32 %v2791_v20, %v8456_v17  ;;  %v2866_v39 = vadd.f32 %v2865_v63, %v8457_v57  ;;  %v2682_v29 = vadd.f32 %v2681_v9, %v8458_v32  ;;  %v8459_v35 = vld [vmem:[#allocation79_spill] sm:$0xff]  ;;  %v8460_v34 = vld [vmem:[#allocation200_spill] sm:$0xff]  ;;  %v8462_v53 = vld [vmem:[#allocation201_spill] sm:$0xff] }
 0x42e   : > { %v2719_v62 = vadd.f32 %v2718_v42, %v8459_v35  ;;  %v2903_v61 = vadd.f32 %v2902_v12, %v8460_v34  ;;  %v8461_v44 = vld [vmem:[#allocation76_spill] sm:$0xff]  ;;  %v2756_v33 = vadd.f32 %v2755_v59, %v8462_v53  ;;  %v8463_v60 = vld [vmem:[#allocation202_spill] sm:$0xff]  ;;  %v2830_v40 = vadd.f32 %v2829_v45, %v6548_v22  ;;  %v8464_v7 = vld [vmem:[#allocation203_spill] sm:$0xff] }
 0x42f   : > { %v2940_v14 = vadd.f32 %v2939_v8, %v8461_v44  ;;  %v2793_v54 = vadd.f32 %v2792_v21, %v8463_v60  ;;  %v2867_v46 = vadd.f32 %v2866_v39, %v8464_v7  ;;  %v8465_v23 = vld [vmem:[#allocation81_spill] sm:$0xff]  ;;  %v8466_v15 = vld [vmem:[#allocation83_spill] sm:$0xff]  ;;  %v8467_v18 = vld [vmem:[#allocation204_spill] sm:$0xff] }
 0x430   : > { %v2683_v56 = vadd.f32 %v2682_v29, %v8465_v23  ;;  %v2720_v11 = vadd.f32 %v2719_v62, %v8466_v15  ;;  %v2904_v55 = vadd.f32 %v2903_v61, %v8467_v18  ;;  %v8468_v26 = vld [vmem:[#allocation80_spill] sm:$0xff]  ;;  %v8469_v48 = vld [vmem:[#allocation205_spill] sm:$0xff]  ;;  %v8470_v58 = vld [vmem:[#allocation206_spill] sm:$0xff] }
 0x431   : > { %v2941_v24 = vadd.f32 %v2940_v14, %v8468_v26  ;;  %v2757_v36 = vadd.f32 %v2756_v33, %v8469_v48  ;;  %v2794_v4 = vadd.f32 %v2793_v54, %v8470_v58  ;;  %v8471_v13 = vld [vmem:[#allocation207_spill] sm:$0xff]  ;;  %v8472_v51 = vld [vmem:[#allocation208_spill] sm:$0xff]  ;;  %v8474_v10 = vld [vmem:[#allocation209_spill] sm:$0xff] }
 0x432   : > { %v2831_v31 = vadd.f32 %v2830_v40, %v8471_v13  ;;  %v2868_v5 = vadd.f32 %v2867_v46, %v8472_v51  ;;  %v8473_v28 = vld [vmem:[#allocation87_spill] sm:$0xff]  ;;  %v2721_v49 = vadd.f32 %v2720_v11, %v8474_v10  ;;  %v8475_v30 = vld [vmem:[#allocation84_spill] sm:$0xff]  ;;  %v8476_v0 = vld [vmem:[#allocation85_spill] sm:$0xff] }
 0x433   : > { %v2684_v22 = vadd.f32 %v2683_v56, %v8473_v28  ;;  %v2905_v50 = vadd.f32 %v2904_v55, %v8475_v30  ;;  %v2942_v25 = vadd.f32 %v2941_v24, %v8476_v0  ;;  %v8477_v52 = vld [vmem:[#allocation210_spill] sm:$0xff]  ;;  %v8478_v2 = vld [vmem:[#allocation211_spill] sm:$0xff]  ;;  %v8479_v37 = vld [vmem:[#allocation212_spill] sm:$0xff] }
 0x434   : > { %v2758_v38 = vadd.f32 %v2757_v36, %v8477_v52  ;;  %v2795_v20 = vadd.f32 %v2794_v4, %v8478_v2  ;;  %v2832_v27 = vadd.f32 %v2831_v31, %v8479_v37  ;;  %v8480_v63 = vld [vmem:[#allocation88_spill] sm:$0xff]  ;;  %v8481_v9 = vld [vmem:[#allocation213_spill] sm:$0xff]  ;;  %v8482_v42 = vld [vmem:[#allocation214_spill] sm:$0xff] }
 0x435   : > { %v2869_v1 = vadd.f32 %v2868_v5, %v8480_v63  ;;  %v2685_v6 = vadd.f32 %v2684_v22, %v8481_v9  ;;  %v2722_v19 = vadd.f32 %v2721_v49, %v8482_v42  ;;  %v8483_v12 = vld [vmem:[#allocation89_spill] sm:$0xff]  ;;  %v8484_v8 = vld [vmem:[#allocation91_spill] sm:$0xff]  ;;  %v8486_v21 = vld [vmem:[#allocation216_spill] sm:$0xff] }
 0x436   : > { %v2906_v41 = vadd.f32 %v2905_v50, %v8483_v12  ;;  %v2943_v47 = vadd.f32 %v2942_v25, %v8484_v8  ;;  %v8485_v59 = vld [vmem:[#allocation215_spill] sm:$0xff]  ;;  %v2796_v45 = vadd.f32 %v2795_v20, %v8486_v21  ;;  %v8487_v57 = vld [vmem:[#allocation92_spill] sm:$0xff]  ;;  %v8488_v32 = vld [vmem:[#allocation93_spill] sm:$0xff] }
 0x437   : > { %v2759_v17 = vadd.f32 %v2758_v38, %v8485_v59  ;;  %v2833_v39 = vadd.f32 %v2832_v27, %v8487_v57  ;;  %v2870_v29 = vadd.f32 %v2869_v1, %v8488_v32  ;;  %v8489_v35 = vld [vmem:[#allocation218_spill] sm:$0xff]  ;;  %v8490_v34 = vld [vmem:[#allocation219_spill] sm:$0xff]  ;;  %v8492_v53 = vld [vmem:[#allocation217_spill] sm:$0xff] }
 0x438   : > { %v2686_v62 = vadd.f32 %v2685_v6, %v8489_v35  ;;  %v2723_v61 = vadd.f32 %v2722_v19, %v8490_v34  ;;  %v8491_v44 = vld [vmem:[#allocation95_spill] sm:$0xff]  ;;  %v2944_v33 = vadd.f32 %v2943_v47, %v8492_v53  ;;  %v8493_v60 = vld [vmem:[#allocation220_spill] sm:$0xff]  ;;  %v8495_v46 = vld [vmem:[#allocation97_spill] sm:$0xff] }
 0x439   : > { %v2907_v14 = vadd.f32 %v2906_v41, %v8491_v44  ;;  %v2760_v54 = vadd.f32 %v2759_v17, %v8493_v60  ;;  %v8494_v40 = vld [vmem:[#allocation96_spill] sm:$0xff]  ;;  %v2834_v23 = vadd.f32 %v2833_v39, %v8495_v46  ;;  %v8496_v56 = vld [vmem:[#allocation99_spill] sm:$0xff]  ;;  %v8499_v24 = vld [vmem:[#allocation221_spill] sm:$0xff] }
 0x43a   : > { %v2797_v7 = vadd.f32 %v2796_v45, %v8494_v40  ;;  %v2871_v15 = vadd.f32 %v2870_v29, %v8496_v56  ;;  %v8497_v11 = vld [vmem:[#allocation223_spill] sm:$0xff]  ;;  %v8498_v55 = vld [vmem:[#allocation224_spill] sm:$0xff]  ;;  %v8500_v36 = vld [vmem:[#allocation222_spill] sm:$0xff] }
 0x43b   : > { %v2687_v18 = vadd.f32 %v2686_v62, %v8497_v11  ;;  %v2724_v26 = vadd.f32 %v2723_v61, %v8498_v55  ;;  %v2908_v48 = vadd.f32 %v2907_v14, %v8499_v24  ;;  %v2945_v58 = vadd.f32 %v2944_v33, %v8500_v36  ;;  %v8501_v4 = vld [vmem:[#allocation100_spill] sm:$0xff]  ;;  %v8502_v31 = vld [vmem:[#allocation101_spill] sm:$0xff]  ;;  %v8503_v5 = vld [vmem:[#allocation103_spill] sm:$0xff] }
 0x43c   : > { %v2761_v13 = vadd.f32 %v2760_v54, %v8501_v4  ;;  %v2798_v51 = vadd.f32 %v2797_v7, %v8502_v31  ;;  %v2835_v28 = vadd.f32 %v2834_v23, %v8503_v5  ;;  %v8504_v22 = vld [vmem:[#allocation225_spill] sm:$0xff]  ;;  %v8505_v49 = vld [vmem:[#allocation228_spill] sm:$0xff]  ;;  %v8507_v25 = vld [vmem:[#allocation226_spill] sm:$0xff] }
 0x43d   : > { %v2872_v10 = vadd.f32 %v2871_v15, %v8504_v22  ;;  %v2688_v30 = vadd.f32 %v2687_v18, %v8505_v49  ;;  %v8506_v50 = vld [vmem:[#allocation104_spill] sm:$0xff]  ;;  %v2909_v52 = vadd.f32 %v2908_v48, %v8507_v25  ;;  %v8508_v38 = vld [vmem:[#allocation227_spill] sm:$0xff]  ;;  %v8509_v20 = vld [vmem:[#allocation105_spill] sm:$0xff] }
 0x43e   : > { %v2725_v0 = vadd.f32 %v2724_v26, %v8506_v50  ;;  %v2946_v2 = vadd.f32 %v2945_v58, %v8508_v38  ;;  %v2762_v37 = vadd.f32 %v2761_v13, %v8509_v20  ;;  %v8510_v27 = vld [vmem:[#allocation107_spill] sm:$0xff]  ;;  %v8511_v1 = vld [vmem:[#allocation229_spill] sm:$0xff]  ;;  %v8512_v6 = vld [vmem:[#allocation230_spill] sm:$0xff] }
 0x43f   : > { %v2799_v63 = vadd.f32 %v2798_v51, %v8510_v27  ;;  %v2836_v9 = vadd.f32 %v2835_v28, %v8511_v1  ;;  %v2873_v42 = vadd.f32 %v2872_v10, %v8512_v6  ;;  %v8513_v19 = vld [vmem:[#allocation108_spill] sm:$0xff]  ;;  %v8514_v41 = vld [vmem:[#allocation109_spill] sm:$0xff]  ;;  %v8515_v47 = vld [vmem:[#allocation231_spill] sm:$0xff] }
 0x440   : > { %v2689_v12 = vadd.f32 %v2688_v30, %v8513_v19  ;;  %v2726_v8 = vadd.f32 %v2725_v0, %v8514_v41  ;;  %v2910_v59 = vadd.f32 %v2909_v52, %v8515_v47  ;;  %v8516_v17 = vld [vmem:[#allocation232_spill] sm:$0xff]  ;;  %v8517_v45 = vld [vmem:[#allocation111_spill] sm:$0xff]  ;;  %v8518_v39 = vld [vmem:[#allocation233_spill] sm:$0xff] }
 0x441   : > { %v2947_v21 = vadd.f32 %v2946_v2, %v8516_v17  ;;  %v2763_v57 = vadd.f32 %v2762_v37, %v8517_v45  ;;  %v2800_v32 = vadd.f32 %v2799_v63, %v8518_v39  ;;  %v8519_v29 = vld [vmem:[#allocation234_spill] sm:$0xff]  ;;  %v8520_v62 = vld [vmem:[#allocation235_spill] sm:$0xff]  ;;  %v8521_v61 = vld [vmem:[#allocation113_spill] sm:$0xff] }
 0x442   : > { %v2837_v35 = vadd.f32 %v2836_v9, %v8519_v29  ;;  %v2874_v34 = vadd.f32 %v2873_v42, %v8520_v62  ;;  %v2690_v44 = vadd.f32 %v2689_v12, %v8521_v61  ;;  %v8522_v14 = vld [vmem:[#allocation114_spill] sm:$0xff]  ;;  %v8523_v33 = vld [vmem:[#allocation236_spill] sm:$0xff]  ;;  %v8525_v46 = vld [vmem:[#allocation115_spill] sm:$0xff] }
 0x443   : > { %v2727_v53 = vadd.f32 %v2726_v8, %v8522_v14  ;;  %v2911_v60 = vadd.f32 %v2910_v59, %v8523_v33  ;;  %v8524_v54 = vld [vmem:[#allocation112_spill] sm:$0xff]  ;;  %v2764_v7 = vadd.f32 %v2763_v57, %v6796_v3  ;;  %v2801_v23 = vadd.f32 %v2800_v32, %v8525_v46  ;;  %v8526_v55 = vld [vmem:[#allocation237_spill] sm:$0xff]  ;;  %v8527_v24 = vld [vmem:[#allocation238_spill] sm:$0xff] }
 0x444   : > { %v2948_v40 = vadd.f32 %v2947_v21, %v8524_v54  ;;  %v2838_v56 = vadd.f32 %v2837_v35, %v6804_v16  ;;  %v2875_v15 = vadd.f32 %v2874_v34, %v6808_v43  ;;  %v2691_v11 = vrot.slane %v2690_v44, 4 }
 0x445   : > { %v2728_v18 = vrot.slane %v2727_v53, 4  ;;  %v2912_v26 = vadd.f32 %v2911_v60, %v8526_v55  ;;  %v2765_v36 = vrot.slane %v2764_v7, 4  ;;  %v2802_v58 = vrot.slane %v2801_v23, 4 }
 0x446   : > { %v2949_v48 = vadd.f32 %v2948_v40, %v8527_v24  ;;  %v2839_v4 = vrot.slane %v2838_v56, 4  ;;  %v2876_v13 = vrot.slane %v2875_v15, 4  ;;  %v2692_v31 = vadd.f32 %v2691_v11, %v2690_v44 }
 0x447   : > { %v2729_v51 = vadd.f32 %v2728_v18, %v2727_v53  ;;  %v2913_v5 = vrot.slane %v2912_v26, 4  ;;  %v2766_v28 = vadd.f32 %v2765_v36, %v2764_v7  ;;  %v2803_v22 = vadd.f32 %v2802_v58, %v2801_v23 }
 0x448   : > { %v2950_v3 = vrot.slane %v2949_v48, 4  ;;  %v2840_v10 = vadd.f32 %v2839_v4, %v2838_v56  ;;  %v2877_v16 = vadd.f32 %v2876_v13, %v2875_v15  ;;  %v2693_v49 = vrot.slane %v2692_v31, 2  ;;  %v2403_v56 = vld [vmem:[#allocation10] sm:$0xff] }
 0x449   : > { %v2730_v43 = vrot.slane %v2729_v51, 2  ;;  %v2914_v30 = vadd.f32 %v2913_v5, %v2912_v26  ;;  %v2767_v0 = vrot.slane %v2766_v28, 2  ;;  %v2804_v25 = vrot.slane %v2803_v22, 2 }
 0x44a   : > { %v2951_v50 = vadd.f32 %v2950_v3, %v2949_v48  ;;  %v2841_v52 = vrot.slane %v2840_v10, 2  ;;  %v2878_v38 = vrot.slane %v2877_v16, 2  ;;  %v2694_v2 = vadd.f32 %v2693_v49, %v2692_v31 }
 0x44b   : > { %v2731_v20 = vadd.f32 %v2730_v43, %v2729_v51  ;;  %v2915_v37 = vrot.slane %v2914_v30, 2  ;;  %v2768_v63 = vadd.f32 %v2767_v0, %v2766_v28  ;;  %v2805_v1 = vadd.f32 %v2804_v25, %v2803_v22 }
 0x44c   : > { %v2952_v27 = vrot.slane %v2951_v50, 2  ;;  %v2842_v9 = vadd.f32 %v2841_v52, %v2840_v10  ;;  %v2879_v6 = vadd.f32 %v2878_v38, %v2877_v16  ;;  %v2695_v42 = vrot.slane %v2694_v2, 1 }
 0x44d   : > { %v2732_v19 = vrot.slane %v2731_v20, 1  ;;  %v2916_v12 = vadd.f32 %v2915_v37, %v2914_v30  ;;  %v2769_v8 = vrot.slane %v2768_v63, 1  ;;  %v2806_v47 = vrot.slane %v2805_v1, 1 }
 0x44e   : > { %v2953_v41 = vadd.f32 %v2952_v27, %v2951_v50  ;;  %v2843_v59 = vrot.slane %v2842_v9, 1  ;;  %v2880_v17 = vrot.slane %v2879_v6, 1  ;;  %v2696_v21 = vadd.f32 %v2695_v42, %v2694_v2 }
 0x44f   : > { %v2733_v45 = vadd.f32 %v2732_v19, %v2731_v20  ;;  %v2917_v57 = vrot.slane %v2916_v12, 1  ;;  %v2770_v32 = vadd.f32 %v2769_v8, %v2768_v63  ;;  %v2807_v29 = vadd.f32 %v2806_v47, %v2805_v1 }
 0x450   : > { %v2954_v39 = vrot.slane %v2953_v41, 1  ;;  %v2844_v35 = vadd.f32 %v2843_v59, %v2842_v9  ;;  %v2881_v62 = vadd.f32 %v2880_v17, %v2879_v6 }
 0x451   : > { %v2918_v34 = vadd.f32 %v2917_v57, %v2916_v12  ;;  %v2964_v44 = vrot.slane %v2733_v45, 7  ;;  %v2965_v14 = vrot.slane %v2770_v32, 6  ;;  %v2966_v53 = vrot.slane %v2807_v29, 5 }
 0x452   : > { %v2955_v61 = vadd.f32 %v2954_v39, %v2953_v41  ;;  %v2967_v33 = vrot.slane %v2844_v35, 4  ;;  %v2968_v60 = vrot.slane %v2881_v62, 3 }
 0x453   : > { %v2969_v54 = vrot.slane %v2918_v34, 2  ;;  %v2971_v7 = vsel %vm2386_vm14, %v2696_v21, %v2964_v44  ;;  %v2972_v46 = vsel %vm2388_vm15, %v2965_v14, %v2966_v53 }
 0x454   : > { %v2970_v40 = vrot.slane %v2955_v61, 1  ;;  %v2974_v23 = vsel %vm2392_vm10, %v2967_v33, %v2968_v60  ;;  %v2973_v15 = vsel %vm2390_vm9, %v2971_v7, %v2972_v46 }
 0x456   : > { %v2975_v11 = vsel %vm2394_vm11, %v2969_v54, %v2970_v40 }
 0x457   : > { %v2976_v18 = vsel %vm2396_vm12, %v2974_v23, %v2975_v11 }
 0x458   : > { %v2977_v55 = vsel %vm2398_vm0, %v2973_v15, %v2976_v18 }
 0x459   : > { %v2979_v26 = vadd.f32 %v2977_v55, %v2403_v56 }
 0x45b   : > { %2980 = vst [vmem:[#allocation10] sm:$0xff] %v2979_v26 }
 0x45c   : > { %3564 = dma.vmem_to_hbm [thread:$0]  (%p8528_p10), %s3023_s7, 128, %s3025_s13, [#allocation9]  }
 0x45d   : > { %3813 = dma.done.wait (%p8529_p3), [#allocation9], 256   ;;  %p8530_p5 = pmov %p8004_p2 }
 0x45f   : > { %3815 = vsyncadd (%p8530_p5), [#allocation9], 4294967040 }
 0x460 PF: > { %s3046_s10 = sand.u32 1, %s3822_s15   ;;  %p8531_p7 = scmp.ge.s32.totalorder %s3834_s18, 2 }
 0x461   : > { %s3047_s14 = scalar_lea.sflag [#allocation4], %s3046_s10 }
 0x462   : > { %p3579_p1 = pnand %p8531_p7, %p3906_p6 }
 0x464   : > { %p3580_p2 = pneg %p3579_p1 }
 0x466   : > { %3817 = dma.done.wait (%p3580_p2), %s3047_s14, 32768  }
 0x467   : > { %3819 = vsyncadd (%p3580_p2), %s3047_s14, 4294934528  ;;  %p20_p4 = scmp.ge.s32.totalorder %s3925_s29, 4   ;;  %s8532_s15 = smov %s3826_s16 }
 0x468   : > { %s8533_s16 = smov %s3830_s17  ;;  %s8534_s17 = smov %s3935_s8 }
 0x469   : > { %s8535_s18 = smov %s3925_s29  ;;  %22 = sbr.rel (!%p20_p4) target bundleno = 7 (0x7), region = 97 }
 0x46e   :  { %3053 = vsyncpa [#allocation3], 1 }
 0x46f   :  { %3055 = vsyncpa [#allocation3 + $0x1], 1 }
 0x470   :  { %3056 = vsyncpa [#allocation6], 1 }
 0x471   :  { %3057 = vsyncpa [#allocation4], 1 }
 0x472   :  { %3059 = vsyncpa [#allocation4 + $0x1], 1 }
 0x473   :  { %3060 = vsyncpa [#allocation9], 1 }

</bundles_post_ra>
